<compile_context>
chip_gen: v6e
topology: v6e:2x2x1
jax: 0.10.0
libtpu: 0.0.40
codegen_flags: <defaults>
</compile_context>

<pallas_src>
import functools
import numpy as np
import jax
import jax.numpy as jnp
from jax.experimental import pallas as pl
from jax.experimental.pallas import tpu as pltpu


_BN_EPS = 1e-5
_BN_FOLD = 1.0 / np.sqrt(1.0 + _BN_EPS)   # BN(eval) fold: mean=0, var=1, gamma=1, beta=0
_ACT_DTYPE = jnp.bfloat16                 # activation / MXU operand dtype (f32 accumulation)

_COMPILER_PARAMS = pltpu.CompilerParams(
    dimension_semantics=("parallel",),    # batch grid -> shard across both TCs on v7x
    vmem_limit_bytes=32 * 1024 * 1024,
)


# ---------------------------------------------------------------------------
# Pallas kernels
# ---------------------------------------------------------------------------
def _make_residual_kernel(has_skip):
    """Fused Residual block on the lane-dense (H, W*C) layout.

    out = relu( conv3x3(relu(conv3x3(x))) + skip(x) ),  skip = identity or 1x1 conv+bn.
    A 3x3 'same' conv is computed as 3 banded lane-space matmuls:
        conv(x) = sum_ky  row_shift_ky(x) @ B[ky]
    where B[ky] is a host-built (W*Cin, W*Cout) block-banded matrix holding the 3 kx taps
    of kernel row ky (W-boundary zero padding is encoded by dropping out-of-range bands),
    and row_shift is a 0/1 (H, H) matmul handling the H-boundary zero padding.
    Every op is an MXU dot with bf16 operands and f32 accumulation.
    """

    def kernel(*refs):
        if has_skip:
            x_ref, sh_ref, b1_ref, b2_ref, bs_ref, o_ref = refs
        else:
            x_ref, sh_ref, b1_ref, b2_ref, o_ref = refs

        x = x_ref[0]                    # (H, W*Cin) bf16
        sd = sh_ref[0]                  # (H, H): row h <- row h-1 (zero top row)
        su = sh_ref[1]                  # (H, H): row h <- row h+1 (zero bottom row)
        f32 = jnp.float32

        def conv3x3(inp, b_ref):
            # inp: (H, W*Ci) bf16, b_ref: (3, W*Ci, W*Co) bf16  ->  (H, W*Co) f32
            dn = jnp.dot(sd, inp, preferred_element_type=f32).astype(inp.dtype)
            up = jnp.dot(su, inp, preferred_element_type=f32).astype(inp.dtype)
            acc = jnp.dot(dn, b_ref[0], preferred_element_type=f32)
            acc = acc + jnp.dot(inp, b_ref[1], preferred_element_type=f32)
            acc = acc + jnp.dot(up, b_ref[2], preferred_element_type=f32)
            return acc

        y = jnp.maximum(conv3x3(x, b1_ref), 0.0)          # conv1 + bn1 + relu (stays in VMEM)
        acc = conv3x3(y.astype(x.dtype), b2_ref)          # conv2 + bn2
        if has_skip:
            skip = jnp.dot(x, bs_ref[...], preferred_element_type=f32)   # 1x1 conv + bn skip
        else:
            skip = x.astype(f32)                                          # identity skip
        o_ref[0] = jnp.maximum(acc + skip, 0.0).astype(o_ref.dtype)

    return kernel


def apply_residual(p, x):
    """x: (N, H, W*Cin) bf16 -> (N, H, W*Cout) bf16 in a single fused pallas_call."""
    N, H, WCin = x.shape
    WCout = p['b1'].shape[2]
    has_skip = 'bs' in p

    in_specs = [
        pl.BlockSpec((1, H, WCin), lambda n: (n, 0, 0)),
        pl.BlockSpec(p['shift'].shape, lambda n: (0, 0, 0)),
        pl.BlockSpec(p['b1'].shape, lambda n: (0, 0, 0)),
        pl.BlockSpec(p['b2'].shape, lambda n: (0, 0, 0)),
    ]
    args = [x, p['shift'], p['b1'], p['b2']]
    if has_skip:
        in_specs.append(pl.BlockSpec(p['bs'].shape, lambda n: (0, 0)))
        args.append(p['bs'])

    # TODO(synk): at realistic hourglass sizes (e.g. 128x128x256) tile over H row-blocks with a
    # 1-row halo instead of whole-image blocks (v7x has only 64 MiB VMEM).
    return pl.pallas_call(
        _make_residual_kernel(has_skip),
        out_shape=jax.ShapeDtypeStruct((N, H, WCout), x.dtype),
        grid=(N,),
        in_specs=in_specs,
        out_specs=pl.BlockSpec((1, H, WCout), lambda n: (n, 0, 0)),
        compiler_params=_COMPILER_PARAMS,
    )(*args)


def _upmerge_kernel(up1_ref, low_ref, u_ref, r_ref, o_ref):
    """out = up1 + nearest_upsample_2x(low), fused.  The upsample is two 0/1 matmuls
    (width: low @ U, height: R @ .), so it stays lane-dense and never hits HBM."""
    f32 = jnp.float32
    low = low_ref[0]                                                    # (H/2, (W/2)*C) bf16
    lw = jnp.dot(low, u_ref[...], preferred_element_type=f32)          # (H/2, W*C), exact copies
    up2 = jnp.dot(r_ref[...], lw.astype(low.dtype),
                  preferred_element_type=f32)                           # (H, W*C)
    o_ref[0] = (up2 + up1_ref[0].astype(f32)).astype(o_ref.dtype)


def apply_upmerge(p, up1, low3):
    N, H, WC = up1.shape
    _, H2, W2C = low3.shape
    return pl.pallas_call(
        _upmerge_kernel,
        out_shape=jax.ShapeDtypeStruct((N, H, WC), up1.dtype),
        grid=(N,),
        in_specs=[
            pl.BlockSpec((1, H, WC), lambda n: (n, 0, 0)),
            pl.BlockSpec((1, H2, W2C), lambda n: (n, 0, 0)),
            pl.BlockSpec((W2C, WC), lambda n: (0, 0)),
            pl.BlockSpec((H, H2), lambda n: (0, 0)),
        ],
        out_specs=pl.BlockSpec((1, H, WC), lambda n: (n, 0, 0)),
        compiler_params=_COMPILER_PARAMS,
    )(up1, low3, p['U'], p['R'])


# ---------------------------------------------------------------------------
# Plain-JAX glue (cheap data shuffle)
# ---------------------------------------------------------------------------
def maxpool2x2(x, C):
    # poolingLayer(2) == MaxPool2d(2) on the fused (N, H, W*C) layout.
    N, H, WC = x.shape
    W = WC // C
    x6 = x.reshape(N, H // 2, 2, W // 2, 2, C)
    return jnp.max(x6, axis=(2, 4)).reshape(N, H // 2, (W // 2) * C)


# ---------------------------------------------------------------------------
# Parameters: deterministic synthetic init; BN folded; conv weights rewritten as banded
# lane-space matrices (host-side numpy; spatial sizes are static per hourglass level).
# ---------------------------------------------------------------------------
def _conv_weight(key, kh, kw, cin, cout):
    std = 1.0 / np.sqrt(kh * kw * cin)
    w = jax.random.normal(key, (kh, kw, cin, cout), jnp.float32) * std * _BN_FOLD
    return np.asarray(w)                      # HWIO, BN-folded, bias == 0


def _banded(w, W):
    """(KH, KW, Cin, Cout) conv weight -> (KH, W*Cin, W*Cout) banded lane-space matrices.
    'same' zero padding along W is encoded by dropping out-of-range bands."""
    KH, KW, Cin, Cout = w.shape
    B = np.zeros((KH, W * Cin, W * Cout), np.float32)
    for ky in range(KH):
        for kx in range(KW):
            dw = kx - KW // 2
            for wo in range(W):
                wi = wo + dw
                if 0 <= wi < W:
                    B[ky, wi * Cin:(wi + 1) * Cin, wo * Cout:(wo + 1) * Cout] = w[ky, kx]
    return B


def _row_shift_mats(H):
    sd = np.eye(H, k=-1, dtype=np.float32)    # (sd @ x)[h] = x[h-1], zero top row
    su = np.eye(H, k=1, dtype=np.float32)     # (su @ x)[h] = x[h+1], zero bottom row
    return np.stack([sd, su])


def _upsample_mats(H2, W2, C):
    H, W = 2 * H2, 2 * W2
    U = np.zeros((W2 * C, W * C), np.float32)
    for w in range(W):
        for c in range(C):
            U[(w // 2) * C + c, w * C + c] = 1.0
    R = np.zeros((H, H2), np.float32)
    for h in range(H):
        R[h, h // 2] = 1.0
    return U, R


def _bf16(a):
    return jnp.asarray(a, dtype=_ACT_DTYPE)


def init_residual(key, cin, cout, H, W):
    k1, k2, k3 = jax.random.split(key, 3)
    w1 = _conv_weight(k1, 3, 3, cin, cout)
    w2 = _conv_weight(k2, 3, 3, cout, cout)
    p = {
        'shift': _bf16(_row_shift_mats(H)),
        'b1': _bf16(_banded(w1, W)),
        'b2': _bf16(_banded(w2, W)),
        # f32 HWIO copies, used only by the pure-JAX reference check:
        'w1': jnp.asarray(w1), 'w2': jnp.asarray(w2),
    }
    if cin != cout:
        ws = _conv_weight(k3, 1, 1, cin, cout)
        p['bs'] = _bf16(_banded(ws, W)[0])
        p['ws'] = jnp.asarray(ws)
    return p


def init_stack(key, cin, cout, modules, H, W):            # stackLayers
    keys = jax.random.split(key, modules)
    ps = [init_residual(keys[0], cin, cout, H, W)]
    ps += [init_residual(keys[i], cout, cout, H, W) for i in range(1, modules)]
    return ps


def init_stack_revr(key, cin, cout, modules, H, W):       # stackLayersReverted
    keys = jax.random.split(key, modules)
    ps = [init_residual(keys[i], cin, cin, H, W) for i in range(modules - 1)]
    ps.append(init_residual(keys[modules - 1], cin, cout, H, W))
    return ps


def init_hourglass(key, iterations, dims, modules, H, W):
    k_up1, k_low1, k_low2, k_low3 = jax.random.split(key, 4)
    cur_dim, nxt_dim = dims[0], dims[1]
    cur_mod, nxt_mod = modules[0], modules[1]
    U, R = _upsample_mats(H // 2, W // 2, cur_dim)
    p = {
        'up1':  init_stack(k_up1, cur_dim, cur_dim, cur_mod, H, W),                  # preserveCurrentDimension
        'low1': init_stack(k_low1, cur_dim, nxt_dim, cur_mod, H // 2, W // 2),       # changeDimension
        'low3': init_stack_revr(k_low3, nxt_dim, cur_dim, cur_mod, H // 2, W // 2),  # changeDimensionBack
        'U': _bf16(U), 'R': _bf16(R),                                                # upSampling + merge kernel
    }
    if iterations > 1:
        p['low2'] = init_hourglass(k_low2, iterations - 1, dims[1:], modules[1:], H // 2, W // 2)
    else:
        p['low2'] = init_stack(k_low2, nxt_dim, nxt_dim, nxt_mod, H // 2, W // 2)    # layersCentral
    return p


# ---------------------------------------------------------------------------
# Hourglass forward (Pallas path)
# ---------------------------------------------------------------------------
def apply_stack(ps, x):
    for p in ps:
        x = apply_residual(p, x)
    return x


def apply_hourglass(p, x, iterations, dims):
    up1 = apply_stack(p['up1'], x)                   # self.preserveCurrentDimension(x)
    max1 = maxpool2x2(x, dims[0])                    # self.downSampling(x)
    low1 = apply_stack(p['low1'], max1)              # self.changeDimension(max1)
    if iterations > 1:
        low2 = apply_hourglass(p['low2'], low1, iterations - 1, dims[1:])
    else:
        low2 = apply_stack(p['low2'], low1)          # self.embeddedHourglass(low1)
    low3 = apply_stack(p['low3'], low2)              # self.changeDimensionBack(low2)
    return apply_upmerge(p, up1, low3)               # self.merge(up1, self.upSampling(low3)) fused


# ---------------------------------------------------------------------------
# Pure-JAX f32 reference (same parameters), used only for a loose correctness check.
# ---------------------------------------------------------------------------
def _ref_conv(x, w):
    return jax.lax.conv_general_dilated(x, w, (1, 1), 'SAME',
                                         dimension_numbers=('NHWC', 'HWIO', 'NHWC'))


def _ref_residual(p, x):
    y = jnp.maximum(_ref_conv(x, p['w1']), 0.0)
    skip = _ref_conv(x, p['ws']) if 'ws' in p else x
    return jnp.maximum(_ref_conv(y, p['w2']) + skip, 0.0)


def _ref_stack(ps, x):
    for p in ps:
        x = _ref_residual(p, x)
    return x


def _ref_hourglass(p, x, iterations):
    up1 = _ref_stack(p['up1'], x)
    N, H, W, C = x.shape
    max1 = jnp.max(x.reshape(N, H // 2, 2, W // 2, 2, C), axis=(2, 4))
    low1 = _ref_stack(p['low1'], max1)
    if iterations > 1:
        low2 = _ref_hourglass(p['low2'], low1, iterations - 1)
    else:
        low2 = _ref_stack(p['low2'], low1)
    low3 = _ref_stack(p['low3'], low2)
    up2 = jnp.repeat(jnp.repeat(low3, 2, axis=1), 2, axis=2)
    return up1 + up2


# ---------------------------------------------------------------------------
if __name__ == "__main__":
    key = jax.random.PRNGKey(0)
    k_param, k_x = jax.random.split(key)

    iterations = 2
    dims = (4, 8, 8)            # current dim 4, nested dims 8, 8
    modules = (1, 1, 1)
    N, C, H, W = 2, 4, 32, 32   # spatial levels 32 -> 16 -> 8

    params = init_hourglass(k_param, iterations, dims, modules, H, W)

    # PyTorch-style NCHW input; kernels run on the lane-dense fused (N, H, W*C) bf16 layout.
    x_nchw = jax.random.normal(k_x, (N, C, H, W), jnp.float32)
    x_fused = jnp.transpose(x_nchw, (0, 2, 3, 1)).reshape(N, H, W * C).astype(_ACT_DTYPE)

    fwd = jax.jit(functools.partial(apply_hourglass, iterations=iterations, dims=dims))
    y_fused = fwd(params, x_fused)
    y_nchw = jnp.transpose(y_fused.astype(jnp.float32).reshape(N, H, W, C), (0, 3, 1, 2))
    jax.block_until_ready(y_nchw)

    assert y_nchw.shape == (N, C, H, W)
    assert bool(jnp.all(jnp.isfinite(y_nchw)))

    # Loose correctness check vs. a pure-JAX f32 reference (kernel path uses bf16 MXU operands).
    x_ref = x_fused.astype(jnp.float32).reshape(N, H, W, C)
    ref_nchw = jnp.transpose(_ref_hourglass(params, x_ref, iterations), (0, 3, 1, 2))
    err = jnp.sqrt(jnp.sum((y_nchw - ref_nchw) ** 2))
    scale = jnp.maximum(jnp.sqrt(jnp.sum(ref_nchw ** 2)), 1e-6)
    rel = float(err / scale)
    assert rel < 0.1, f"relative L2 error vs reference too high: {rel:.4f}"

    print("KERNEL_OK")
</pallas_src>

<mosaic_0001>
module attributes {stable_mosaic.version = 11 : i64} {
  func.func @kernel(%arg0: i32, %arg1: memref<1x16x64xbf16, #tpu.memory_space<vmem>>, %arg2: memref<2x16x16xbf16, #tpu.memory_space<vmem>>, %arg3: memref<3x64x128xbf16, #tpu.memory_space<vmem>>, %arg4: memref<3x128x128xbf16, #tpu.memory_space<vmem>>, %arg5: memref<64x128xbf16, #tpu.memory_space<vmem>>, %arg6: memref<1x16x128xbf16, #tpu.memory_space<vmem>>) attributes {dimension_semantics = [#tpu.dimension_semantics<parallel>], iteration_bounds = array<i64: 2>, scalar_prefetch = 0 : i64, scratch_operands = 0 : i64, tpu.core_type = #tpu.core_type<tc>, window_params = [{transform_indices = @transform_0, window_bounds = array<i64: 1, 16, 64>}, {pipeline_mode = #tpu.pipeline_mode<synchronous>, transform_indices = @transform_1, window_bounds = array<i64: 2, 16, 16>}, {pipeline_mode = #tpu.pipeline_mode<synchronous>, transform_indices = @transform_2, window_bounds = array<i64: 3, 64, 128>}, {pipeline_mode = #tpu.pipeline_mode<synchronous>, transform_indices = @transform_3, window_bounds = array<i64: 3, 128, 128>}, {pipeline_mode = #tpu.pipeline_mode<synchronous>, transform_indices = @transform_4, window_bounds = array<i64: 64, 128>}, {transform_indices = @transform_5, window_bounds = array<i64: 1, 16, 128>}]} {
    %c0 = arith.constant 0 : index
    %c0_0 = arith.constant 0 : index
    %c0_1 = arith.constant 0 : index
    %0 = vector.load %arg1[%c0, %c0_0, %c0_1] : memref<1x16x64xbf16, #tpu.memory_space<vmem>>, vector<1x16x64xbf16>
    %1 = vector.shape_cast %0 : vector<1x16x64xbf16> to vector<16x64xbf16>
    %c0_2 = arith.constant 0 : index
    %c0_3 = arith.constant 0 : index
    %c0_4 = arith.constant 0 : index
    %2 = vector.load %arg2[%c0_2, %c0_3, %c0_4] : memref<2x16x16xbf16, #tpu.memory_space<vmem>>, vector<1x16x16xbf16>
    %3 = vector.shape_cast %2 : vector<1x16x16xbf16> to vector<16x16xbf16>
    %c1 = arith.constant 1 : index
    %c0_5 = arith.constant 0 : index
    %c0_6 = arith.constant 0 : index
    %4 = vector.load %arg2[%c1, %c0_5, %c0_6] : memref<2x16x16xbf16, #tpu.memory_space<vmem>>, vector<1x16x16xbf16>
    %5 = vector.shape_cast %4 : vector<1x16x16xbf16> to vector<16x16xbf16>
    %cst = arith.constant dense<0.000000e+00> : vector<16x64xf32>
    %6 = tpu.matmul %3, %1, %cst {dimension_numbers = #tpu.dot_dimension_numbers<[1], [0], [0], [1], [0, 0, 1, 1], [], []>} : vector<16x16xbf16>, vector<16x64xbf16>, vector<16x64xf32> -> vector<16x64xf32>
    %7 = arith.truncf %6 : vector<16x64xf32> to vector<16x64xbf16>
    %cst_7 = arith.constant dense<0.000000e+00> : vector<16x64xf32>
    %8 = tpu.matmul %5, %1, %cst_7 {dimension_numbers = #tpu.dot_dimension_numbers<[1], [0], [0], [1], [0, 0, 1, 1], [], []>} : vector<16x16xbf16>, vector<16x64xbf16>, vector<16x64xf32> -> vector<16x64xf32>
    %9 = arith.truncf %8 : vector<16x64xf32> to vector<16x64xbf16>
    %c0_8 = arith.constant 0 : index
    %c0_9 = arith.constant 0 : index
    %c0_10 = arith.constant 0 : index
    %10 = vector.load %arg3[%c0_8, %c0_9, %c0_10] : memref<3x64x128xbf16, #tpu.memory_space<vmem>>, vector<1x64x128xbf16>
    %11 = vector.shape_cast %10 : vector<1x64x128xbf16> to vector<64x128xbf16>
    %cst_11 = arith.constant dense<0.000000e+00> : vector<16x128xf32>
    %12 = tpu.matmul %7, %11, %cst_11 {dimension_numbers = #tpu.dot_dimension_numbers<[1], [0], [0], [1], [0, 0, 1, 1], [], []>} : vector<16x64xbf16>, vector<64x128xbf16>, vector<16x128xf32> -> vector<16x128xf32>
    %c1_12 = arith.constant 1 : index
    %c0_13 = arith.constant 0 : index
    %c0_14 = arith.constant 0 : index
    %13 = vector.load %arg3[%c1_12, %c0_13, %c0_14] : memref<3x64x128xbf16, #tpu.memory_space<vmem>>, vector<1x64x128xbf16>
    %14 = vector.shape_cast %13 : vector<1x64x128xbf16> to vector<64x128xbf16>
    %cst_15 = arith.constant dense<0.000000e+00> : vector<16x128xf32>
    %15 = tpu.matmul %1, %14, %cst_15 {dimension_numbers = #tpu.dot_dimension_numbers<[1], [0], [0], [1], [0, 0, 1, 1], [], []>} : vector<16x64xbf16>, vector<64x128xbf16>, vector<16x128xf32> -> vector<16x128xf32>
    %16 = arith.addf %12, %15 : vector<16x128xf32>
    %c2 = arith.constant 2 : index
    %c0_16 = arith.constant 0 : index
    %c0_17 = arith.constant 0 : index
    %17 = vector.load %arg3[%c2, %c0_16, %c0_17] : memref<3x64x128xbf16, #tpu.memory_space<vmem>>, vector<1x64x128xbf16>
    %18 = vector.shape_cast %17 : vector<1x64x128xbf16> to vector<64x128xbf16>
    %cst_18 = arith.constant dense<0.000000e+00> : vector<16x128xf32>
    %19 = tpu.matmul %9, %18, %cst_18 {dimension_numbers = #tpu.dot_dimension_numbers<[1], [0], [0], [1], [0, 0, 1, 1], [], []>} : vector<16x64xbf16>, vector<64x128xbf16>, vector<16x128xf32> -> vector<16x128xf32>
    %20 = arith.addf %16, %19 : vector<16x128xf32>
    %cst_19 = arith.constant 0.000000e+00 : f32
    %21 = vector.broadcast %cst_19 : f32 to vector<16x128xf32>
    %22 = arith.maximumf %20, %21 : vector<16x128xf32>
    %23 = arith.truncf %22 : vector<16x128xf32> to vector<16x128xbf16>
    %cst_20 = arith.constant dense<0.000000e+00> : vector<16x128xf32>
    %24 = tpu.matmul %3, %23, %cst_20 {dimension_numbers = #tpu.dot_dimension_numbers<[1], [0], [0], [1], [0, 0, 1, 1], [], []>} : vector<16x16xbf16>, vector<16x128xbf16>, vector<16x128xf32> -> vector<16x128xf32>
    %25 = arith.truncf %24 : vector<16x128xf32> to vector<16x128xbf16>
    %cst_21 = arith.constant dense<0.000000e+00> : vector<16x128xf32>
    %26 = tpu.matmul %5, %23, %cst_21 {dimension_numbers = #tpu.dot_dimension_numbers<[1], [0], [0], [1], [0, 0, 1, 1], [], []>} : vector<16x16xbf16>, vector<16x128xbf16>, vector<16x128xf32> -> vector<16x128xf32>
    %27 = arith.truncf %26 : vector<16x128xf32> to vector<16x128xbf16>
    %c0_22 = arith.constant 0 : index
    %c0_23 = arith.constant 0 : index
    %c0_24 = arith.constant 0 : index
    %28 = vector.load %arg4[%c0_22, %c0_23, %c0_24] : memref<3x128x128xbf16, #tpu.memory_space<vmem>>, vector<1x128x128xbf16>
    %29 = vector.shape_cast %28 : vector<1x128x128xbf16> to vector<128x128xbf16>
    %cst_25 = arith.constant dense<0.000000e+00> : vector<16x128xf32>
    %30 = tpu.matmul %25, %29, %cst_25 {dimension_numbers = #tpu.dot_dimension_numbers<[1], [0], [0], [1], [0, 0, 1, 1], [], []>} : vector<16x128xbf16>, vector<128x128xbf16>, vector<16x128xf32> -> vector<16x128xf32>
    %c1_26 = arith.constant 1 : index
    %c0_27 = arith.constant 0 : index
    %c0_28 = arith.constant 0 : index
    %31 = vector.load %arg4[%c1_26, %c0_27, %c0_28] : memref<3x128x128xbf16, #tpu.memory_space<vmem>>, vector<1x128x128xbf16>
    %32 = vector.shape_cast %31 : vector<1x128x128xbf16> to vector<128x128xbf16>
    %cst_29 = arith.constant dense<0.000000e+00> : vector<16x128xf32>
    %33 = tpu.matmul %23, %32, %cst_29 {dimension_numbers = #tpu.dot_dimension_numbers<[1], [0], [0], [1], [0, 0, 1, 1], [], []>} : vector<16x128xbf16>, vector<128x128xbf16>, vector<16x128xf32> -> vector<16x128xf32>
    %34 = arith.addf %30, %33 : vector<16x128xf32>
    %c2_30 = arith.constant 2 : index
    %c0_31 = arith.constant 0 : index
    %c0_32 = arith.constant 0 : index
    %35 = vector.load %arg4[%c2_30, %c0_31, %c0_32] : memref<3x128x128xbf16, #tpu.memory_space<vmem>>, vector<1x128x128xbf16>
    %36 = vector.shape_cast %35 : vector<1x128x128xbf16> to vector<128x128xbf16>
    %cst_33 = arith.constant dense<0.000000e+00> : vector<16x128xf32>
    %37 = tpu.matmul %27, %36, %cst_33 {dimension_numbers = #tpu.dot_dimension_numbers<[1], [0], [0], [1], [0, 0, 1, 1], [], []>} : vector<16x128xbf16>, vector<128x128xbf16>, vector<16x128xf32> -> vector<16x128xf32>
    %38 = arith.addf %34, %37 : vector<16x128xf32>
    %c0_34 = arith.constant 0 : index
    %c0_35 = arith.constant 0 : index
    %39 = vector.load %arg5[%c0_34, %c0_35] : memref<64x128xbf16, #tpu.memory_space<vmem>>, vector<64x128xbf16>
    %cst_36 = arith.constant dense<0.000000e+00> : vector<16x128xf32>
    %40 = tpu.matmul %1, %39, %cst_36 {dimension_numbers = #tpu.dot_dimension_numbers<[1], [0], [0], [1], [0, 0, 1, 1], [], []>} : vector<16x64xbf16>, vector<64x128xbf16>, vector<16x128xf32> -> vector<16x128xf32>
    %41 = arith.addf %38, %40 : vector<16x128xf32>
    %cst_37 = arith.constant 0.000000e+00 : f32
    %42 = vector.broadcast %cst_37 : f32 to vector<16x128xf32>
    %43 = arith.maximumf %41, %42 : vector<16x128xf32>
    %44 = arith.truncf %43 : vector<16x128xf32> to vector<16x128xbf16>
    %c0_38 = arith.constant 0 : index
    %c0_39 = arith.constant 0 : index
    %c0_40 = arith.constant 0 : index
    %45 = vector.load %arg6[%c0_38, %c0_39, %c0_40] : memref<1x16x128xbf16, #tpu.memory_space<vmem>>, vector<1x16x128xbf16>
    %46 = vector.shape_cast %45 : vector<1x16x128xbf16> to vector<16x128xbf16>
    %47 = vector.shape_cast %44 : vector<16x128xbf16> to vector<1x16x128xbf16>
    tpu.vector_store %arg6[%c0_38, %c0_39, %c0_40], %47 {strides = array<i32>} : memref<1x16x128xbf16, #tpu.memory_space<vmem>>, vector<1x16x128xbf16>,
    return
  }
  func.func @transform_0(%arg0: i32) -> (i32, i32, i32) {
    %c0_i32 = arith.constant 0 : i32
    %c0_i32_0 = arith.constant 0 : i32
    %c0_i32_1 = arith.constant 0 : i32
    return %arg0, %c0_i32, %c0_i32_0 : i32, i32, i32
  }
  func.func @transform_1(%arg0: i32) -> (i32, i32, i32) {
    %c0_i32 = arith.constant 0 : i32
    %c0_i32_0 = arith.constant 0 : i32
    %c0_i32_1 = arith.constant 0 : i32
    %c0_i32_2 = arith.constant 0 : i32
    return %c0_i32, %c0_i32_0, %c0_i32_1 : i32, i32, i32
  }
  func.func @transform_2(%arg0: i32) -> (i32, i32, i32) {
    %c0_i32 = arith.constant 0 : i32
    %c0_i32_0 = arith.constant 0 : i32
    %c0_i32_1 = arith.constant 0 : i32
    %c0_i32_2 = arith.constant 0 : i32
    return %c0_i32, %c0_i32_0, %c0_i32_1 : i32, i32, i32
  }
  func.func @transform_3(%arg0: i32) -> (i32, i32, i32) {
    %c0_i32 = arith.constant 0 : i32
    %c0_i32_0 = arith.constant 0 : i32
    %c0_i32_1 = arith.constant 0 : i32
    %c0_i32_2 = arith.constant 0 : i32
    return %c0_i32, %c0_i32_0, %c0_i32_1 : i32, i32, i32
  }
  func.func @transform_4(%arg0: i32) -> (i32, i32) {
    %c0_i32 = arith.constant 0 : i32
    %c0_i32_0 = arith.constant 0 : i32
    %c0_i32_1 = arith.constant 0 : i32
    return %c0_i32, %c0_i32_0 : i32, i32
  }
  func.func @transform_5(%arg0: i32) -> (i32, i32, i32) {
    %c0_i32 = arith.constant 0 : i32
    %c0_i32_0 = arith.constant 0 : i32
    %c0_i32_1 = arith.constant 0 : i32
    return %arg0, %c0_i32, %c0_i32_0 : i32, i32, i32
  }
}

module attributes {stable_mosaic.version = 11 : i64} {
  func.func @kernel(%arg0: i32, %arg1: memref<1x8x64xbf16, #tpu.memory_space<vmem>>, %arg2: memref<2x8x8xbf16, #tpu.memory_space<vmem>>, %arg3: memref<3x64x64xbf16, #tpu.memory_space<vmem>>, %arg4: memref<3x64x64xbf16, #tpu.memory_space<vmem>>, %arg5: memref<1x8x64xbf16, #tpu.memory_space<vmem>>) attributes {dimension_semantics = [#tpu.dimension_semantics<parallel>], iteration_bounds = array<i64: 2>, scalar_prefetch = 0 : i64, scratch_operands = 0 : i64, tpu.core_type = #tpu.core_type<tc>, window_params = [{transform_indices = @transform_0, window_bounds = array<i64: 1, 8, 64>}, {pipeline_mode = #tpu.pipeline_mode<synchronous>, transform_indices = @transform_1, window_bounds = array<i64: 2, 8, 8>}, {pipeline_mode = #tpu.pipeline_mode<synchronous>, transform_indices = @transform_2, window_bounds = array<i64: 3, 64, 64>}, {pipeline_mode = #tpu.pipeline_mode<synchronous>, transform_indices = @transform_3, window_bounds = array<i64: 3, 64, 64>}, {transform_indices = @transform_4, window_bounds = array<i64: 1, 8, 64>}]} {
    %c0 = arith.constant 0 : index
    %c0_0 = arith.constant 0 : index
    %c0_1 = arith.constant 0 : index
    %0 = vector.load %arg1[%c0, %c0_0, %c0_1] : memref<1x8x64xbf16, #tpu.memory_space<vmem>>, vector<1x8x64xbf16>
    %1 = vector.shape_cast %0 : vector<1x8x64xbf16> to vector<8x64xbf16>
    %c0_2 = arith.constant 0 : index
    %c0_3 = arith.constant 0 : index
    %c0_4 = arith.constant 0 : index
    %2 = vector.load %arg2[%c0_2, %c0_3, %c0_4] : memref<2x8x8xbf16, #tpu.memory_space<vmem>>, vector<1x8x8xbf16>
    %3 = vector.shape_cast %2 : vector<1x8x8xbf16> to vector<8x8xbf16>
    %c1 = arith.constant 1 : index
    %c0_5 = arith.constant 0 : index
    %c0_6 = arith.constant 0 : index
    %4 = vector.load %arg2[%c1, %c0_5, %c0_6] : memref<2x8x8xbf16, #tpu.memory_space<vmem>>, vector<1x8x8xbf16>
    %5 = vector.shape_cast %4 : vector<1x8x8xbf16> to vector<8x8xbf16>
    %cst = arith.constant dense<0.000000e+00> : vector<8x64xf32>
    %6 = tpu.matmul %3, %1, %cst {dimension_numbers = #tpu.dot_dimension_numbers<[1], [0], [0], [1], [0, 0, 1, 1], [], []>} : vector<8x8xbf16>, vector<8x64xbf16>, vector<8x64xf32> -> vector<8x64xf32>
    %7 = arith.truncf %6 : vector<8x64xf32> to vector<8x64xbf16>
    %cst_7 = arith.constant dense<0.000000e+00> : vector<8x64xf32>
    %8 = tpu.matmul %5, %1, %cst_7 {dimension_numbers = #tpu.dot_dimension_numbers<[1], [0], [0], [1], [0, 0, 1, 1], [], []>} : vector<8x8xbf16>, vector<8x64xbf16>, vector<8x64xf32> -> vector<8x64xf32>
    %9 = arith.truncf %8 : vector<8x64xf32> to vector<8x64xbf16>
    %c0_8 = arith.constant 0 : index
    %c0_9 = arith.constant 0 : index
    %c0_10 = arith.constant 0 : index
    %10 = vector.load %arg3[%c0_8, %c0_9, %c0_10] : memref<3x64x64xbf16, #tpu.memory_space<vmem>>, vector<1x64x64xbf16>
    %11 = vector.shape_cast %10 : vector<1x64x64xbf16> to vector<64x64xbf16>
    %cst_11 = arith.constant dense<0.000000e+00> : vector<8x64xf32>
    %12 = tpu.matmul %7, %11, %cst_11 {dimension_numbers = #tpu.dot_dimension_numbers<[1], [0], [0], [1], [0, 0, 1, 1], [], []>} : vector<8x64xbf16>, vector<64x64xbf16>, vector<8x64xf32> -> vector<8x64xf32>
    %c1_12 = arith.constant 1 : index
    %c0_13 = arith.constant 0 : index
    %c0_14 = arith.constant 0 : index
    %13 = vector.load %arg3[%c1_12, %c0_13, %c0_14] : memref<3x64x64xbf16, #tpu.memory_space<vmem>>, vector<1x64x64xbf16>
    %14 = vector.shape_cast %13 : vector<1x64x64xbf16> to vector<64x64xbf16>
    %cst_15 = arith.constant dense<0.000000e+00> : vector<8x64xf32>
    %15 = tpu.matmul %1, %14, %cst_15 {dimension_numbers = #tpu.dot_dimension_numbers<[1], [0], [0], [1], [0, 0, 1, 1], [], []>} : vector<8x64xbf16>, vector<64x64xbf16>, vector<8x64xf32> -> vector<8x64xf32>
    %16 = arith.addf %12, %15 : vector<8x64xf32>
    %c2 = arith.constant 2 : index
    %c0_16 = arith.constant 0 : index
    %c0_17 = arith.constant 0 : index
    %17 = vector.load %arg3[%c2, %c0_16, %c0_17] : memref<3x64x64xbf16, #tpu.memory_space<vmem>>, vector<1x64x64xbf16>
    %18 = vector.shape_cast %17 : vector<1x64x64xbf16> to vector<64x64xbf16>
    %cst_18 = arith.constant dense<0.000000e+00> : vector<8x64xf32>
    %19 = tpu.matmul %9, %18, %cst_18 {dimension_numbers = #tpu.dot_dimension_numbers<[1], [0], [0], [1], [0, 0, 1, 1], [], []>} : vector<8x64xbf16>, vector<64x64xbf16>, vector<8x64xf32> -> vector<8x64xf32>
    %20 = arith.addf %16, %19 : vector<8x64xf32>
    %cst_19 = arith.constant 0.000000e+00 : f32
    %21 = vector.broadcast %cst_19 : f32 to vector<8x64xf32>
    %22 = arith.maximumf %20, %21 : vector<8x64xf32>
    %23 = arith.truncf %22 : vector<8x64xf32> to vector<8x64xbf16>
    %cst_20 = arith.constant dense<0.000000e+00> : vector<8x64xf32>
    %24 = tpu.matmul %3, %23, %cst_20 {dimension_numbers = #tpu.dot_dimension_numbers<[1], [0], [0], [1], [0, 0, 1, 1], [], []>} : vector<8x8xbf16>, vector<8x64xbf16>, vector<8x64xf32> -> vector<8x64xf32>
    %25 = arith.truncf %24 : vector<8x64xf32> to vector<8x64xbf16>
    %cst_21 = arith.constant dense<0.000000e+00> : vector<8x64xf32>
    %26 = tpu.matmul %5, %23, %cst_21 {dimension_numbers = #tpu.dot_dimension_numbers<[1], [0], [0], [1], [0, 0, 1, 1], [], []>} : vector<8x8xbf16>, vector<8x64xbf16>, vector<8x64xf32> -> vector<8x64xf32>
    %27 = arith.truncf %26 : vector<8x64xf32> to vector<8x64xbf16>
    %c0_22 = arith.constant 0 : index
    %c0_23 = arith.constant 0 : index
    %c0_24 = arith.constant 0 : index
    %28 = vector.load %arg4[%c0_22, %c0_23, %c0_24] : memref<3x64x64xbf16, #tpu.memory_space<vmem>>, vector<1x64x64xbf16>
    %29 = vector.shape_cast %28 : vector<1x64x64xbf16> to vector<64x64xbf16>
    %cst_25 = arith.constant dense<0.000000e+00> : vector<8x64xf32>
    %30 = tpu.matmul %25, %29, %cst_25 {dimension_numbers = #tpu.dot_dimension_numbers<[1], [0], [0], [1], [0, 0, 1, 1], [], []>} : vector<8x64xbf16>, vector<64x64xbf16>, vector<8x64xf32> -> vector<8x64xf32>
    %c1_26 = arith.constant 1 : index
    %c0_27 = arith.constant 0 : index
    %c0_28 = arith.constant 0 : index
    %31 = vector.load %arg4[%c1_26, %c0_27, %c0_28] : memref<3x64x64xbf16, #tpu.memory_space<vmem>>, vector<1x64x64xbf16>
    %32 = vector.shape_cast %31 : vector<1x64x64xbf16> to vector<64x64xbf16>
    %cst_29 = arith.constant dense<0.000000e+00> : vector<8x64xf32>
    %33 = tpu.matmul %23, %32, %cst_29 {dimension_numbers = #tpu.dot_dimension_numbers<[1], [0], [0], [1], [0, 0, 1, 1], [], []>} : vector<8x64xbf16>, vector<64x64xbf16>, vector<8x64xf32> -> vector<8x64xf32>
    %34 = arith.addf %30, %33 : vector<8x64xf32>
    %c2_30 = arith.constant 2 : index
    %c0_31 = arith.constant 0 : index
    %c0_32 = arith.constant 0 : index
    %35 = vector.load %arg4[%c2_30, %c0_31, %c0_32] : memref<3x64x64xbf16, #tpu.memory_space<vmem>>, vector<1x64x64xbf16>
    %36 = vector.shape_cast %35 : vector<1x64x64xbf16> to vector<64x64xbf16>
    %cst_33 = arith.constant dense<0.000000e+00> : vector<8x64xf32>
    %37 = tpu.matmul %27, %36, %cst_33 {dimension_numbers = #tpu.dot_dimension_numbers<[1], [0], [0], [1], [0, 0, 1, 1], [], []>} : vector<8x64xbf16>, vector<64x64xbf16>, vector<8x64xf32> -> vector<8x64xf32>
    %38 = arith.addf %34, %37 : vector<8x64xf32>
    %39 = arith.extf %1 : vector<8x64xbf16> to vector<8x64xf32>
    %40 = arith.addf %38, %39 : vector<8x64xf32>
    %cst_34 = arith.constant 0.000000e+00 : f32
    %41 = vector.broadcast %cst_34 : f32 to vector<8x64xf32>
    %42 = arith.maximumf %40, %41 : vector<8x64xf32>
    %43 = arith.truncf %42 : vector<8x64xf32> to vector<8x64xbf16>
    %c0_35 = arith.constant 0 : index
    %c0_36 = arith.constant 0 : index
    %c0_37 = arith.constant 0 : index
    %44 = vector.load %arg5[%c0_35, %c0_36, %c0_37] : memref<1x8x64xbf16, #tpu.memory_space<vmem>>, vector<1x8x64xbf16>
    %45 = vector.shape_cast %44 : vector<1x8x64xbf16> to vector<8x64xbf16>
    %46 = vector.shape_cast %43 : vector<8x64xbf16> to vector<1x8x64xbf16>
    tpu.vector_store %arg5[%c0_35, %c0_36, %c0_37], %46 {strides = array<i32>} : memref<1x8x64xbf16, #tpu.memory_space<vmem>>, vector<1x8x64xbf16>,
    return
  }
  func.func @transform_0(%arg0: i32) -> (i32, i32, i32) {
    %c0_i32 = arith.constant 0 : i32
    %c0_i32_0 = arith.constant 0 : i32
    %c0_i32_1 = arith.constant 0 : i32
    return %arg0, %c0_i32, %c0_i32_0 : i32, i32, i32
  }
  func.func @transform_1(%arg0: i32) -> (i32, i32, i32) {
    %c0_i32 = arith.constant 0 : i32
    %c0_i32_0 = arith.constant 0 : i32
    %c0_i32_1 = arith.constant 0 : i32
    %c0_i32_2 = arith.constant 0 : i32
    return %c0_i32, %c0_i32_0, %c0_i32_1 : i32, i32, i32
  }
  func.func @transform_2(%arg0: i32) -> (i32, i32, i32) {
    %c0_i32 = arith.constant 0 : i32
    %c0_i32_0 = arith.constant 0 : i32
    %c0_i32_1 = arith.constant 0 : i32
    %c0_i32_2 = arith.constant 0 : i32
    return %c0_i32, %c0_i32_0, %c0_i32_1 : i32, i32, i32
  }
  func.func @transform_3(%arg0: i32) -> (i32, i32, i32) {
    %c0_i32 = arith.constant 0 : i32
    %c0_i32_0 = arith.constant 0 : i32
    %c0_i32_1 = arith.constant 0 : i32
    %c0_i32_2 = arith.constant 0 : i32
    return %c0_i32, %c0_i32_0, %c0_i32_1 : i32, i32, i32
  }
  func.func @transform_4(%arg0: i32) -> (i32, i32, i32) {
    %c0_i32 = arith.constant 0 : i32
    %c0_i32_0 = arith.constant 0 : i32
    %c0_i32_1 = arith.constant 0 : i32
    return %arg0, %c0_i32, %c0_i32_0 : i32, i32, i32
  }
}

module attributes {stable_mosaic.version = 11 : i64} {
  func.func @kernel(%arg0: i32, %arg1: memref<1x16x128xbf16, #tpu.memory_space<vmem>>, %arg2: memref<2x16x16xbf16, #tpu.memory_space<vmem>>, %arg3: memref<3x128x128xbf16, #tpu.memory_space<vmem>>, %arg4: memref<3x128x128xbf16, #tpu.memory_space<vmem>>, %arg5: memref<1x16x128xbf16, #tpu.memory_space<vmem>>) attributes {dimension_semantics = [#tpu.dimension_semantics<parallel>], iteration_bounds = array<i64: 2>, scalar_prefetch = 0 : i64, scratch_operands = 0 : i64, tpu.core_type = #tpu.core_type<tc>, window_params = [{transform_indices = @transform_0, window_bounds = array<i64: 1, 16, 128>}, {pipeline_mode = #tpu.pipeline_mode<synchronous>, transform_indices = @transform_1, window_bounds = array<i64: 2, 16, 16>}, {pipeline_mode = #tpu.pipeline_mode<synchronous>, transform_indices = @transform_2, window_bounds = array<i64: 3, 128, 128>}, {pipeline_mode = #tpu.pipeline_mode<synchronous>, transform_indices = @transform_3, window_bounds = array<i64: 3, 128, 128>}, {transform_indices = @transform_4, window_bounds = array<i64: 1, 16, 128>}]} {
    %c0 = arith.constant 0 : index
    %c0_0 = arith.constant 0 : index
    %c0_1 = arith.constant 0 : index
    %0 = vector.load %arg1[%c0, %c0_0, %c0_1] : memref<1x16x128xbf16, #tpu.memory_space<vmem>>, vector<1x16x128xbf16>
    %1 = vector.shape_cast %0 : vector<1x16x128xbf16> to vector<16x128xbf16>
    %c0_2 = arith.constant 0 : index
    %c0_3 = arith.constant 0 : index
    %c0_4 = arith.constant 0 : index
    %2 = vector.load %arg2[%c0_2, %c0_3, %c0_4] : memref<2x16x16xbf16, #tpu.memory_space<vmem>>, vector<1x16x16xbf16>
    %3 = vector.shape_cast %2 : vector<1x16x16xbf16> to vector<16x16xbf16>
    %c1 = arith.constant 1 : index
    %c0_5 = arith.constant 0 : index
    %c0_6 = arith.constant 0 : index
    %4 = vector.load %arg2[%c1, %c0_5, %c0_6] : memref<2x16x16xbf16, #tpu.memory_space<vmem>>, vector<1x16x16xbf16>
    %5 = vector.shape_cast %4 : vector<1x16x16xbf16> to vector<16x16xbf16>
    %cst = arith.constant dense<0.000000e+00> : vector<16x128xf32>
    %6 = tpu.matmul %3, %1, %cst {dimension_numbers = #tpu.dot_dimension_numbers<[1], [0], [0], [1], [0, 0, 1, 1], [], []>} : vector<16x16xbf16>, vector<16x128xbf16>, vector<16x128xf32> -> vector<16x128xf32>
    %7 = arith.truncf %6 : vector<16x128xf32> to vector<16x128xbf16>
    %cst_7 = arith.constant dense<0.000000e+00> : vector<16x128xf32>
    %8 = tpu.matmul %5, %1, %cst_7 {dimension_numbers = #tpu.dot_dimension_numbers<[1], [0], [0], [1], [0, 0, 1, 1], [], []>} : vector<16x16xbf16>, vector<16x128xbf16>, vector<16x128xf32> -> vector<16x128xf32>
    %9 = arith.truncf %8 : vector<16x128xf32> to vector<16x128xbf16>
    %c0_8 = arith.constant 0 : index
    %c0_9 = arith.constant 0 : index
    %c0_10 = arith.constant 0 : index
    %10 = vector.load %arg3[%c0_8, %c0_9, %c0_10] : memref<3x128x128xbf16, #tpu.memory_space<vmem>>, vector<1x128x128xbf16>
    %11 = vector.shape_cast %10 : vector<1x128x128xbf16> to vector<128x128xbf16>
    %cst_11 = arith.constant dense<0.000000e+00> : vector<16x128xf32>
    %12 = tpu.matmul %7, %11, %cst_11 {dimension_numbers = #tpu.dot_dimension_numbers<[1], [0], [0], [1], [0, 0, 1, 1], [], []>} : vector<16x128xbf16>, vector<128x128xbf16>, vector<16x128xf32> -> vector<16x128xf32>
    %c1_12 = arith.constant 1 : index
    %c0_13 = arith.constant 0 : index
    %c0_14 = arith.constant 0 : index
    %13 = vector.load %arg3[%c1_12, %c0_13, %c0_14] : memref<3x128x128xbf16, #tpu.memory_space<vmem>>, vector<1x128x128xbf16>
    %14 = vector.shape_cast %13 : vector<1x128x128xbf16> to vector<128x128xbf16>
    %cst_15 = arith.constant dense<0.000000e+00> : vector<16x128xf32>
    %15 = tpu.matmul %1, %14, %cst_15 {dimension_numbers = #tpu.dot_dimension_numbers<[1], [0], [0], [1], [0, 0, 1, 1], [], []>} : vector<16x128xbf16>, vector<128x128xbf16>, vector<16x128xf32> -> vector<16x128xf32>
    %16 = arith.addf %12, %15 : vector<16x128xf32>
    %c2 = arith.constant 2 : index
    %c0_16 = arith.constant 0 : index
    %c0_17 = arith.constant 0 : index
    %17 = vector.load %arg3[%c2, %c0_16, %c0_17] : memref<3x128x128xbf16, #tpu.memory_space<vmem>>, vector<1x128x128xbf16>
    %18 = vector.shape_cast %17 : vector<1x128x128xbf16> to vector<128x128xbf16>
    %cst_18 = arith.constant dense<0.000000e+00> : vector<16x128xf32>
    %19 = tpu.matmul %9, %18, %cst_18 {dimension_numbers = #tpu.dot_dimension_numbers<[1], [0], [0], [1], [0, 0, 1, 1], [], []>} : vector<16x128xbf16>, vector<128x128xbf16>, vector<16x128xf32> -> vector<16x128xf32>
    %20 = arith.addf %16, %19 : vector<16x128xf32>
    %cst_19 = arith.constant 0.000000e+00 : f32
    %21 = vector.broadcast %cst_19 : f32 to vector<16x128xf32>
    %22 = arith.maximumf %20, %21 : vector<16x128xf32>
    %23 = arith.truncf %22 : vector<16x128xf32> to vector<16x128xbf16>
    %cst_20 = arith.constant dense<0.000000e+00> : vector<16x128xf32>
    %24 = tpu.matmul %3, %23, %cst_20 {dimension_numbers = #tpu.dot_dimension_numbers<[1], [0], [0], [1], [0, 0, 1, 1], [], []>} : vector<16x16xbf16>, vector<16x128xbf16>, vector<16x128xf32> -> vector<16x128xf32>
    %25 = arith.truncf %24 : vector<16x128xf32> to vector<16x128xbf16>
    %cst_21 = arith.constant dense<0.000000e+00> : vector<16x128xf32>
    %26 = tpu.matmul %5, %23, %cst_21 {dimension_numbers = #tpu.dot_dimension_numbers<[1], [0], [0], [1], [0, 0, 1, 1], [], []>} : vector<16x16xbf16>, vector<16x128xbf16>, vector<16x128xf32> -> vector<16x128xf32>
    %27 = arith.truncf %26 : vector<16x128xf32> to vector<16x128xbf16>
    %c0_22 = arith.constant 0 : index
    %c0_23 = arith.constant 0 : index
    %c0_24 = arith.constant 0 : index
    %28 = vector.load %arg4[%c0_22, %c0_23, %c0_24] : memref<3x128x128xbf16, #tpu.memory_space<vmem>>, vector<1x128x128xbf16>
    %29 = vector.shape_cast %28 : vector<1x128x128xbf16> to vector<128x128xbf16>
    %cst_25 = arith.constant dense<0.000000e+00> : vector<16x128xf32>
    %30 = tpu.matmul %25, %29, %cst_25 {dimension_numbers = #tpu.dot_dimension_numbers<[1], [0], [0], [1], [0, 0, 1, 1], [], []>} : vector<16x128xbf16>, vector<128x128xbf16>, vector<16x128xf32> -> vector<16x128xf32>
    %c1_26 = arith.constant 1 : index
    %c0_27 = arith.constant 0 : index
    %c0_28 = arith.constant 0 : index
    %31 = vector.load %arg4[%c1_26, %c0_27, %c0_28] : memref<3x128x128xbf16, #tpu.memory_space<vmem>>, vector<1x128x128xbf16>
    %32 = vector.shape_cast %31 : vector<1x128x128xbf16> to vector<128x128xbf16>
    %cst_29 = arith.constant dense<0.000000e+00> : vector<16x128xf32>
    %33 = tpu.matmul %23, %32, %cst_29 {dimension_numbers = #tpu.dot_dimension_numbers<[1], [0], [0], [1], [0, 0, 1, 1], [], []>} : vector<16x128xbf16>, vector<128x128xbf16>, vector<16x128xf32> -> vector<16x128xf32>
    %34 = arith.addf %30, %33 : vector<16x128xf32>
    %c2_30 = arith.constant 2 : index
    %c0_31 = arith.constant 0 : index
    %c0_32 = arith.constant 0 : index
    %35 = vector.load %arg4[%c2_30, %c0_31, %c0_32] : memref<3x128x128xbf16, #tpu.memory_space<vmem>>, vector<1x128x128xbf16>
    %36 = vector.shape_cast %35 : vector<1x128x128xbf16> to vector<128x128xbf16>
    %cst_33 = arith.constant dense<0.000000e+00> : vector<16x128xf32>
    %37 = tpu.matmul %27, %36, %cst_33 {dimension_numbers = #tpu.dot_dimension_numbers<[1], [0], [0], [1], [0, 0, 1, 1], [], []>} : vector<16x128xbf16>, vector<128x128xbf16>, vector<16x128xf32> -> vector<16x128xf32>
    %38 = arith.addf %34, %37 : vector<16x128xf32>
    %39 = arith.extf %1 : vector<16x128xbf16> to vector<16x128xf32>
    %40 = arith.addf %38, %39 : vector<16x128xf32>
    %cst_34 = arith.constant 0.000000e+00 : f32
    %41 = vector.broadcast %cst_34 : f32 to vector<16x128xf32>
    %42 = arith.maximumf %40, %41 : vector<16x128xf32>
    %43 = arith.truncf %42 : vector<16x128xf32> to vector<16x128xbf16>
    %c0_35 = arith.constant 0 : index
    %c0_36 = arith.constant 0 : index
    %c0_37 = arith.constant 0 : index
    %44 = vector.load %arg5[%c0_35, %c0_36, %c0_37] : memref<1x16x128xbf16, #tpu.memory_space<vmem>>, vector<1x16x128xbf16>
    %45 = vector.shape_cast %44 : vector<1x16x128xbf16> to vector<16x128xbf16>
    %46 = vector.shape_cast %43 : vector<16x128xbf16> to vector<1x16x128xbf16>
    tpu.vector_store %arg5[%c0_35, %c0_36, %c0_37], %46 {strides = array<i32>} : memref<1x16x128xbf16, #tpu.memory_space<vmem>>, vector<1x16x128xbf16>,
    return
  }
  func.func @transform_0(%arg0: i32) -> (i32, i32, i32) {
    %c0_i32 = arith.constant 0 : i32
    %c0_i32_0 = arith.constant 0 : i32
    %c0_i32_1 = arith.constant 0 : i32
    return %arg0, %c0_i32, %c0_i32_0 : i32, i32, i32
  }
  func.func @transform_1(%arg0: i32) -> (i32, i32, i32) {
    %c0_i32 = arith.constant 0 : i32
    %c0_i32_0 = arith.constant 0 : i32
    %c0_i32_1 = arith.constant 0 : i32
    %c0_i32_2 = arith.constant 0 : i32
    return %c0_i32, %c0_i32_0, %c0_i32_1 : i32, i32, i32
  }
  func.func @transform_2(%arg0: i32) -> (i32, i32, i32) {
    %c0_i32 = arith.constant 0 : i32
    %c0_i32_0 = arith.constant 0 : i32
    %c0_i32_1 = arith.constant 0 : i32
    %c0_i32_2 = arith.constant 0 : i32
    return %c0_i32, %c0_i32_0, %c0_i32_1 : i32, i32, i32
  }
  func.func @transform_3(%arg0: i32) -> (i32, i32, i32) {
    %c0_i32 = arith.constant 0 : i32
    %c0_i32_0 = arith.constant 0 : i32
    %c0_i32_1 = arith.constant 0 : i32
    %c0_i32_2 = arith.constant 0 : i32
    return %c0_i32, %c0_i32_0, %c0_i32_1 : i32, i32, i32
  }
  func.func @transform_4(%arg0: i32) -> (i32, i32, i32) {
    %c0_i32 = arith.constant 0 : i32
    %c0_i32_0 = arith.constant 0 : i32
    %c0_i32_1 = arith.constant 0 : i32
    return %arg0, %c0_i32, %c0_i32_0 : i32, i32, i32
  }
}

module attributes {stable_mosaic.version = 11 : i64} {
  func.func @_upmerge_kernel(%arg0: i32, %arg1: memref<1x16x128xbf16, #tpu.memory_space<vmem>>, %arg2: memref<1x8x64xbf16, #tpu.memory_space<vmem>>, %arg3: memref<64x128xbf16, #tpu.memory_space<vmem>>, %arg4: memref<16x8xbf16, #tpu.memory_space<vmem>>, %arg5: memref<1x16x128xbf16, #tpu.memory_space<vmem>>) attributes {dimension_semantics = [#tpu.dimension_semantics<parallel>], iteration_bounds = array<i64: 2>, scalar_prefetch = 0 : i64, scratch_operands = 0 : i64, tpu.core_type = #tpu.core_type<tc>, window_params = [{transform_indices = @transform_0, window_bounds = array<i64: 1, 16, 128>}, {transform_indices = @transform_1, window_bounds = array<i64: 1, 8, 64>}, {pipeline_mode = #tpu.pipeline_mode<synchronous>, transform_indices = @transform_2, window_bounds = array<i64: 64, 128>}, {pipeline_mode = #tpu.pipeline_mode<synchronous>, transform_indices = @transform_3, window_bounds = array<i64: 16, 8>}, {transform_indices = @transform_4, window_bounds = array<i64: 1, 16, 128>}]} {
    %c0 = arith.constant 0 : index
    %c0_0 = arith.constant 0 : index
    %c0_1 = arith.constant 0 : index
    %0 = vector.load %arg2[%c0, %c0_0, %c0_1] : memref<1x8x64xbf16, #tpu.memory_space<vmem>>, vector<1x8x64xbf16>
    %1 = vector.shape_cast %0 : vector<1x8x64xbf16> to vector<8x64xbf16>
    %c0_2 = arith.constant 0 : index
    %c0_3 = arith.constant 0 : index
    %2 = vector.load %arg3[%c0_2, %c0_3] : memref<64x128xbf16, #tpu.memory_space<vmem>>, vector<64x128xbf16>
    %cst = arith.constant dense<0.000000e+00> : vector<8x128xf32>
    %3 = tpu.matmul %1, %2, %cst {dimension_numbers = #tpu.dot_dimension_numbers<[1], [0], [0], [1], [0, 0, 1, 1], [], []>} : vector<8x64xbf16>, vector<64x128xbf16>, vector<8x128xf32> -> vector<8x128xf32>
    %c0_4 = arith.constant 0 : index
    %c0_5 = arith.constant 0 : index
    %4 = vector.load %arg4[%c0_4, %c0_5] : memref<16x8xbf16, #tpu.memory_space<vmem>>, vector<16x8xbf16>
    %5 = arith.truncf %3 : vector<8x128xf32> to vector<8x128xbf16>
    %cst_6 = arith.constant dense<0.000000e+00> : vector<16x128xf32>
    %6 = tpu.matmul %4, %5, %cst_6 {dimension_numbers = #tpu.dot_dimension_numbers<[1], [0], [0], [1], [0, 0, 1, 1], [], []>} : vector<16x8xbf16>, vector<8x128xbf16>, vector<16x128xf32> -> vector<16x128xf32>
    %c0_7 = arith.constant 0 : index
    %c0_8 = arith.constant 0 : index
    %c0_9 = arith.constant 0 : index
    %7 = vector.load %arg1[%c0_7, %c0_8, %c0_9] : memref<1x16x128xbf16, #tpu.memory_space<vmem>>, vector<1x16x128xbf16>
    %8 = vector.shape_cast %7 : vector<1x16x128xbf16> to vector<16x128xbf16>
    %9 = arith.extf %8 : vector<16x128xbf16> to vector<16x128xf32>
    %10 = arith.addf %6, %9 : vector<16x128xf32>
    %11 = arith.truncf %10 : vector<16x128xf32> to vector<16x128xbf16>
    %c0_10 = arith.constant 0 : index
    %c0_11 = arith.constant 0 : index
    %c0_12 = arith.constant 0 : index
    %12 = vector.load %arg5[%c0_10, %c0_11, %c0_12] : memref<1x16x128xbf16, #tpu.memory_space<vmem>>, vector<1x16x128xbf16>
    %13 = vector.shape_cast %12 : vector<1x16x128xbf16> to vector<16x128xbf16>
    %14 = vector.shape_cast %11 : vector<16x128xbf16> to vector<1x16x128xbf16>
    tpu.vector_store %arg5[%c0_10, %c0_11, %c0_12], %14 {strides = array<i32>} : memref<1x16x128xbf16, #tpu.memory_space<vmem>>, vector<1x16x128xbf16>,
    return
  }
  func.func @transform_0(%arg0: i32) -> (i32, i32, i32) {
    %c0_i32 = arith.constant 0 : i32
    %c0_i32_0 = arith.constant 0 : i32
    %c0_i32_1 = arith.constant 0 : i32
    return %arg0, %c0_i32, %c0_i32_0 : i32, i32, i32
  }
  func.func @transform_1(%arg0: i32) -> (i32, i32, i32) {
    %c0_i32 = arith.constant 0 : i32
    %c0_i32_0 = arith.constant 0 : i32
    %c0_i32_1 = arith.constant 0 : i32
    return %arg0, %c0_i32, %c0_i32_0 : i32, i32, i32
  }
  func.func @transform_2(%arg0: i32) -> (i32, i32) {
    %c0_i32 = arith.constant 0 : i32
    %c0_i32_0 = arith.constant 0 : i32
    %c0_i32_1 = arith.constant 0 : i32
    return %c0_i32, %c0_i32_0 : i32, i32
  }
  func.func @transform_3(%arg0: i32) -> (i32, i32) {
    %c0_i32 = arith.constant 0 : i32
    %c0_i32_0 = arith.constant 0 : i32
    %c0_i32_1 = arith.constant 0 : i32
    return %c0_i32, %c0_i32_0 : i32, i32
  }
  func.func @transform_4(%arg0: i32) -> (i32, i32, i32) {
    %c0_i32 = arith.constant 0 : i32
    %c0_i32_0 = arith.constant 0 : i32
    %c0_i32_1 = arith.constant 0 : i32
    return %arg0, %c0_i32, %c0_i32_0 : i32, i32, i32
  }
}

module attributes {stable_mosaic.version = 11 : i64} {
  func.func @kernel(%arg0: i32, %arg1: memref<1x16x128xbf16, #tpu.memory_space<vmem>>, %arg2: memref<2x16x16xbf16, #tpu.memory_space<vmem>>, %arg3: memref<3x128x64xbf16, #tpu.memory_space<vmem>>, %arg4: memref<3x64x64xbf16, #tpu.memory_space<vmem>>, %arg5: memref<128x64xbf16, #tpu.memory_space<vmem>>, %arg6: memref<1x16x64xbf16, #tpu.memory_space<vmem>>) attributes {dimension_semantics = [#tpu.dimension_semantics<parallel>], iteration_bounds = array<i64: 2>, scalar_prefetch = 0 : i64, scratch_operands = 0 : i64, tpu.core_type = #tpu.core_type<tc>, window_params = [{transform_indices = @transform_0, window_bounds = array<i64: 1, 16, 128>}, {pipeline_mode = #tpu.pipeline_mode<synchronous>, transform_indices = @transform_1, window_bounds = array<i64: 2, 16, 16>}, {pipeline_mode = #tpu.pipeline_mode<synchronous>, transform_indices = @transform_2, window_bounds = array<i64: 3, 128, 64>}, {pipeline_mode = #tpu.pipeline_mode<synchronous>, transform_indices = @transform_3, window_bounds = array<i64: 3, 64, 64>}, {pipeline_mode = #tpu.pipeline_mode<synchronous>, transform_indices = @transform_4, window_bounds = array<i64: 128, 64>}, {transform_indices = @transform_5, window_bounds = array<i64: 1, 16, 64>}]} {
    %c0 = arith.constant 0 : index
    %c0_0 = arith.constant 0 : index
    %c0_1 = arith.constant 0 : index
    %0 = vector.load %arg1[%c0, %c0_0, %c0_1] : memref<1x16x128xbf16, #tpu.memory_space<vmem>>, vector<1x16x128xbf16>
    %1 = vector.shape_cast %0 : vector<1x16x128xbf16> to vector<16x128xbf16>
    %c0_2 = arith.constant 0 : index
    %c0_3 = arith.constant 0 : index
    %c0_4 = arith.constant 0 : index
    %2 = vector.load %arg2[%c0_2, %c0_3, %c0_4] : memref<2x16x16xbf16, #tpu.memory_space<vmem>>, vector<1x16x16xbf16>
    %3 = vector.shape_cast %2 : vector<1x16x16xbf16> to vector<16x16xbf16>
    %c1 = arith.constant 1 : index
    %c0_5 = arith.constant 0 : index
    %c0_6 = arith.constant 0 : index
    %4 = vector.load %arg2[%c1, %c0_5, %c0_6] : memref<2x16x16xbf16, #tpu.memory_space<vmem>>, vector<1x16x16xbf16>
    %5 = vector.shape_cast %4 : vector<1x16x16xbf16> to vector<16x16xbf16>
    %cst = arith.constant dense<0.000000e+00> : vector<16x128xf32>
    %6 = tpu.matmul %3, %1, %cst {dimension_numbers = #tpu.dot_dimension_numbers<[1], [0], [0], [1], [0, 0, 1, 1], [], []>} : vector<16x16xbf16>, vector<16x128xbf16>, vector<16x128xf32> -> vector<16x128xf32>
    %7 = arith.truncf %6 : vector<16x128xf32> to vector<16x128xbf16>
    %cst_7 = arith.constant dense<0.000000e+00> : vector<16x128xf32>
    %8 = tpu.matmul %5, %1, %cst_7 {dimension_numbers = #tpu.dot_dimension_numbers<[1], [0], [0], [1], [0, 0, 1, 1], [], []>} : vector<16x16xbf16>, vector<16x128xbf16>, vector<16x128xf32> -> vector<16x128xf32>
    %9 = arith.truncf %8 : vector<16x128xf32> to vector<16x128xbf16>
    %c0_8 = arith.constant 0 : index
    %c0_9 = arith.constant 0 : index
    %c0_10 = arith.constant 0 : index
    %10 = vector.load %arg3[%c0_8, %c0_9, %c0_10] : memref<3x128x64xbf16, #tpu.memory_space<vmem>>, vector<1x128x64xbf16>
    %11 = vector.shape_cast %10 : vector<1x128x64xbf16> to vector<128x64xbf16>
    %cst_11 = arith.constant dense<0.000000e+00> : vector<16x64xf32>
    %12 = tpu.matmul %7, %11, %cst_11 {dimension_numbers = #tpu.dot_dimension_numbers<[1], [0], [0], [1], [0, 0, 1, 1], [], []>} : vector<16x128xbf16>, vector<128x64xbf16>, vector<16x64xf32> -> vector<16x64xf32>
    %c1_12 = arith.constant 1 : index
    %c0_13 = arith.constant 0 : index
    %c0_14 = arith.constant 0 : index
    %13 = vector.load %arg3[%c1_12, %c0_13, %c0_14] : memref<3x128x64xbf16, #tpu.memory_space<vmem>>, vector<1x128x64xbf16>
    %14 = vector.shape_cast %13 : vector<1x128x64xbf16> to vector<128x64xbf16>
    %cst_15 = arith.constant dense<0.000000e+00> : vector<16x64xf32>
    %15 = tpu.matmul %1, %14, %cst_15 {dimension_numbers = #tpu.dot_dimension_numbers<[1], [0], [0], [1], [0, 0, 1, 1], [], []>} : vector<16x128xbf16>, vector<128x64xbf16>, vector<16x64xf32> -> vector<16x64xf32>
    %16 = arith.addf %12, %15 : vector<16x64xf32>
    %c2 = arith.constant 2 : index
    %c0_16 = arith.constant 0 : index
    %c0_17 = arith.constant 0 : index
    %17 = vector.load %arg3[%c2, %c0_16, %c0_17] : memref<3x128x64xbf16, #tpu.memory_space<vmem>>, vector<1x128x64xbf16>
    %18 = vector.shape_cast %17 : vector<1x128x64xbf16> to vector<128x64xbf16>
    %cst_18 = arith.constant dense<0.000000e+00> : vector<16x64xf32>
    %19 = tpu.matmul %9, %18, %cst_18 {dimension_numbers = #tpu.dot_dimension_numbers<[1], [0], [0], [1], [0, 0, 1, 1], [], []>} : vector<16x128xbf16>, vector<128x64xbf16>, vector<16x64xf32> -> vector<16x64xf32>
    %20 = arith.addf %16, %19 : vector<16x64xf32>
    %cst_19 = arith.constant 0.000000e+00 : f32
    %21 = vector.broadcast %cst_19 : f32 to vector<16x64xf32>
    %22 = arith.maximumf %20, %21 : vector<16x64xf32>
    %23 = arith.truncf %22 : vector<16x64xf32> to vector<16x64xbf16>
    %cst_20 = arith.constant dense<0.000000e+00> : vector<16x64xf32>
    %24 = tpu.matmul %3, %23, %cst_20 {dimension_numbers = #tpu.dot_dimension_numbers<[1], [0], [0], [1], [0, 0, 1, 1], [], []>} : vector<16x16xbf16>, vector<16x64xbf16>, vector<16x64xf32> -> vector<16x64xf32>
    %25 = arith.truncf %24 : vector<16x64xf32> to vector<16x64xbf16>
    %cst_21 = arith.constant dense<0.000000e+00> : vector<16x64xf32>
    %26 = tpu.matmul %5, %23, %cst_21 {dimension_numbers = #tpu.dot_dimension_numbers<[1], [0], [0], [1], [0, 0, 1, 1], [], []>} : vector<16x16xbf16>, vector<16x64xbf16>, vector<16x64xf32> -> vector<16x64xf32>
    %27 = arith.truncf %26 : vector<16x64xf32> to vector<16x64xbf16>
    %c0_22 = arith.constant 0 : index
    %c0_23 = arith.constant 0 : index
    %c0_24 = arith.constant 0 : index
    %28 = vector.load %arg4[%c0_22, %c0_23, %c0_24] : memref<3x64x64xbf16, #tpu.memory_space<vmem>>, vector<1x64x64xbf16>
    %29 = vector.shape_cast %28 : vector<1x64x64xbf16> to vector<64x64xbf16>
    %cst_25 = arith.constant dense<0.000000e+00> : vector<16x64xf32>
    %30 = tpu.matmul %25, %29, %cst_25 {dimension_numbers = #tpu.dot_dimension_numbers<[1], [0], [0], [1], [0, 0, 1, 1], [], []>} : vector<16x64xbf16>, vector<64x64xbf16>, vector<16x64xf32> -> vector<16x64xf32>
    %c1_26 = arith.constant 1 : index
    %c0_27 = arith.constant 0 : index
    %c0_28 = arith.constant 0 : index
    %31 = vector.load %arg4[%c1_26, %c0_27, %c0_28] : memref<3x64x64xbf16, #tpu.memory_space<vmem>>, vector<1x64x64xbf16>
    %32 = vector.shape_cast %31 : vector<1x64x64xbf16> to vector<64x64xbf16>
    %cst_29 = arith.constant dense<0.000000e+00> : vector<16x64xf32>
    %33 = tpu.matmul %23, %32, %cst_29 {dimension_numbers = #tpu.dot_dimension_numbers<[1], [0], [0], [1], [0, 0, 1, 1], [], []>} : vector<16x64xbf16>, vector<64x64xbf16>, vector<16x64xf32> -> vector<16x64xf32>
    %34 = arith.addf %30, %33 : vector<16x64xf32>
    %c2_30 = arith.constant 2 : index
    %c0_31 = arith.constant 0 : index
    %c0_32 = arith.constant 0 : index
    %35 = vector.load %arg4[%c2_30, %c0_31, %c0_32] : memref<3x64x64xbf16, #tpu.memory_space<vmem>>, vector<1x64x64xbf16>
    %36 = vector.shape_cast %35 : vector<1x64x64xbf16> to vector<64x64xbf16>
    %cst_33 = arith.constant dense<0.000000e+00> : vector<16x64xf32>
    %37 = tpu.matmul %27, %36, %cst_33 {dimension_numbers = #tpu.dot_dimension_numbers<[1], [0], [0], [1], [0, 0, 1, 1], [], []>} : vector<16x64xbf16>, vector<64x64xbf16>, vector<16x64xf32> -> vector<16x64xf32>
    %38 = arith.addf %34, %37 : vector<16x64xf32>
    %c0_34 = arith.constant 0 : index
    %c0_35 = arith.constant 0 : index
    %39 = vector.load %arg5[%c0_34, %c0_35] : memref<128x64xbf16, #tpu.memory_space<vmem>>, vector<128x64xbf16>
    %cst_36 = arith.constant dense<0.000000e+00> : vector<16x64xf32>
    %40 = tpu.matmul %1, %39, %cst_36 {dimension_numbers = #tpu.dot_dimension_numbers<[1], [0], [0], [1], [0, 0, 1, 1], [], []>} : vector<16x128xbf16>, vector<128x64xbf16>, vector<16x64xf32> -> vector<16x64xf32>
    %41 = arith.addf %38, %40 : vector<16x64xf32>
    %cst_37 = arith.constant 0.000000e+00 : f32
    %42 = vector.broadcast %cst_37 : f32 to vector<16x64xf32>
    %43 = arith.maximumf %41, %42 : vector<16x64xf32>
    %44 = arith.truncf %43 : vector<16x64xf32> to vector<16x64xbf16>
    %c0_38 = arith.constant 0 : index
    %c0_39 = arith.constant 0 : index
    %c0_40 = arith.constant 0 : index
    %45 = vector.load %arg6[%c0_38, %c0_39, %c0_40] : memref<1x16x64xbf16, #tpu.memory_space<vmem>>, vector<1x16x64xbf16>
    %46 = vector.shape_cast %45 : vector<1x16x64xbf16> to vector<16x64xbf16>
    %47 = vector.shape_cast %44 : vector<16x64xbf16> to vector<1x16x64xbf16>
    tpu.vector_store %arg6[%c0_38, %c0_39, %c0_40], %47 {strides = array<i32>} : memref<1x16x64xbf16, #tpu.memory_space<vmem>>, vector<1x16x64xbf16>,
    return
  }
  func.func @transform_0(%arg0: i32) -> (i32, i32, i32) {
    %c0_i32 = arith.constant 0 : i32
    %c0_i32_0 = arith.constant 0 : i32
    %c0_i32_1 = arith.constant 0 : i32
    return %arg0, %c0_i32, %c0_i32_0 : i32, i32, i32
  }
  func.func @transform_1(%arg0: i32) -> (i32, i32, i32) {
    %c0_i32 = arith.constant 0 : i32
    %c0_i32_0 = arith.constant 0 : i32
    %c0_i32_1 = arith.constant 0 : i32
    %c0_i32_2 = arith.constant 0 : i32
    return %c0_i32, %c0_i32_0, %c0_i32_1 : i32, i32, i32
  }
  func.func @transform_2(%arg0: i32) -> (i32, i32, i32) {
    %c0_i32 = arith.constant 0 : i32
    %c0_i32_0 = arith.constant 0 : i32
    %c0_i32_1 = arith.constant 0 : i32
    %c0_i32_2 = arith.constant 0 : i32
    return %c0_i32, %c0_i32_0, %c0_i32_1 : i32, i32, i32
  }
  func.func @transform_3(%arg0: i32) -> (i32, i32, i32) {
    %c0_i32 = arith.constant 0 : i32
    %c0_i32_0 = arith.constant 0 : i32
    %c0_i32_1 = arith.constant 0 : i32
    %c0_i32_2 = arith.constant 0 : i32
    return %c0_i32, %c0_i32_0, %c0_i32_1 : i32, i32, i32
  }
  func.func @transform_4(%arg0: i32) -> (i32, i32) {
    %c0_i32 = arith.constant 0 : i32
    %c0_i32_0 = arith.constant 0 : i32
    %c0_i32_1 = arith.constant 0 : i32
    return %c0_i32, %c0_i32_0 : i32, i32
  }
  func.func @transform_5(%arg0: i32) -> (i32, i32, i32) {
    %c0_i32 = arith.constant 0 : i32
    %c0_i32_0 = arith.constant 0 : i32
    %c0_i32_1 = arith.constant 0 : i32
    return %arg0, %c0_i32, %c0_i32_0 : i32, i32, i32
  }
}

module attributes {stable_mosaic.version = 11 : i64} {
  func.func @kernel(%arg0: i32, %arg1: memref<1x32x128xbf16, #tpu.memory_space<vmem>>, %arg2: memref<2x32x32xbf16, #tpu.memory_space<vmem>>, %arg3: memref<3x128x128xbf16, #tpu.memory_space<vmem>>, %arg4: memref<3x128x128xbf16, #tpu.memory_space<vmem>>, %arg5: memref<1x32x128xbf16, #tpu.memory_space<vmem>>) attributes {dimension_semantics = [#tpu.dimension_semantics<parallel>], iteration_bounds = array<i64: 2>, scalar_prefetch = 0 : i64, scratch_operands = 0 : i64, tpu.core_type = #tpu.core_type<tc>, window_params = [{transform_indices = @transform_0, window_bounds = array<i64: 1, 32, 128>}, {pipeline_mode = #tpu.pipeline_mode<synchronous>, transform_indices = @transform_1, window_bounds = array<i64: 2, 32, 32>}, {pipeline_mode = #tpu.pipeline_mode<synchronous>, transform_indices = @transform_2, window_bounds = array<i64: 3, 128, 128>}, {pipeline_mode = #tpu.pipeline_mode<synchronous>, transform_indices = @transform_3, window_bounds = array<i64: 3, 128, 128>}, {transform_indices = @transform_4, window_bounds = array<i64: 1, 32, 128>}]} {
    %c0 = arith.constant 0 : index
    %c0_0 = arith.constant 0 : index
    %c0_1 = arith.constant 0 : index
    %0 = vector.load %arg1[%c0, %c0_0, %c0_1] : memref<1x32x128xbf16, #tpu.memory_space<vmem>>, vector<1x32x128xbf16>
    %1 = vector.shape_cast %0 : vector<1x32x128xbf16> to vector<32x128xbf16>
    %c0_2 = arith.constant 0 : index
    %c0_3 = arith.constant 0 : index
    %c0_4 = arith.constant 0 : index
    %2 = vector.load %arg2[%c0_2, %c0_3, %c0_4] : memref<2x32x32xbf16, #tpu.memory_space<vmem>>, vector<1x32x32xbf16>
    %3 = vector.shape_cast %2 : vector<1x32x32xbf16> to vector<32x32xbf16>
    %c1 = arith.constant 1 : index
    %c0_5 = arith.constant 0 : index
    %c0_6 = arith.constant 0 : index
    %4 = vector.load %arg2[%c1, %c0_5, %c0_6] : memref<2x32x32xbf16, #tpu.memory_space<vmem>>, vector<1x32x32xbf16>
    %5 = vector.shape_cast %4 : vector<1x32x32xbf16> to vector<32x32xbf16>
    %cst = arith.constant dense<0.000000e+00> : vector<32x128xf32>
    %6 = tpu.matmul %3, %1, %cst {dimension_numbers = #tpu.dot_dimension_numbers<[1], [0], [0], [1], [0, 0, 1, 1], [], []>} : vector<32x32xbf16>, vector<32x128xbf16>, vector<32x128xf32> -> vector<32x128xf32>
    %7 = arith.truncf %6 : vector<32x128xf32> to vector<32x128xbf16>
    %cst_7 = arith.constant dense<0.000000e+00> : vector<32x128xf32>
    %8 = tpu.matmul %5, %1, %cst_7 {dimension_numbers = #tpu.dot_dimension_numbers<[1], [0], [0], [1], [0, 0, 1, 1], [], []>} : vector<32x32xbf16>, vector<32x128xbf16>, vector<32x128xf32> -> vector<32x128xf32>
    %9 = arith.truncf %8 : vector<32x128xf32> to vector<32x128xbf16>
    %c0_8 = arith.constant 0 : index
    %c0_9 = arith.constant 0 : index
    %c0_10 = arith.constant 0 : index
    %10 = vector.load %arg3[%c0_8, %c0_9, %c0_10] : memref<3x128x128xbf16, #tpu.memory_space<vmem>>, vector<1x128x128xbf16>
    %11 = vector.shape_cast %10 : vector<1x128x128xbf16> to vector<128x128xbf16>
    %cst_11 = arith.constant dense<0.000000e+00> : vector<32x128xf32>
    %12 = tpu.matmul %7, %11, %cst_11 {dimension_numbers = #tpu.dot_dimension_numbers<[1], [0], [0], [1], [0, 0, 1, 1], [], []>} : vector<32x128xbf16>, vector<128x128xbf16>, vector<32x128xf32> -> vector<32x128xf32>
    %c1_12 = arith.constant 1 : index
    %c0_13 = arith.constant 0 : index
    %c0_14 = arith.constant 0 : index
    %13 = vector.load %arg3[%c1_12, %c0_13, %c0_14] : memref<3x128x128xbf16, #tpu.memory_space<vmem>>, vector<1x128x128xbf16>
    %14 = vector.shape_cast %13 : vector<1x128x128xbf16> to vector<128x128xbf16>
    %cst_15 = arith.constant dense<0.000000e+00> : vector<32x128xf32>
    %15 = tpu.matmul %1, %14, %cst_15 {dimension_numbers = #tpu.dot_dimension_numbers<[1], [0], [0], [1], [0, 0, 1, 1], [], []>} : vector<32x128xbf16>, vector<128x128xbf16>, vector<32x128xf32> -> vector<32x128xf32>
    %16 = arith.addf %12, %15 : vector<32x128xf32>
    %c2 = arith.constant 2 : index
    %c0_16 = arith.constant 0 : index
    %c0_17 = arith.constant 0 : index
    %17 = vector.load %arg3[%c2, %c0_16, %c0_17] : memref<3x128x128xbf16, #tpu.memory_space<vmem>>, vector<1x128x128xbf16>
    %18 = vector.shape_cast %17 : vector<1x128x128xbf16> to vector<128x128xbf16>
    %cst_18 = arith.constant dense<0.000000e+00> : vector<32x128xf32>
    %19 = tpu.matmul %9, %18, %cst_18 {dimension_numbers = #tpu.dot_dimension_numbers<[1], [0], [0], [1], [0, 0, 1, 1], [], []>} : vector<32x128xbf16>, vector<128x128xbf16>, vector<32x128xf32> -> vector<32x128xf32>
    %20 = arith.addf %16, %19 : vector<32x128xf32>
    %cst_19 = arith.constant 0.000000e+00 : f32
    %21 = vector.broadcast %cst_19 : f32 to vector<32x128xf32>
    %22 = arith.maximumf %20, %21 : vector<32x128xf32>
    %23 = arith.truncf %22 : vector<32x128xf32> to vector<32x128xbf16>
    %cst_20 = arith.constant dense<0.000000e+00> : vector<32x128xf32>
    %24 = tpu.matmul %3, %23, %cst_20 {dimension_numbers = #tpu.dot_dimension_numbers<[1], [0], [0], [1], [0, 0, 1, 1], [], []>} : vector<32x32xbf16>, vector<32x128xbf16>, vector<32x128xf32> -> vector<32x128xf32>
    %25 = arith.truncf %24 : vector<32x128xf32> to vector<32x128xbf16>
    %cst_21 = arith.constant dense<0.000000e+00> : vector<32x128xf32>
    %26 = tpu.matmul %5, %23, %cst_21 {dimension_numbers = #tpu.dot_dimension_numbers<[1], [0], [0], [1], [0, 0, 1, 1], [], []>} : vector<32x32xbf16>, vector<32x128xbf16>, vector<32x128xf32> -> vector<32x128xf32>
    %27 = arith.truncf %26 : vector<32x128xf32> to vector<32x128xbf16>
    %c0_22 = arith.constant 0 : index
    %c0_23 = arith.constant 0 : index
    %c0_24 = arith.constant 0 : index
    %28 = vector.load %arg4[%c0_22, %c0_23, %c0_24] : memref<3x128x128xbf16, #tpu.memory_space<vmem>>, vector<1x128x128xbf16>
    %29 = vector.shape_cast %28 : vector<1x128x128xbf16> to vector<128x128xbf16>
    %cst_25 = arith.constant dense<0.000000e+00> : vector<32x128xf32>
    %30 = tpu.matmul %25, %29, %cst_25 {dimension_numbers = #tpu.dot_dimension_numbers<[1], [0], [0], [1], [0, 0, 1, 1], [], []>} : vector<32x128xbf16>, vector<128x128xbf16>, vector<32x128xf32> -> vector<32x128xf32>
    %c1_26 = arith.constant 1 : index
    %c0_27 = arith.constant 0 : index
    %c0_28 = arith.constant 0 : index
    %31 = vector.load %arg4[%c1_26, %c0_27, %c0_28] : memref<3x128x128xbf16, #tpu.memory_space<vmem>>, vector<1x128x128xbf16>
    %32 = vector.shape_cast %31 : vector<1x128x128xbf16> to vector<128x128xbf16>
    %cst_29 = arith.constant dense<0.000000e+00> : vector<32x128xf32>
    %33 = tpu.matmul %23, %32, %cst_29 {dimension_numbers = #tpu.dot_dimension_numbers<[1], [0], [0], [1], [0, 0, 1, 1], [], []>} : vector<32x128xbf16>, vector<128x128xbf16>, vector<32x128xf32> -> vector<32x128xf32>
    %34 = arith.addf %30, %33 : vector<32x128xf32>
    %c2_30 = arith.constant 2 : index
    %c0_31 = arith.constant 0 : index
    %c0_32 = arith.constant 0 : index
    %35 = vector.load %arg4[%c2_30, %c0_31, %c0_32] : memref<3x128x128xbf16, #tpu.memory_space<vmem>>, vector<1x128x128xbf16>
    %36 = vector.shape_cast %35 : vector<1x128x128xbf16> to vector<128x128xbf16>
    %cst_33 = arith.constant dense<0.000000e+00> : vector<32x128xf32>
    %37 = tpu.matmul %27, %36, %cst_33 {dimension_numbers = #tpu.dot_dimension_numbers<[1], [0], [0], [1], [0, 0, 1, 1], [], []>} : vector<32x128xbf16>, vector<128x128xbf16>, vector<32x128xf32> -> vector<32x128xf32>
    %38 = arith.addf %34, %37 : vector<32x128xf32>
    %39 = arith.extf %1 : vector<32x128xbf16> to vector<32x128xf32>
    %40 = arith.addf %38, %39 : vector<32x128xf32>
    %cst_34 = arith.constant 0.000000e+00 : f32
    %41 = vector.broadcast %cst_34 : f32 to vector<32x128xf32>
    %42 = arith.maximumf %40, %41 : vector<32x128xf32>
    %43 = arith.truncf %42 : vector<32x128xf32> to vector<32x128xbf16>
    %c0_35 = arith.constant 0 : index
    %c0_36 = arith.constant 0 : index
    %c0_37 = arith.constant 0 : index
    %44 = vector.load %arg5[%c0_35, %c0_36, %c0_37] : memref<1x32x128xbf16, #tpu.memory_space<vmem>>, vector<1x32x128xbf16>
    %45 = vector.shape_cast %44 : vector<1x32x128xbf16> to vector<32x128xbf16>
    %46 = vector.shape_cast %43 : vector<32x128xbf16> to vector<1x32x128xbf16>
    tpu.vector_store %arg5[%c0_35, %c0_36, %c0_37], %46 {strides = array<i32>} : memref<1x32x128xbf16, #tpu.memory_space<vmem>>, vector<1x32x128xbf16>,
    return
  }
  func.func @transform_0(%arg0: i32) -> (i32, i32, i32) {
    %c0_i32 = arith.constant 0 : i32
    %c0_i32_0 = arith.constant 0 : i32
    %c0_i32_1 = arith.constant 0 : i32
    return %arg0, %c0_i32, %c0_i32_0 : i32, i32, i32
  }
  func.func @transform_1(%arg0: i32) -> (i32, i32, i32) {
    %c0_i32 = arith.constant 0 : i32
    %c0_i32_0 = arith.constant 0 : i32
    %c0_i32_1 = arith.constant 0 : i32
    %c0_i32_2 = arith.constant 0 : i32
    return %c0_i32, %c0_i32_0, %c0_i32_1 : i32, i32, i32
  }
  func.func @transform_2(%arg0: i32) -> (i32, i32, i32) {
    %c0_i32 = arith.constant 0 : i32
    %c0_i32_0 = arith.constant 0 : i32
    %c0_i32_1 = arith.constant 0 : i32
    %c0_i32_2 = arith.constant 0 : i32
    return %c0_i32, %c0_i32_0, %c0_i32_1 : i32, i32, i32
  }
  func.func @transform_3(%arg0: i32) -> (i32, i32, i32) {
    %c0_i32 = arith.constant 0 : i32
    %c0_i32_0 = arith.constant 0 : i32
    %c0_i32_1 = arith.constant 0 : i32
    %c0_i32_2 = arith.constant 0 : i32
    return %c0_i32, %c0_i32_0, %c0_i32_1 : i32, i32, i32
  }
  func.func @transform_4(%arg0: i32) -> (i32, i32, i32) {
    %c0_i32 = arith.constant 0 : i32
    %c0_i32_0 = arith.constant 0 : i32
    %c0_i32_1 = arith.constant 0 : i32
    return %arg0, %c0_i32, %c0_i32_0 : i32, i32, i32
  }
}

module attributes {stable_mosaic.version = 11 : i64} {
  func.func @_upmerge_kernel(%arg0: i32, %arg1: memref<1x32x128xbf16, #tpu.memory_space<vmem>>, %arg2: memref<1x16x64xbf16, #tpu.memory_space<vmem>>, %arg3: memref<64x128xbf16, #tpu.memory_space<vmem>>, %arg4: memref<32x16xbf16, #tpu.memory_space<vmem>>, %arg5: memref<1x32x128xbf16, #tpu.memory_space<vmem>>) attributes {dimension_semantics = [#tpu.dimension_semantics<parallel>], iteration_bounds = array<i64: 2>, scalar_prefetch = 0 : i64, scratch_operands = 0 : i64, tpu.core_type = #tpu.core_type<tc>, window_params = [{transform_indices = @transform_0, window_bounds = array<i64: 1, 32, 128>}, {transform_indices = @transform_1, window_bounds = array<i64: 1, 16, 64>}, {pipeline_mode = #tpu.pipeline_mode<synchronous>, transform_indices = @transform_2, window_bounds = array<i64: 64, 128>}, {pipeline_mode = #tpu.pipeline_mode<synchronous>, transform_indices = @transform_3, window_bounds = array<i64: 32, 16>}, {transform_indices = @transform_4, window_bounds = array<i64: 1, 32, 128>}]} {
    %c0 = arith.constant 0 : index
    %c0_0 = arith.constant 0 : index
    %c0_1 = arith.constant 0 : index
    %0 = vector.load %arg2[%c0, %c0_0, %c0_1] : memref<1x16x64xbf16, #tpu.memory_space<vmem>>, vector<1x16x64xbf16>
    %1 = vector.shape_cast %0 : vector<1x16x64xbf16> to vector<16x64xbf16>
    %c0_2 = arith.constant 0 : index
    %c0_3 = arith.constant 0 : index
    %2 = vector.load %arg3[%c0_2, %c0_3] : memref<64x128xbf16, #tpu.memory_space<vmem>>, vector<64x128xbf16>
    %cst = arith.constant dense<0.000000e+00> : vector<16x128xf32>
    %3 = tpu.matmul %1, %2, %cst {dimension_numbers = #tpu.dot_dimension_numbers<[1], [0], [0], [1], [0, 0, 1, 1], [], []>} : vector<16x64xbf16>, vector<64x128xbf16>, vector<16x128xf32> -> vector<16x128xf32>
    %c0_4 = arith.constant 0 : index
    %c0_5 = arith.constant 0 : index
    %4 = vector.load %arg4[%c0_4, %c0_5] : memref<32x16xbf16, #tpu.memory_space<vmem>>, vector<32x16xbf16>
    %5 = arith.truncf %3 : vector<16x128xf32> to vector<16x128xbf16>
    %cst_6 = arith.constant dense<0.000000e+00> : vector<32x128xf32>
    %6 = tpu.matmul %4, %5, %cst_6 {dimension_numbers = #tpu.dot_dimension_numbers<[1], [0], [0], [1], [0, 0, 1, 1], [], []>} : vector<32x16xbf16>, vector<16x128xbf16>, vector<32x128xf32> -> vector<32x128xf32>
    %c0_7 = arith.constant 0 : index
    %c0_8 = arith.constant 0 : index
    %c0_9 = arith.constant 0 : index
    %7 = vector.load %arg1[%c0_7, %c0_8, %c0_9] : memref<1x32x128xbf16, #tpu.memory_space<vmem>>, vector<1x32x128xbf16>
    %8 = vector.shape_cast %7 : vector<1x32x128xbf16> to vector<32x128xbf16>
    %9 = arith.extf %8 : vector<32x128xbf16> to vector<32x128xf32>
    %10 = arith.addf %6, %9 : vector<32x128xf32>
    %11 = arith.truncf %10 : vector<32x128xf32> to vector<32x128xbf16>
    %c0_10 = arith.constant 0 : index
    %c0_11 = arith.constant 0 : index
    %c0_12 = arith.constant 0 : index
    %12 = vector.load %arg5[%c0_10, %c0_11, %c0_12] : memref<1x32x128xbf16, #tpu.memory_space<vmem>>, vector<1x32x128xbf16>
    %13 = vector.shape_cast %12 : vector<1x32x128xbf16> to vector<32x128xbf16>
    %14 = vector.shape_cast %11 : vector<32x128xbf16> to vector<1x32x128xbf16>
    tpu.vector_store %arg5[%c0_10, %c0_11, %c0_12], %14 {strides = array<i32>} : memref<1x32x128xbf16, #tpu.memory_space<vmem>>, vector<1x32x128xbf16>,
    return
  }
  func.func @transform_0(%arg0: i32) -> (i32, i32, i32) {
    %c0_i32 = arith.constant 0 : i32
    %c0_i32_0 = arith.constant 0 : i32
    %c0_i32_1 = arith.constant 0 : i32
    return %arg0, %c0_i32, %c0_i32_0 : i32, i32, i32
  }
  func.func @transform_1(%arg0: i32) -> (i32, i32, i32) {
    %c0_i32 = arith.constant 0 : i32
    %c0_i32_0 = arith.constant 0 : i32
    %c0_i32_1 = arith.constant 0 : i32
    return %arg0, %c0_i32, %c0_i32_0 : i32, i32, i32
  }
  func.func @transform_2(%arg0: i32) -> (i32, i32) {
    %c0_i32 = arith.constant 0 : i32
    %c0_i32_0 = arith.constant 0 : i32
    %c0_i32_1 = arith.constant 0 : i32
    return %c0_i32, %c0_i32_0 : i32, i32
  }
  func.func @transform_3(%arg0: i32) -> (i32, i32) {
    %c0_i32 = arith.constant 0 : i32
    %c0_i32_0 = arith.constant 0 : i32
    %c0_i32_1 = arith.constant 0 : i32
    return %c0_i32, %c0_i32_0 : i32, i32
  }
  func.func @transform_4(%arg0: i32) -> (i32, i32, i32) {
    %c0_i32 = arith.constant 0 : i32
    %c0_i32_0 = arith.constant 0 : i32
    %c0_i32_1 = arith.constant 0 : i32
    return %arg0, %c0_i32, %c0_i32_0 : i32, i32, i32
  }
}

</mosaic_0001>

<bundles_post_ra>
// kernel: apply_hourglass.10
= control target key start
LH: loop header
LB: loop body
LE: loop exit
PB: predicated region body
PF: predicated region fallthrough
CT: control target
= control target key end

     0   :  { %s1524_s18 = smov 0   ;;  %s1762_s0 = inlined_call_operand.vmem [shape: bf16[2,16,64], index: 0, kind: input, shape index: {}]   ;;  %s1763_s1 = inlined_call_operand.vmem [shape: bf16[2,16,16], index: 1, kind: input, shape index: {}]   ;;  %s1764_s2 = inlined_call_operand.vmem [shape: bf16[3,64,128], index: 2, kind: input, shape index: {}]   ;;  %s1765_s3 = inlined_call_operand.vmem [shape: bf16[3,128,128], index: 3, kind: input, shape index: {}]   ;;  %s1766_s4 = inlined_call_operand.vmem [shape: bf16[64,128], index: 4, kind: input, shape index: {}]   ;;  %s1767_s5 = inlined_call_operand.vmem [shape: bf16[2,16,128], index: 5, kind: output, shape index: {}]  }
   0x1 LB: > { %s1121_s19 = sadd.s32 4294967295, %s1490_s18   ;;  %p1125_p0 = scmp.ge.s32.totalorder %s1490_s18, 1  ;;  %s1490_s18 = sphi %s1524_s18, %s15_s18  }
   0x2   : > { %p187_p1 = scmp.lt.s32.totalorder %s1490_s18, 3 }
   0x4   : > { %p188_p2 = pnand %p1125_p0, %p187_p1 }
   0x5   : > { %p215_p3 = scmp.lt.s32.totalorder (!%p188_p2), %s1121_s19, 1 }
   0x6   : > { %191 = sbr.rel (%p188_p2) target bundleno = 850 (0x352), region = 40 }
   0xb   : > { %v1492_v0 = vmov 0.0   ;;  %vm1493_vm0 = vmmov 0   ;;  %s1769_s19 = smov (!%p215_p3, %s1121_s19), 1  ;;  %v1444_v1 = vld [vmem:[%s1764_s2 + $0x38] sm:$0xff]   ;;  %v1445_v2 = vld [vmem:[%s1764_s2 + $0x30] sm:$0xff]   ;;  %v1558_v4 = vld [vmem:[%s1763_s1] sm:$0xff]  }
   0xc   : > { %1299 = vmatprep.subr.bf16.mxu1 %v1492_v0  ;;  %1301 = vmatprep.mubr.msk.bf16.mxu1 %vm1493_vm0, %v1492_v0  ;;  %s1235_s22 = sshll.u32 %s1769_s19, 3  ;;  %vm244_vm1 = vcmask 130048   ;;  %v1446_v5 = vld [vmem:[%s1764_s2 + $0x28] sm:$0xff]   ;;  %vm381_vm2 = vcmask 523264   ;;  %v1447_v6 = vld [vmem:[%s1764_s2 + $0x20] sm:$0xff]   ;;  %v1448_v8 = vld [vmem:[%s1764_s2 + $0x18] sm:$0xff]  }
   0xd   : > { %1311 = vmatprep.subr.bf16.mxu0 %v1492_v0  ;;  %1319 = vmatprep.mubr.msk.bf16.mxu0 %vm1493_vm0, %v1492_v0  ;;  %s219_s27 = scalar_lea.vmem %s1762_s0, %s1235_s22  ;;  %v1577_v7 = vld [vmem:[%s1763_s1 + $0x8] sm:$0xff]   ;;  %v1449_v9 = vld [vmem:[%s1764_s2 + $0x10] sm:$0xff]   ;;  %v1451_v11 = vld [vmem:[%s1764_s2 + $0x58] sm:$0xff]   ;;  %s224_s21 = scalar_lea.vmem %s1767_s5, %s1235_s22 }
   0xe   : > { %1312 = vmatpush3.bf16.msra.mxu0 %v1444_v1  ;;  %v1553_v3 = vld [vmem:[%s219_s27] sm:$0xff]   ;;  %v1450_v10 = vld [vmem:[%s1764_s2 + $0x8] sm:$0xff]   ;;  %v1453_v13 = vld [vmem:[%s1764_s2 + $0x50] sm:$0xff]  }
   0xf   : > { %1313 = vmatprep.subr.bf16.mxu0 %v1492_v0  ;;  %1300 = vmatpush3.bf16.msra.mxu1 %v1553_v3  ;;  %v1452_v12 = vld [vmem:[%s1764_s2] sm:$0xff]   ;;  %v1454_v14 = vld [vmem:[%s1764_s2 + $0x48] sm:$0xff]   ;;  %v1456_v26 = vld [vmem:[%s1765_s3 + $0x78] sm:$0xff]  }
  0x10   : > { %1305 = vmatprep.subr.bf16.mxu1 %v1492_v0  ;;  %v1455_v15 = vld [vmem:[%s1764_s2 + $0x40] sm:$0xff]   ;;  %v1457_v31 = vld [vmem:[%s1765_s3 + $0x70] sm:$0xff]   ;;  %v1458_v32 = vld [vmem:[%s1765_s3 + $0x68] sm:$0xff]  }
  0x11   : > { %v1459_v33 = vld [vmem:[%s1765_s3 + $0x60] sm:$0xff]   ;;  %v1460_v34 = vld [vmem:[%s1765_s3 + $0x58] sm:$0xff]   ;;  %v1461_v35 = vld [vmem:[%s1765_s3 + $0x50] sm:$0xff]  }
  0x12   : > { %1314 = vmatpush3.bf16.msra.mxu0 %v1445_v2  ;;  %1302 = vmatmul.mubr.msk.bf16.vlgmr.msra.gmra.mxu1 %vm244_vm1, %v1558_v4  ;;  %v1462_v36 = vld [vmem:[%s1765_s3 + $0x48] sm:$0xff]   ;;  %v1463_v37 = vld [vmem:[%s1765_s3 + $0x40] sm:$0xff]   ;;  %v1467_v52 = vld [vmem:[%s1765_s3 + $0xb8] sm:$0xff]  }
  0x13   : > { %1315 = vmatprep.subr.bf16.mxu0 %v1492_v0  ;;  %1306 = vmatpush3.bf16.msra.mxu1 %v1553_v3  ;;  %v1469_v54 = vld [vmem:[%s1765_s3 + $0xb0] sm:$0xff]   ;;  %v1471_v55 = vld [vmem:[%s1765_s3 + $0xa8] sm:$0xff]   ;;  %v1464_v56 = vld [vmem:[%s1765_s3 + $0x38] sm:$0xff]  }
  0x14   : > { %1307 = vmatprep.mubr.msk.bf16.mxu1 %vm1493_vm0, %v1492_v0  ;;  %1323 = vmatprep.subr.bf16.mxu1 %v1492_v0  ;;  %v1473_v57 = vld [vmem:[%s1765_s3 + $0xa0] sm:$0xff]   ;;  %v1465_v58 = vld [vmem:[%s1765_s3 + $0x30] sm:$0xff]   ;;  %v1466_v59 = vld [vmem:[%s1765_s3 + $0x28] sm:$0xff]  }
  0x15   : > { %v1468_v60 = vld [vmem:[%s1765_s3 + $0x20] sm:$0xff]   ;;  %v1470_v61 = vld [vmem:[%s1765_s3 + $0x18] sm:$0xff]   ;;  %v1472_v62 = vld [vmem:[%s1765_s3 + $0x10] sm:$0xff]  }
  0x16   : > { %1316 = vmatpush3.bf16.msra.mxu0 %v1446_v5  ;;  %v1474_v63 = vld [vmem:[%s1765_s3 + $0x8] sm:$0xff]   ;;  %v1475_v1 = vld [vmem:[%s1765_s3 + $0x98] sm:$0xff]   ;;  %v1476_v2 = vld [vmem:[%s1765_s3] sm:$0xff]  }
  0x17   : > { %1317 = vmatprep.subr.bf16.mxu0 %v1492_v0  ;;  %v1479_v5 = vld [vmem:[%s1765_s3 + $0x88] sm:$0xff]  }
  0x1a   : > { %1318 = vmatpush3.bf16.msra.mxu0 %v1447_v6  ;;  %1308 = vmatmul.mubr.msk.bf16.vlgmr.msra.gmra.mxu1 %vm244_vm1, %v1577_v7  ;;  %v1481_v6 = vld [vmem:[%s1765_s3 + $0x80] sm:$0xff]  }
  0x1b   : > { %1335 = vmatprep.subr.bf16.mxu0 %v1492_v0  ;;  %1324 = vmatpush3.bf16.msra.mxu1 %v1448_v8 }
  0x1c   : > { %1325 = vmatprep.subr.bf16.mxu1 %v1492_v0  ;;  %1331 = vmatprep.mubr.msk.bf16.mxu1 %vm1493_vm0, %v1492_v0 }
  0x1d   : > { %1320 = vmatmul.mubr.msk.bf16.vlgmr.msra.gmra.mxu0 %vm381_vm2, %v1553_v3 }
  0x1e   : > { %1343 = vmatprep.mubr.msk.bf16.mxu0 %vm1493_vm0, %v1492_v0  ;;  %1336 = vmatpush3.bf16.msra.mxu0 %v1451_v11 }
  0x1f   : > { %1326 = vmatpush3.bf16.msra.mxu1 %v1449_v9  ;;  %1337 = vmatprep.subr.bf16.mxu0 %v1492_v0 }
  0x20   : > { %1327 = vmatprep.subr.bf16.mxu1 %v1492_v0 }
  0x22   : > { %1338 = vmatpush3.bf16.msra.mxu0 %v1453_v13 }
  0x23   : > { %1328 = vmatpush3.bf16.msra.mxu1 %v1450_v10  ;;  %1339 = vmatprep.subr.bf16.mxu0 %v1492_v0 }
  0x24   : > { %1329 = vmatprep.subr.bf16.mxu1 %v1492_v0 }
  0x26   : > { %1340 = vmatpush3.bf16.msra.mxu0 %v1454_v14  ;;  %v1478_v14 = vld [vmem:[%s1766_s4 + $0x18] sm:$0xff]  }
  0x27   : > { %1330 = vmatpush3.bf16.msra.mxu1 %v1452_v12  ;;  %1341 = vmatprep.subr.bf16.mxu0 %v1492_v0 }
  0x28   : > { %1347 = vmatprep.subr.bf16.mxu1 %v1492_v0 }
  0x2a   : > { %1342 = vmatpush3.bf16.msra.mxu0 %v1455_v15 }
  0x2b   : > { %1359 = vmatprep.subr.bf16.mxu0 %v1492_v0 }
  0xd2   : > { %v282_v16 = vpop.f32.mrf.mxu1 }
  0xd4   : > { %v1303_v17 = vpop.f32.mrf.mxu1 }
  0xd6   : > { %v285_v18 = vpop.f32.mrf.mxu1 }
  0xd7   : > { %v289_v19 = vpack.c.bf16 %v285_v18, %v282_v16  ;;  %v1480_v18 = vld [vmem:[%s1766_s4 + $0x10] sm:$0xff]  }
  0xd8   : > { %v1304_v20 = vpop.f32.mrf.mxu1 }
  0xd9   : > { %1332 = vmatmul.mubr.msk.bf16.vlgmr.msra.gmra.mxu1 %vm381_vm2, %v289_v19 }
  0xda   : > { %v332_v21 = vpop.f32.mrf.mxu1  ;;  %1349 = vmatprep.mubr.msk.bf16.mxu1 %vm1493_vm0, %v1492_v0 }
  0xdc   : > { %v1309_v23 = vpop.f32.mrf.mxu1 }
  0xdd   : > { %v419_v22 = vpop.f32.mrf.mxu0 }
  0xde   : > { %v335_v25 = vpop.f32.mrf.mxu1 }
  0xdf   : > { %v1321_v24 = vpop.f32.mrf.mxu0  ;;  %v339_v27 = vpack.c.bf16 %v335_v25, %v332_v21  ;;  %v1482_v21 = vld [vmem:[%s1766_s4 + $0x8] sm:$0xff]  }
  0xe0   : > { %v1310_v29 = vpop.f32.mrf.mxu1  ;;  %v1483_v24 = vld [vmem:[%s1766_s4] sm:$0xff]  }
  0xe1   : > { %v422_v28 = vpop.f32.mrf.mxu0  ;;  %1344 = vmatmul.mubr.msk.bf16.vlgmr.msra.gmra.mxu0 %vm381_vm2, %v339_v27 }
  0xe2   : > { %1360 = vmatpush3.bf16.msra.mxu0 %v1456_v26  ;;  %1375 = vmatprep.mubr.msk.bf16.mxu0 %vm1493_vm0, %v1492_v0 }
  0xe3   : > { %v1322_v30 = vpop.f32.mrf.mxu0  ;;  %1361 = vmatprep.subr.bf16.mxu0 %v1492_v0 }
  0xe6   : > { %1362 = vmatpush3.bf16.msra.mxu0 %v1457_v31 }
  0xe7   : > { %1363 = vmatprep.subr.bf16.mxu0 %v1492_v0 }
  0xea   : > { %1364 = vmatpush3.bf16.msra.mxu0 %v1458_v32 }
  0xeb   : > { %1365 = vmatprep.subr.bf16.mxu0 %v1492_v0 }
  0xee   : > { %1366 = vmatpush3.bf16.msra.mxu0 %v1459_v33 }
  0xef   : > { %1367 = vmatprep.subr.bf16.mxu0 %v1492_v0 }
  0xf2   : > { %1368 = vmatpush3.bf16.msra.mxu0 %v1460_v34 }
  0xf3   : > { %1369 = vmatprep.subr.bf16.mxu0 %v1492_v0 }
  0xf6   : > { %1370 = vmatpush3.bf16.msra.mxu0 %v1461_v35 }
  0xf7   : > { %1371 = vmatprep.subr.bf16.mxu0 %v1492_v0 }
  0xfa   : > { %1372 = vmatpush3.bf16.msra.mxu0 %v1462_v36 }
  0xfb   : > { %1373 = vmatprep.subr.bf16.mxu0 %v1492_v0 }
  0xfe   : > { %1374 = vmatpush3.bf16.msra.mxu0 %v1463_v37 }
  0xff   : > { %1399 = vmatprep.subr.bf16.mxu0 %v1492_v0 }
 0x199   : > { %v487_v38 = vpop.f32.mrf.mxu1 }
 0x19a   : > { %v488_v43 = vadd.f32 %v487_v38, %v419_v22 }
 0x19b   : > { %v1333_v39 = vpop.f32.mrf.mxu1 }
 0x19d   : > { %v490_v40 = vpop.f32.mrf.mxu1 }
 0x19e   : > { %v491_v45 = vadd.f32 %v490_v40, %v422_v28 }
 0x19f   : > { %v1334_v41 = vpop.f32.mrf.mxu1 }
 0x1a1   : > { %v564_v42 = vpop.f32.mrf.mxu0 }
 0x1a2   : > { %v571_v46 = vadd.f32 %v564_v42, %v488_v43 }
 0x1a3   : > { %v1345_v44 = vpop.f32.mrf.mxu0 }
 0x1a4   : > { %v573_v50 = vmax.f32 %v571_v46, 0.0 }
 0x1a5   : > { %v567_v47 = vpop.f32.mrf.mxu0 }
 0x1a6   : > { %v572_v48 = vadd.f32 %v567_v47, %v491_v45 }
 0x1a7   : > { %v1346_v49 = vpop.f32.mrf.mxu0 }
 0x1a8   : > { %v574_v51 = vmax.f32 %v572_v48, 0.0 }
 0x1aa   : > { %v575_v53 = vpack.c.bf16 %v574_v51, %v573_v50 }
 0x1ac   : > { %1348 = vmatpush3.bf16.msra.mxu1 %v575_v53  ;;  %1376 = vmatmul.mubr.bf16.vlgmr.msra.gmra.mxu0 %v575_v53 }
 0x1ad   : > { %1353 = vmatprep.subr.bf16.mxu1 %v1492_v0  ;;  %1400 = vmatpush3.bf16.msra.mxu0 %v1467_v52 }
 0x1ae   : > { %1401 = vmatprep.subr.bf16.mxu0 %v1492_v0  ;;  %1415 = vmatprep.mubr.msk.bf16.mxu0 %vm1493_vm0, %v1492_v0 }
 0x1af   : > { %1350 = vmatmul.mubr.msk.bf16.vlgmr.msra.gmra.mxu1 %vm244_vm1, %v1558_v4  ;;  %v1477_v4 = vld [vmem:[%s1765_s3 + $0x90] sm:$0xff]  }
 0x1b0   : > { %1354 = vmatpush3.bf16.msra.mxu1 %v575_v53  ;;  %1355 = vmatprep.mubr.msk.bf16.mxu1 %vm1493_vm0, %v1492_v0 }
 0x1b1   : > { %1379 = vmatprep.subr.bf16.mxu1 %v1492_v0  ;;  %1402 = vmatpush3.bf16.msra.mxu0 %v1469_v54 }
 0x1b2   : > { %1403 = vmatprep.subr.bf16.mxu0 %v1492_v0 }
 0x1b5   : > { %1404 = vmatpush3.bf16.msra.mxu0 %v1471_v55 }
 0x1b6   : > { %1405 = vmatprep.subr.bf16.mxu0 %v1492_v0 }
 0x1b7   : > { %1356 = vmatmul.mubr.msk.bf16.vlgmr.msra.gmra.mxu1 %vm244_vm1, %v1577_v7 }
 0x1b8   : > { %1380 = vmatpush3.bf16.msra.mxu1 %v1464_v56  ;;  %1395 = vmatprep.mubr.msk.bf16.mxu1 %vm1493_vm0, %v1492_v0 }
 0x1b9   : > { %1381 = vmatprep.subr.bf16.mxu1 %v1492_v0  ;;  %1406 = vmatpush3.bf16.msra.mxu0 %v1473_v57 }
 0x1ba   : > { %1407 = vmatprep.subr.bf16.mxu0 %v1492_v0 }
 0x1bc   : > { %1382 = vmatpush3.bf16.msra.mxu1 %v1465_v58 }
 0x1bd   : > { %1383 = vmatprep.subr.bf16.mxu1 %v1492_v0  ;;  %1408 = vmatpush3.bf16.msra.mxu0 %v1475_v1 }
 0x1be   : > { %1409 = vmatprep.subr.bf16.mxu0 %v1492_v0 }
 0x1c0   : > { %1384 = vmatpush3.bf16.msra.mxu1 %v1466_v59 }
 0x1c1   : > { %1385 = vmatprep.subr.bf16.mxu1 %v1492_v0  ;;  %1410 = vmatpush3.bf16.msra.mxu0 %v1477_v4 }
 0x1c2   : > { %1411 = vmatprep.subr.bf16.mxu0 %v1492_v0 }
 0x1c4   : > { %1386 = vmatpush3.bf16.msra.mxu1 %v1468_v60 }
 0x1c5   : > { %1387 = vmatprep.subr.bf16.mxu1 %v1492_v0  ;;  %1412 = vmatpush3.bf16.msra.mxu0 %v1479_v5 }
 0x1c6   : > { %1413 = vmatprep.subr.bf16.mxu0 %v1492_v0 }
 0x1c8   : > { %1388 = vmatpush3.bf16.msra.mxu1 %v1470_v61 }
 0x1c9   : > { %1389 = vmatprep.subr.bf16.mxu1 %v1492_v0  ;;  %1414 = vmatpush3.bf16.msra.mxu0 %v1481_v6 }
 0x1cc   : > { %1390 = vmatpush3.bf16.msra.mxu1 %v1472_v62 }
 0x1cd   : > { %1391 = vmatprep.subr.bf16.mxu1 %v1492_v0 }
 0x1d0   : > { %1392 = vmatpush3.bf16.msra.mxu1 %v1474_v63 }
 0x1d1   : > { %1393 = vmatprep.subr.bf16.mxu1 %v1492_v0 }
 0x1d4   : > { %1394 = vmatpush3.bf16.msra.mxu1 %v1476_v2 }
 0x1d5   : > { %1419 = vmatprep.subr.bf16.mxu1 %v1492_v0 }
 0x26c   : > { %v775_v7 = vpop.f32.mrf.mxu0 }
 0x26e   : > { %v1377_v8 = vpop.f32.mrf.mxu0 }
 0x26f   : > { %v610_v9 = vpop.f32.mrf.mxu1 }
 0x270   : > { %v778_v10 = vpop.f32.mrf.mxu0 }
 0x271   : > { %v1351_v11 = vpop.f32.mrf.mxu1 }
 0x272   : > { %v1378_v12 = vpop.f32.mrf.mxu0 }
 0x273   : > { %v613_v13 = vpop.f32.mrf.mxu1 }
 0x274   : > { %v617_v15 = vpack.c.bf16 %v613_v13, %v610_v9 }
 0x275   : > { %v1352_v16 = vpop.f32.mrf.mxu1 }
 0x276   : > { %1396 = vmatmul.mubr.bf16.vlgmr.msra.gmra.mxu1 %v617_v15 }
 0x277   : > { %1420 = vmatpush3.bf16.msra.mxu1 %v1478_v14  ;;  %v652_v17 = vpop.f32.mrf.mxu1  ;;  %1427 = vmatprep.mubr.msk.bf16.mxu1 %vm1493_vm0, %v1492_v0 }
 0x278   : > { %1421 = vmatprep.subr.bf16.mxu1 %v1492_v0 }
 0x279   : > { %v1357_v19 = vpop.f32.mrf.mxu1 }
 0x27b   : > { %1422 = vmatpush3.bf16.msra.mxu1 %v1480_v18  ;;  %v655_v20 = vpop.f32.mrf.mxu1 }
 0x27c   : > { %v659_v22 = vpack.c.bf16 %v655_v20, %v652_v17  ;;  %1423 = vmatprep.subr.bf16.mxu1 %v1492_v0 }
 0x27d   : > { %v1358_v23 = vpop.f32.mrf.mxu1 }
 0x27e   : > { %1416 = vmatmul.mubr.bf16.vlgmr.msra.gmra.mxu0 %v659_v22 }
 0x27f   : > { %1424 = vmatpush3.bf16.msra.mxu1 %v1482_v21 }
 0x280   : > { %1425 = vmatprep.subr.bf16.mxu1 %v1492_v0 }
 0x283   : > { %1426 = vmatpush3.bf16.msra.mxu1 %v1483_v24 }
 0x286   : > { %1428 = vmatmul.mubr.msk.bf16.vlgmr.msra.gmra.mxu1 %vm381_vm2, %v1553_v3 }
 0x336   : > { %v864_v25 = vpop.f32.mrf.mxu1 }
 0x337   : > { %v865_v33 = vadd.f32 %v864_v25, %v775_v7 }
 0x338   : > { %v1397_v26 = vpop.f32.mrf.mxu1 }
 0x33a   : > { %v867_v27 = vpop.f32.mrf.mxu1 }
 0x33b   : > { %v868_v35 = vadd.f32 %v867_v27, %v778_v10 }
 0x33c   : > { %v1398_v28 = vpop.f32.mrf.mxu1 }
 0x33e   : > { %v970_v29 = vpop.f32.mrf.mxu0 }
 0x33f   : > { %v977_v36 = vadd.f32 %v970_v29, %v865_v33 }
 0x340   : > { %v1417_v30 = vpop.f32.mrf.mxu0 }
 0x342   : > { %v973_v31 = vpop.f32.mrf.mxu0 }
 0x343   : > { %v978_v38 = vadd.f32 %v973_v31, %v868_v35 }
 0x344   : > { %v1418_v32 = vpop.f32.mrf.mxu0 }
 0x346   : > { %v1045_v34 = vpop.f32.mrf.mxu1 }
 0x347   : > { %v1052_v0 = vadd.f32 %v1045_v34, %v977_v36 }
 0x348   : > { %v1429_v37 = vpop.f32.mrf.mxu1 }
 0x349   : > { %v1054_v3 = vmax.f32 %v1052_v0, 0.0 }
 0x34a   : > { %v1048_v39 = vpop.f32.mrf.mxu1 }
 0x34b   : > { %v1053_v40 = vadd.f32 %v1048_v39, %v978_v38 }
 0x34c   : > { %v1430_v41 = vpop.f32.mrf.mxu1 }
 0x34d   : > { %v1055_v42 = vmax.f32 %v1053_v40, 0.0 }
 0x34f   : > { %v1242_v43 = vpack.c.bf16 %v1055_v42, %v1054_v3 }
 0x351   : > { %1243 = vst [vmem:[%s224_s21] sm:$0xff] %v1242_v43  }
 0x352 PF: > { %s15_s18 = sadd.s32 1, %s1490_s18  }
 0x353   : > { %p12_p4 = scmp.ge.s32.totalorder %s15_s18, 4  }
 0x355   :  { %14 = sbr.rel (!%p12_p4) target bundleno = 1 (0x1), region = 75 }

// kernel: apply_hourglass.12
= control target key start
LH: loop header
LB: loop body
LE: loop exit
PB: predicated region body
PF: predicated region fallthrough
CT: control target
= control target key end

     0   :  { %s1171_s15 = smov 0   ;;  %s1346_s0 = inlined_call_operand.vmem [shape: bf16[2,8,64], index: 0, kind: input, shape index: {}]   ;;  %s1347_s1 = inlined_call_operand.vmem [shape: bf16[2,8,8], index: 1, kind: input, shape index: {}]   ;;  %s1348_s2 = inlined_call_operand.vmem [shape: bf16[3,64,64], index: 2, kind: input, shape index: {}]   ;;  %s1349_s3 = inlined_call_operand.vmem [shape: bf16[3,64,64], index: 3, kind: input, shape index: {}]   ;;  %s1350_s4 = inlined_call_operand.vmem [shape: bf16[2,8,64], index: 4, kind: output, shape index: {}]  }
   0x1 LB: > { %s892_s16 = sadd.s32 4294967295, %s1142_s15   ;;  %p896_p0 = scmp.ge.s32.totalorder %s1142_s15, 1  ;;  %s1142_s15 = sphi %s1171_s15, %s14_s15  }
   0x2   : > { %p161_p1 = scmp.lt.s32.totalorder %s1142_s15, 3 }
   0x4   : > { %p162_p2 = pnand %p896_p0, %p161_p1 }
   0x5   : > { %p185_p3 = scmp.lt.s32.totalorder (!%p162_p2), %s892_s16, 1 }
   0x6   : > { %165 = sbr.rel (%p162_p2) target bundleno = 830 (0x33e), region = 36 }
   0xb   : > { %v1144_v0 = vmov 0.0   ;;  %vm1145_vm0 = vmmov 0   ;;  %v1112_v1 = vld [vmem:[%s1348_s2 + $0x38] sm:$0xff]   ;;  %s1352_s16 = smov (!%p185_p3, %s892_s16), 1  ;;  %v1113_v2 = vld [vmem:[%s1348_s2 + $0x30] sm:$0xff]   ;;  %vm202_vm1 = vcmask 1043456  }
   0xc   : > { %1006 = vmatprep.subr.bf16.mxu1 %v1144_v0  ;;  %1008 = vmatprep.mubr.msk.bf16.mxu1 %vm1145_vm0, %v1144_v0  ;;  %s897_s21 = sshll.u32 %s1352_s16, 2  ;;  %v1205_v4 = vld [vmem:[%s1347_s1] sm:$0xf]  ;;  %v1114_v6 = vld [vmem:[%s1348_s2 + $0x28] sm:$0xff]   ;;  %vm198_vm2 = vcmask 64512   ;;  %vm332_vm3 = vcmask 523264  }
   0xd   : > { %1018 = vmatprep.subr.bf16.mxu0 %v1144_v0  ;;  %1026 = vmatprep.mubr.msk.bf16.mxu0 %vm1145_vm0, %v1144_v0  ;;  %s188_s24 = scalar_lea.vmem %s1346_s0, %s897_s21  ;;  %v1115_v7 = vld [vmem:[%s1348_s2 + $0x20] sm:$0xff]   ;;  %v1119_v8 = vld [vmem:[%s1348_s2 + $0x58] sm:$0xff]   ;;  %v1117_v11 = vld [vmem:[%s1348_s2 + $0x10] sm:$0xff]   ;;  %s192_s29 = scalar_lea.vmem %s1350_s4, %s897_s21  ;;  %vm837_vm4 = vcmask 519168  }
   0xe   : > { %1019 = vmatpush3.bf16.msra.mxu0 %v1112_v1  ;;  %v1200_v3 = vld [vmem:[%s188_s24] sm:$0xf]  ;;  %v1229_v9 = vld [vmem:[%s1347_s1 + $0x4] sm:$0xf]  ;;  %v1116_v10 = vld [vmem:[%s1348_s2 + $0x18] sm:$0xff]  }
   0xf   : > { %1020 = vmatprep.subr.bf16.mxu0 %v1144_v0  ;;  %v204_v5 = vsel %vm202_vm1, %v1200_v3, 0  ;;  %v1118_v12 = vld [vmem:[%s1348_s2 + $0x8] sm:$0xff]   ;;  %v1120_v13 = vld [vmem:[%s1348_s2] sm:$0xff]   ;;  %v1121_v14 = vld [vmem:[%s1348_s2 + $0x50] sm:$0xff]  }
  0x10   : > { %1007 = vmatpush3.bf16.msra.mxu1 %v204_v5  ;;  %v1122_v15 = vld [vmem:[%s1348_s2 + $0x48] sm:$0xff]   ;;  %v1123_v16 = vld [vmem:[%s1348_s2 + $0x40] sm:$0xff]   ;;  %v1124_v31 = vld [vmem:[%s1349_s3 + $0x38] sm:$0xff]  }
  0x11   : > { %1012 = vmatprep.subr.bf16.mxu1 %v1144_v0  ;;  %v1125_v32 = vld [vmem:[%s1349_s3 + $0x30] sm:$0xff]   ;;  %v1126_v33 = vld [vmem:[%s1349_s3 + $0x28] sm:$0xff]   ;;  %v1127_v34 = vld [vmem:[%s1349_s3 + $0x20] sm:$0xff]  }
  0x12   : > { %1021 = vmatpush3.bf16.msra.mxu0 %v1113_v2  ;;  %v1128_v48 = vld [vmem:[%s1349_s3 + $0x18] sm:$0xff]   ;;  %v1129_v49 = vld [vmem:[%s1349_s3 + $0x10] sm:$0xff]   ;;  %v1130_v50 = vld [vmem:[%s1349_s3 + $0x8] sm:$0xff]  }
  0x13   : > { %1022 = vmatprep.subr.bf16.mxu0 %v1144_v0  ;;  %1009 = vmatmul.mubr.msk.bf16.vlgmr.msra.gmra.mxu1 %vm198_vm2, %v1205_v4  ;;  %v1131_v51 = vld [vmem:[%s1349_s3 + $0x58] sm:$0xff]   ;;  %v1132_v52 = vld [vmem:[%s1349_s3] sm:$0xff]   ;;  %v1133_v53 = vld [vmem:[%s1349_s3 + $0x50] sm:$0xff]  }
  0x14   : > { %1013 = vmatpush3.bf16.msra.mxu1 %v204_v5  ;;  %1014 = vmatprep.mubr.msk.bf16.mxu1 %vm1145_vm0, %v1144_v0  ;;  %v1134_v54 = vld [vmem:[%s1349_s3 + $0x48] sm:$0xff]   ;;  %v1135_v55 = vld [vmem:[%s1349_s3 + $0x40] sm:$0xff]  }
  0x15   : > { %1030 = vmatprep.subr.bf16.mxu1 %v1144_v0 }
  0x16   : > { %1023 = vmatpush3.bf16.msra.mxu0 %v1114_v6 }
  0x17   : > { %1024 = vmatprep.subr.bf16.mxu0 %v1144_v0 }
  0x1a   : > { %1025 = vmatpush3.bf16.msra.mxu0 %v1115_v7 }
  0x1b   : > { %1042 = vmatprep.subr.bf16.mxu0 %v1144_v0  ;;  %1015 = vmatmul.mubr.msk.bf16.vlgmr.msra.gmra.mxu1 %vm198_vm2, %v1229_v9 }
  0x1c   : > { %1031 = vmatpush3.bf16.msra.mxu1 %v1116_v10  ;;  %1038 = vmatprep.mubr.msk.bf16.mxu1 %vm1145_vm0, %v1144_v0 }
  0x1d   : > { %1027 = vmatmul.mubr.msk.bf16.vlgmr.msra.gmra.mxu0 %vm332_vm3, %v1200_v3  ;;  %1032 = vmatprep.subr.bf16.mxu1 %v1144_v0 }
  0x1e   : > { %1043 = vmatpush3.bf16.msra.mxu0 %v1119_v8  ;;  %1050 = vmatprep.mubr.msk.bf16.mxu0 %vm1145_vm0, %v1144_v0 }
  0x1f   : > { %1044 = vmatprep.subr.bf16.mxu0 %v1144_v0 }
  0x20   : > { %1033 = vmatpush3.bf16.msra.mxu1 %v1117_v11 }
  0x21   : > { %1034 = vmatprep.subr.bf16.mxu1 %v1144_v0 }
  0x22   : > { %1045 = vmatpush3.bf16.msra.mxu0 %v1121_v14 }
  0x23   : > { %1046 = vmatprep.subr.bf16.mxu0 %v1144_v0 }
  0x24   : > { %1035 = vmatpush3.bf16.msra.mxu1 %v1118_v12  ;;  %v833_v12 = vunpack.c.l.bf16 %v1200_v3 }
  0x25   : > { %1036 = vmatprep.subr.bf16.mxu1 %v1144_v0 }
  0x26   : > { %1047 = vmatpush3.bf16.msra.mxu0 %v1122_v15 }
  0x27   : > { %1048 = vmatprep.subr.bf16.mxu0 %v1144_v0 }
  0x28   : > { %1037 = vmatpush3.bf16.msra.mxu1 %v1120_v13 }
  0x29   : > { %1054 = vmatprep.subr.bf16.mxu1 %v1144_v0 }
  0x2a   : > { %1049 = vmatpush3.bf16.msra.mxu0 %v1123_v16 }
  0x2b   : > { %1066 = vmatprep.subr.bf16.mxu0 %v1144_v0 }
  0xd3   : > { %v240_v17 = vpop.f32.mrf.mxu1 }
  0xd4   : > { %v246_v18 = vpack.c.bf16 %v240_v17, %v240_v17 }
  0xd5   : > { %v1010_v19 = vpop.f32.mrf.mxu1 }
  0xd6   : > { %1039 = vmatmul.mubr.msk.bf16.vlgmr.msra.gmra.mxu1 %vm332_vm3, %v246_v18 }
  0xd7   : > { %v243_v20 = vpop.f32.mrf.mxu1  ;;  %1056 = vmatprep.mubr.msk.bf16.mxu1 %vm1145_vm0, %v1144_v0 }
  0xd9   : > { %v1011_v21 = vpop.f32.mrf.mxu1 }
  0xdb   : > { %v284_v23 = vpop.f32.mrf.mxu1 }
  0xdc   : > { %v290_v24 = vpack.c.bf16 %v284_v23, %v284_v23 }
  0xdd   : > { %v369_v22 = vpop.f32.mrf.mxu0  ;;  %v1016_v26 = vpop.f32.mrf.mxu1 }
  0xde   : > { %1051 = vmatmul.mubr.msk.bf16.vlgmr.msra.gmra.mxu0 %vm332_vm3, %v290_v24 }
  0xdf   : > { %v1028_v25 = vpop.f32.mrf.mxu0  ;;  %v287_v28 = vpop.f32.mrf.mxu1  ;;  %1074 = vmatprep.mubr.msk.bf16.mxu0 %vm1145_vm0, %v1144_v0  ;;  %1067 = vmatpush3.bf16.msra.mxu0 %v1124_v31 }
  0xe0   : > { %1068 = vmatprep.subr.bf16.mxu0 %v1144_v0 }
  0xe1   : > { %v372_v27 = vpop.f32.mrf.mxu0  ;;  %v1017_v30 = vpop.f32.mrf.mxu1 }
  0xe3   : > { %v1029_v29 = vpop.f32.mrf.mxu0  ;;  %1069 = vmatpush3.bf16.msra.mxu0 %v1125_v32 }
  0xe4   : > { %1070 = vmatprep.subr.bf16.mxu0 %v1144_v0 }
  0xe7   : > { %1071 = vmatpush3.bf16.msra.mxu0 %v1126_v33 }
  0xe8   : > { %1072 = vmatprep.subr.bf16.mxu0 %v1144_v0 }
  0xeb   : > { %1073 = vmatpush3.bf16.msra.mxu0 %v1127_v34 }
  0xec   : > { %1090 = vmatprep.subr.bf16.mxu0 %v1144_v0 }
 0x196   : > { %v436_v35 = vpop.f32.mrf.mxu1 }
 0x197   : > { %v437_v39 = vadd.f32 %v436_v35, %v369_v22 }
 0x198   : > { %v1040_v36 = vpop.f32.mrf.mxu1 }
 0x19a   : > { %v439_v37 = vpop.f32.mrf.mxu1 }
 0x19c   : > { %v1041_v38 = vpop.f32.mrf.mxu1 }
 0x19e   : > { %v512_v40 = vpop.f32.mrf.mxu0 }
 0x19f   : > { %v518_v41 = vadd.f32 %v512_v40, %v437_v39 }
 0x1a0   : > { %v1052_v42 = vpop.f32.mrf.mxu0 }
 0x1a1   : > { %v519_v43 = vmax.f32 %v518_v41, 0.0 }
 0x1a2   : > { %v515_v44 = vpop.f32.mrf.mxu0 }
 0x1a3   : > { %v520_v45 = vpack.c.bf16 %v519_v43, %v519_v43 }
 0x1a4   : > { %v1053_v46 = vpop.f32.mrf.mxu0 }
 0x1a5   : > { %1075 = vmatmul.mubr.msk.bf16.vlgmr.msra.gmra.mxu0 %vm332_vm3, %v520_v45  ;;  %v522_v47 = vsel %vm202_vm1, %v520_v45, 0 }
 0x1a6   : > { %1055 = vmatpush3.bf16.msra.mxu1 %v522_v47  ;;  %1098 = vmatprep.mubr.msk.bf16.mxu0 %vm1145_vm0, %v1144_v0 }
 0x1a7   : > { %1060 = vmatprep.subr.bf16.mxu1 %v1144_v0  ;;  %1091 = vmatpush3.bf16.msra.mxu0 %v1131_v51 }
 0x1a8   : > { %1092 = vmatprep.subr.bf16.mxu0 %v1144_v0 }
 0x1a9   : > { %1057 = vmatmul.mubr.msk.bf16.vlgmr.msra.gmra.mxu1 %vm198_vm2, %v1205_v4 }
 0x1aa   : > { %1061 = vmatpush3.bf16.msra.mxu1 %v522_v47  ;;  %1062 = vmatprep.mubr.msk.bf16.mxu1 %vm1145_vm0, %v1144_v0 }
 0x1ab   : > { %1078 = vmatprep.subr.bf16.mxu1 %v1144_v0  ;;  %1093 = vmatpush3.bf16.msra.mxu0 %v1133_v53 }
 0x1ac   : > { %1094 = vmatprep.subr.bf16.mxu0 %v1144_v0 }
 0x1af   : > { %1095 = vmatpush3.bf16.msra.mxu0 %v1134_v54 }
 0x1b0   : > { %1096 = vmatprep.subr.bf16.mxu0 %v1144_v0 }
 0x1b1   : > { %1063 = vmatmul.mubr.msk.bf16.vlgmr.msra.gmra.mxu1 %vm198_vm2, %v1229_v9 }
 0x1b2   : > { %1079 = vmatpush3.bf16.msra.mxu1 %v1128_v48  ;;  %1086 = vmatprep.mubr.msk.bf16.mxu1 %vm1145_vm0, %v1144_v0 }
 0x1b3   : > { %1080 = vmatprep.subr.bf16.mxu1 %v1144_v0  ;;  %1097 = vmatpush3.bf16.msra.mxu0 %v1135_v55 }
 0x1b6   : > { %1081 = vmatpush3.bf16.msra.mxu1 %v1129_v49 }
 0x1b7   : > { %1082 = vmatprep.subr.bf16.mxu1 %v1144_v0 }
 0x1ba   : > { %1083 = vmatpush3.bf16.msra.mxu1 %v1130_v50 }
 0x1bb   : > { %1084 = vmatprep.subr.bf16.mxu1 %v1144_v0 }
 0x1be   : > { %1085 = vmatpush3.bf16.msra.mxu1 %v1132_v52 }
 0x265   : > { %v683_v56 = vpop.f32.mrf.mxu0 }
 0x267   : > { %v1076_v57 = vpop.f32.mrf.mxu0 }
 0x269   : > { %v558_v58 = vpop.f32.mrf.mxu1  ;;  %v686_v59 = vpop.f32.mrf.mxu0 }
 0x26a   : > { %v564_v60 = vpack.c.bf16 %v558_v58, %v558_v58 }
 0x26b   : > { %v1058_v61 = vpop.f32.mrf.mxu1  ;;  %v1077_v62 = vpop.f32.mrf.mxu0 }
 0x26c   : > { %1087 = vmatmul.mubr.msk.bf16.vlgmr.msra.gmra.mxu1 %vm332_vm3, %v564_v60 }
 0x26d   : > { %v561_v63 = vpop.f32.mrf.mxu1 }
 0x26f   : > { %v1059_v1 = vpop.f32.mrf.mxu1 }
 0x271   : > { %v599_v2 = vpop.f32.mrf.mxu1 }
 0x272   : > { %v605_v4 = vpack.c.bf16 %v599_v2, %v599_v2 }
 0x273   : > { %v1064_v5 = vpop.f32.mrf.mxu1 }
 0x274   : > { %1099 = vmatmul.mubr.msk.bf16.vlgmr.msra.gmra.mxu0 %vm332_vm3, %v605_v4 }
 0x275   : > { %v602_v0 = vpop.f32.mrf.mxu1 }
 0x277   : > { %v1065_v6 = vpop.f32.mrf.mxu1 }
 0x32c   : > { %v750_v7 = vpop.f32.mrf.mxu1 }
 0x32d   : > { %v751_v11 = vadd.f32 %v750_v7, %v683_v56 }
 0x32e   : > { %v1088_v8 = vpop.f32.mrf.mxu1 }
 0x330   : > { %v753_v9 = vpop.f32.mrf.mxu1 }
 0x332   : > { %v1089_v10 = vpop.f32.mrf.mxu1 }
 0x334   : > { %v826_v13 = vpop.f32.mrf.mxu0 }
 0x335   : > { %v832_v14 = vadd.f32 %v826_v13, %v751_v11 }
 0x336   : > { %v1100_v15 = vpop.f32.mrf.mxu0 }
 0x337   : > { %v834_v16 = vadd.f32 %v833_v12, %v832_v14 }
 0x338   : > { %v829_v17 = vpop.f32.mrf.mxu0 }
 0x339   : > { %v835_v18 = vmax.f32 %v834_v16, 0.0 }
 0x33a   : > { %v1101_v19 = vpop.f32.mrf.mxu0 }
 0x33b   : > { %v836_v20 = vpack.c.bf16 %v835_v18, %v835_v18 }
 0x33d   : > { %838 = vst.msk [vmem:[%s192_s29] sm:$0xf] %vm837_vm4, %v836_v20 }
 0x33e PF: > { %s14_s15 = sadd.s32 1, %s1142_s15  }
 0x33f   : > { %p11_p4 = scmp.ge.s32.totalorder %s14_s15, 4  }
 0x341   :  { %13 = sbr.rel (!%p11_p4) target bundleno = 1 (0x1), region = 71 }

// kernel: apply_hourglass.11
= control target key start
LH: loop header
LB: loop body
LE: loop exit
PB: predicated region body
PF: predicated region fallthrough
CT: control target
= control target key end

     0   :  { %s1555_s15 = smov 0   ;;  %s1820_s0 = inlined_call_operand.vmem [shape: bf16[2,16,128], index: 0, kind: input, shape index: {}]   ;;  %s1821_s1 = inlined_call_operand.vmem [shape: bf16[2,16,16], index: 1, kind: input, shape index: {}]   ;;  %s1822_s2 = inlined_call_operand.vmem [shape: bf16[3,128,128], index: 2, kind: input, shape index: {}]   ;;  %s1823_s3 = inlined_call_operand.vmem [shape: bf16[3,128,128], index: 3, kind: input, shape index: {}]   ;;  %s1824_s4 = inlined_call_operand.vmem [shape: bf16[2,16,128], index: 4, kind: output, shape index: {}]  }
   0x1 LB: > { %s1109_s16 = sadd.s32 4294967295, %s1526_s15   ;;  %p1113_p0 = scmp.ge.s32.totalorder %s1526_s15, 1  ;;  %s1526_s15 = sphi %s1555_s15, %s14_s15  }
   0x2   : > { %p162_p1 = scmp.lt.s32.totalorder %s1526_s15, 3 }
   0x4   : > { %p163_p2 = pnand %p1113_p0, %p162_p1 }
   0x5   : > { %p188_p3 = scmp.lt.s32.totalorder (!%p163_p2), %s1109_s16, 1 }
   0x6   : > { %166 = sbr.rel (%p163_p2) target bundleno = 832 (0x340), region = 36 }
   0xb   : > { %v1528_v0 = vmov 0.0   ;;  %s1826_s16 = smov (!%p188_p3, %s1109_s16), 1  ;;  %vm1529_vm0 = vmmov 0   ;;  %v1582_v2 = vld [vmem:[%s1821_s1] sm:$0xff]   ;;  %v1587_v3 = vld [vmem:[%s1821_s1 + $0x8] sm:$0xff]   ;;  %vm217_vm1 = vcmask 130048  }
   0xc   : > { %1314 = vmatprep.subr.bf16.mxu0 %v1528_v0  ;;  %1320 = vmatprep.subr.bf16.mxu1 %v1528_v0  ;;  %s1243_s17 = sshll.u32 %s1826_s16, 3  ;;  %v1471_v4 = vld [vmem:[%s1822_s2 + $0x78] sm:$0xff]   ;;  %v1472_v6 = vld [vmem:[%s1822_s2 + $0x70] sm:$0xff]   ;;  %v1473_v8 = vld [vmem:[%s1822_s2 + $0x68] sm:$0xff]  }
   0xd   : > { %1316 = vmatprep.mubr.msk.bf16.mxu0 %vm1529_vm0, %v1528_v0  ;;  %1322 = vmatprep.mubr.msk.bf16.mxu1 %vm1529_vm0, %v1528_v0  ;;  %s192_s20 = scalar_lea.vmem %s1820_s0, %s1243_s17  ;;  %v1479_v5 = vld [vmem:[%s1822_s2 + $0x38] sm:$0xff]   ;;  %v1481_v7 = vld [vmem:[%s1822_s2 + $0x30] sm:$0xff]   ;;  %v1483_v9 = vld [vmem:[%s1822_s2 + $0x28] sm:$0xff]   ;;  %s197_s5 = scalar_lea.vmem %s1824_s4, %s1243_s17 }
   0xe   : > { %v1577_v1 = vld [vmem:[%s192_s20] sm:$0xff]   ;;  %v1475_v12 = vld [vmem:[%s1822_s2 + $0x58] sm:$0xff]   ;;  %v1476_v14 = vld [vmem:[%s1822_s2 + $0x50] sm:$0xff]  }
   0xf   : > { %1315 = vmatpush3.bf16.msra.mxu0 %v1577_v1  ;;  %1321 = vmatpush3.bf16.msra.mxu1 %v1577_v1  ;;  %v1474_v10 = vld [vmem:[%s1822_s2 + $0x60] sm:$0xff]   ;;  %v1487_v13 = vld [vmem:[%s1822_s2 + $0x18] sm:$0xff]   ;;  %v1489_v15 = vld [vmem:[%s1822_s2 + $0x10] sm:$0xff]  }
  0x10   : > { %1326 = vmatprep.subr.bf16.mxu0 %v1528_v0  ;;  %1346 = vmatprep.subr.bf16.mxu1 %v1528_v0  ;;  %v1485_v11 = vld [vmem:[%s1822_s2 + $0x20] sm:$0xff]   ;;  %v1477_v16 = vld [vmem:[%s1822_s2 + $0x48] sm:$0xff]   ;;  %v1480_v18 = vld [vmem:[%s1822_s2 + $0xb8] sm:$0xff]  }
  0x11   : > { %v1478_v17 = vld [vmem:[%s1822_s2 + $0x40] sm:$0xff]   ;;  %v1482_v19 = vld [vmem:[%s1822_s2 + $0xb0] sm:$0xff]   ;;  %v1484_v20 = vld [vmem:[%s1822_s2 + $0xa8] sm:$0xff]  }
  0x12   : > { %1317 = vmatmul.mubr.msk.bf16.vlgmr.msra.gmra.mxu0 %vm217_vm1, %v1582_v2  ;;  %1323 = vmatmul.mubr.msk.bf16.vlgmr.msra.gmra.mxu1 %vm217_vm1, %v1587_v3  ;;  %v1486_v21 = vld [vmem:[%s1822_s2 + $0xa0] sm:$0xff]   ;;  %v1488_v22 = vld [vmem:[%s1822_s2 + $0x98] sm:$0xff]   ;;  %v1490_v23 = vld [vmem:[%s1822_s2 + $0x90] sm:$0xff]  }
  0x13   : > { %1327 = vmatpush3.bf16.msra.mxu0 %v1471_v4  ;;  %1342 = vmatprep.mubr.msk.bf16.mxu0 %vm1529_vm0, %v1528_v0  ;;  %v1491_v24 = vld [vmem:[%s1822_s2 + $0x8] sm:$0xff]   ;;  %v1493_v26 = vld [vmem:[%s1822_s2] sm:$0xff]   ;;  %v1495_v57 = vld [vmem:[%s1823_s3 + $0x78] sm:$0xff]  }
  0x14   : > { %1328 = vmatprep.subr.bf16.mxu0 %v1528_v0  ;;  %1347 = vmatpush3.bf16.msra.mxu1 %v1479_v5  ;;  %v1492_v25 = vld [vmem:[%s1822_s2 + $0x88] sm:$0xff]   ;;  %v1494_v27 = vld [vmem:[%s1822_s2 + $0x80] sm:$0xff]   ;;  %v1503_v58 = vld [vmem:[%s1823_s3 + $0x38] sm:$0xff]  }
  0x15   : > { %1348 = vmatprep.subr.bf16.mxu1 %v1528_v0  ;;  %1362 = vmatprep.mubr.msk.bf16.mxu1 %vm1529_vm0, %v1528_v0  ;;  %v1496_v59 = vld [vmem:[%s1823_s3 + $0x70] sm:$0xff]   ;;  %v1497_v61 = vld [vmem:[%s1823_s3 + $0x68] sm:$0xff]   ;;  %v1498_v63 = vld [vmem:[%s1823_s3 + $0x60] sm:$0xff]  }
  0x16   : > { %v1505_v60 = vld [vmem:[%s1823_s3 + $0x30] sm:$0xff]   ;;  %v1507_v62 = vld [vmem:[%s1823_s3 + $0x28] sm:$0xff]   ;;  %v1511_v4 = vld [vmem:[%s1823_s3 + $0x18] sm:$0xff]  }
  0x17   : > { %1329 = vmatpush3.bf16.msra.mxu0 %v1472_v6  ;;  %v1500_v5 = vld [vmem:[%s1823_s3 + $0x50] sm:$0xff]  }
  0x18   : > { %1330 = vmatprep.subr.bf16.mxu0 %v1528_v0  ;;  %1349 = vmatpush3.bf16.msra.mxu1 %v1481_v7  ;;  %v1513_v6 = vld [vmem:[%s1823_s3 + $0x10] sm:$0xff]   ;;  %v1501_v7 = vld [vmem:[%s1823_s3 + $0x48] sm:$0xff]  }
  0x19   : > { %1350 = vmatprep.subr.bf16.mxu1 %v1528_v0 }
  0x1b   : > { %1331 = vmatpush3.bf16.msra.mxu0 %v1473_v8  ;;  %v1502_v8 = vld [vmem:[%s1823_s3 + $0x40] sm:$0xff]  }
  0x1c   : > { %1332 = vmatprep.subr.bf16.mxu0 %v1528_v0  ;;  %1351 = vmatpush3.bf16.msra.mxu1 %v1483_v9  ;;  %v1504_v9 = vld [vmem:[%s1823_s3 + $0xb8] sm:$0xff]  }
  0x1d   : > { %1352 = vmatprep.subr.bf16.mxu1 %v1528_v0 }
  0x1f   : > { %1333 = vmatpush3.bf16.msra.mxu0 %v1474_v10  ;;  %v1506_v10 = vld [vmem:[%s1823_s3 + $0xb0] sm:$0xff]  }
  0x20   : > { %1334 = vmatprep.subr.bf16.mxu0 %v1528_v0  ;;  %1353 = vmatpush3.bf16.msra.mxu1 %v1485_v11  ;;  %v1508_v11 = vld [vmem:[%s1823_s3 + $0xa8] sm:$0xff]  }
  0x21   : > { %1354 = vmatprep.subr.bf16.mxu1 %v1528_v0 }
  0x23   : > { %1335 = vmatpush3.bf16.msra.mxu0 %v1475_v12  ;;  %v1510_v12 = vld [vmem:[%s1823_s3 + $0xa0] sm:$0xff]  }
  0x24   : > { %1336 = vmatprep.subr.bf16.mxu0 %v1528_v0  ;;  %1355 = vmatpush3.bf16.msra.mxu1 %v1487_v13  ;;  %v1512_v13 = vld [vmem:[%s1823_s3 + $0x98] sm:$0xff]  }
  0x25   : > { %1356 = vmatprep.subr.bf16.mxu1 %v1528_v0 }
  0x27   : > { %1337 = vmatpush3.bf16.msra.mxu0 %v1476_v14  ;;  %v1514_v14 = vld [vmem:[%s1823_s3 + $0x90] sm:$0xff]  }
  0x28   : > { %1338 = vmatprep.subr.bf16.mxu0 %v1528_v0  ;;  %1357 = vmatpush3.bf16.msra.mxu1 %v1489_v15  ;;  %v1515_v15 = vld [vmem:[%s1823_s3 + $0x8] sm:$0xff]  }
  0x29   : > { %1358 = vmatprep.subr.bf16.mxu1 %v1528_v0 }
  0x2b   : > { %1339 = vmatpush3.bf16.msra.mxu0 %v1477_v16  ;;  %v1516_v16 = vld [vmem:[%s1823_s3 + $0x88] sm:$0xff]  }
  0x2c   : > { %1340 = vmatprep.subr.bf16.mxu0 %v1528_v0  ;;  %1359 = vmatpush3.bf16.msra.mxu1 %v1491_v24 }
  0x2d   : > { %1360 = vmatprep.subr.bf16.mxu1 %v1528_v0 }
  0x2f   : > { %1341 = vmatpush3.bf16.msra.mxu0 %v1478_v17  ;;  %v1517_v17 = vld [vmem:[%s1823_s3] sm:$0xff]  }
  0x30   : > { %1366 = vmatprep.subr.bf16.mxu0 %v1528_v0  ;;  %1361 = vmatpush3.bf16.msra.mxu1 %v1493_v26 }
  0x31   : > { %1392 = vmatprep.subr.bf16.mxu1 %v1528_v0 }
  0x32   : > { %1343 = vmatmul.mubr.bf16.vlgmr.msra.gmra.mxu0 %v1577_v1 }
  0x33   : > { %1367 = vmatpush3.bf16.msra.mxu0 %v1480_v18  ;;  %1382 = vmatprep.mubr.msk.bf16.mxu0 %vm1529_vm0, %v1528_v0  ;;  %v1518_v18 = vld [vmem:[%s1823_s3 + $0x80] sm:$0xff]  }
  0x34   : > { %1368 = vmatprep.subr.bf16.mxu0 %v1528_v0 }
  0x37   : > { %1369 = vmatpush3.bf16.msra.mxu0 %v1482_v19 }
  0x38   : > { %1370 = vmatprep.subr.bf16.mxu0 %v1528_v0 }
  0x3b   : > { %1371 = vmatpush3.bf16.msra.mxu0 %v1484_v20 }
  0x3c   : > { %1372 = vmatprep.subr.bf16.mxu0 %v1528_v0 }
  0x3f   : > { %1373 = vmatpush3.bf16.msra.mxu0 %v1486_v21 }
  0x40   : > { %1374 = vmatprep.subr.bf16.mxu0 %v1528_v0 }
  0x43   : > { %1375 = vmatpush3.bf16.msra.mxu0 %v1488_v22 }
  0x44   : > { %1376 = vmatprep.subr.bf16.mxu0 %v1528_v0 }
  0x47   : > { %1377 = vmatpush3.bf16.msra.mxu0 %v1490_v23 }
  0x48   : > { %1378 = vmatprep.subr.bf16.mxu0 %v1528_v0 }
  0x4b   : > { %1379 = vmatpush3.bf16.msra.mxu0 %v1492_v25 }
  0x4c   : > { %1380 = vmatprep.subr.bf16.mxu0 %v1528_v0 }
  0x4f   : > { %1381 = vmatpush3.bf16.msra.mxu0 %v1494_v27 }
  0x50   : > { %1386 = vmatprep.subr.bf16.mxu0 %v1528_v0 }
  0xd2   : > { %v255_v28 = vpop.f32.mrf.mxu0  ;;  %v305_v29 = vpop.f32.mrf.mxu1 }
  0xd4   : > { %v1318_v30 = vpop.f32.mrf.mxu0  ;;  %v1324_v31 = vpop.f32.mrf.mxu1 }
  0xd6   : > { %v258_v32 = vpop.f32.mrf.mxu0  ;;  %v308_v33 = vpop.f32.mrf.mxu1 }
  0xd7   : > { %v262_v34 = vpack.c.bf16 %v258_v32, %v255_v28  ;;  %v312_v35 = vpack.c.bf16 %v308_v33, %v305_v29 }
  0xd8   : > { %v1319_v36 = vpop.f32.mrf.mxu0  ;;  %v1325_v37 = vpop.f32.mrf.mxu1 }
  0xd9   : > { %1363 = vmatmul.mubr.bf16.vlgmr.msra.gmra.mxu1 %v262_v34  ;;  %1383 = vmatmul.mubr.bf16.vlgmr.msra.gmra.mxu0 %v312_v35 }
  0xda   : > { %1388 = vmatprep.mubr.msk.bf16.mxu0 %vm1529_vm0, %v1528_v0  ;;  %1394 = vmatprep.mubr.msk.bf16.mxu1 %vm1529_vm0, %v1528_v0 }
  0xf2   : > { %v428_v38 = vpop.f32.mrf.mxu0 }
  0xf4   : > { %v1344_v39 = vpop.f32.mrf.mxu0 }
  0xf6   : > { %v431_v40 = vpop.f32.mrf.mxu0 }
  0xf8   : > { %v1345_v41 = vpop.f32.mrf.mxu0 }
 0x199   : > { %v517_v42 = vpop.f32.mrf.mxu1  ;;  %v623_v43 = vpop.f32.mrf.mxu0 }
 0x19a   : > { %v518_v44 = vadd.f32 %v517_v42, %v428_v38  ;;  %v1038_v38 = vunpack.c.l.bf16 %v1577_v1  ;;  %v1039_v42 = vunpack.c.h.bf16 %v1577_v1 }
 0x19b   : > { %v1364_v45 = vpop.f32.mrf.mxu1  ;;  %v1384_v46 = vpop.f32.mrf.mxu0 }
 0x19c   : > { %v630_v49 = vadd.f32 %v623_v43, %v518_v44 }
 0x19d   : > { %v520_v47 = vpop.f32.mrf.mxu1  ;;  %v626_v48 = vpop.f32.mrf.mxu0 }
 0x19e   : > { %v521_v50 = vadd.f32 %v520_v47, %v431_v40  ;;  %v632_v54 = vmax.f32 %v630_v49, 0.0 }
 0x19f   : > { %v1365_v51 = vpop.f32.mrf.mxu1  ;;  %v1385_v52 = vpop.f32.mrf.mxu0 }
 0x1a0   : > { %v631_v53 = vadd.f32 %v626_v48, %v521_v50 }
 0x1a2   : > { %v633_v55 = vmax.f32 %v631_v53, 0.0 }
 0x1a4   : > { %v634_v56 = vpack.c.bf16 %v633_v55, %v632_v54 }
 0x1a6   : > { %1387 = vmatpush3.bf16.msra.mxu0 %v634_v56  ;;  %1393 = vmatpush3.bf16.msra.mxu1 %v634_v56 }
 0x1a7   : > { %1398 = vmatprep.subr.bf16.mxu1 %v1528_v0  ;;  %1418 = vmatprep.subr.bf16.mxu0 %v1528_v0 }
 0x1a9   : > { %1389 = vmatmul.mubr.msk.bf16.vlgmr.msra.gmra.mxu0 %vm217_vm1, %v1582_v2  ;;  %1395 = vmatmul.mubr.msk.bf16.vlgmr.msra.gmra.mxu1 %vm217_vm1, %v1587_v3  ;;  %v1509_v2 = vld [vmem:[%s1823_s3 + $0x20] sm:$0xff]   ;;  %v1499_v3 = vld [vmem:[%s1823_s3 + $0x58] sm:$0xff]  }
 0x1aa   : > { %1399 = vmatpush3.bf16.msra.mxu1 %v1495_v57  ;;  %1414 = vmatprep.mubr.msk.bf16.mxu1 %vm1529_vm0, %v1528_v0 }
 0x1ab   : > { %1400 = vmatprep.subr.bf16.mxu1 %v1528_v0  ;;  %1419 = vmatpush3.bf16.msra.mxu0 %v1503_v58 }
 0x1ac   : > { %1420 = vmatprep.subr.bf16.mxu0 %v1528_v0  ;;  %1434 = vmatprep.mubr.msk.bf16.mxu0 %vm1529_vm0, %v1528_v0 }
 0x1ae   : > { %1401 = vmatpush3.bf16.msra.mxu1 %v1496_v59 }
 0x1af   : > { %1402 = vmatprep.subr.bf16.mxu1 %v1528_v0  ;;  %1421 = vmatpush3.bf16.msra.mxu0 %v1505_v60 }
 0x1b0   : > { %1422 = vmatprep.subr.bf16.mxu0 %v1528_v0 }
 0x1b2   : > { %1403 = vmatpush3.bf16.msra.mxu1 %v1497_v61 }
 0x1b3   : > { %1404 = vmatprep.subr.bf16.mxu1 %v1528_v0  ;;  %1423 = vmatpush3.bf16.msra.mxu0 %v1507_v62 }
 0x1b4   : > { %1424 = vmatprep.subr.bf16.mxu0 %v1528_v0 }
 0x1b6   : > { %1405 = vmatpush3.bf16.msra.mxu1 %v1498_v63 }
 0x1b7   : > { %1406 = vmatprep.subr.bf16.mxu1 %v1528_v0  ;;  %1425 = vmatpush3.bf16.msra.mxu0 %v1509_v2 }
 0x1b8   : > { %1426 = vmatprep.subr.bf16.mxu0 %v1528_v0 }
 0x1ba   : > { %1407 = vmatpush3.bf16.msra.mxu1 %v1499_v3 }
 0x1bb   : > { %1408 = vmatprep.subr.bf16.mxu1 %v1528_v0  ;;  %1427 = vmatpush3.bf16.msra.mxu0 %v1511_v4 }
 0x1bc   : > { %1428 = vmatprep.subr.bf16.mxu0 %v1528_v0 }
 0x1be   : > { %1409 = vmatpush3.bf16.msra.mxu1 %v1500_v5 }
 0x1bf   : > { %1410 = vmatprep.subr.bf16.mxu1 %v1528_v0  ;;  %1429 = vmatpush3.bf16.msra.mxu0 %v1513_v6 }
 0x1c0   : > { %1430 = vmatprep.subr.bf16.mxu0 %v1528_v0 }
 0x1c2   : > { %1411 = vmatpush3.bf16.msra.mxu1 %v1501_v7 }
 0x1c3   : > { %1412 = vmatprep.subr.bf16.mxu1 %v1528_v0  ;;  %1431 = vmatpush3.bf16.msra.mxu0 %v1515_v15 }
 0x1c4   : > { %1432 = vmatprep.subr.bf16.mxu0 %v1528_v0 }
 0x1c6   : > { %1413 = vmatpush3.bf16.msra.mxu1 %v1502_v8 }
 0x1c7   : > { %1438 = vmatprep.subr.bf16.mxu1 %v1528_v0  ;;  %1433 = vmatpush3.bf16.msra.mxu0 %v1517_v17 }
 0x1c9   : > { %1415 = vmatmul.mubr.bf16.vlgmr.msra.gmra.mxu1 %v634_v56 }
 0x1ca   : > { %1439 = vmatpush3.bf16.msra.mxu1 %v1504_v9  ;;  %1454 = vmatprep.mubr.msk.bf16.mxu1 %vm1529_vm0, %v1528_v0 }
 0x1cb   : > { %1440 = vmatprep.subr.bf16.mxu1 %v1528_v0 }
 0x1ce   : > { %1441 = vmatpush3.bf16.msra.mxu1 %v1506_v10 }
 0x1cf   : > { %1442 = vmatprep.subr.bf16.mxu1 %v1528_v0 }
 0x1d2   : > { %1443 = vmatpush3.bf16.msra.mxu1 %v1508_v11 }
 0x1d3   : > { %1444 = vmatprep.subr.bf16.mxu1 %v1528_v0 }
 0x1d6   : > { %1445 = vmatpush3.bf16.msra.mxu1 %v1510_v12 }
 0x1d7   : > { %1446 = vmatprep.subr.bf16.mxu1 %v1528_v0 }
 0x1da   : > { %1447 = vmatpush3.bf16.msra.mxu1 %v1512_v13 }
 0x1db   : > { %1448 = vmatprep.subr.bf16.mxu1 %v1528_v0 }
 0x1de   : > { %1449 = vmatpush3.bf16.msra.mxu1 %v1514_v14 }
 0x1df   : > { %1450 = vmatprep.subr.bf16.mxu1 %v1528_v0 }
 0x1e2   : > { %1451 = vmatpush3.bf16.msra.mxu1 %v1516_v16 }
 0x1e3   : > { %1452 = vmatprep.subr.bf16.mxu1 %v1528_v0 }
 0x1e6   : > { %1453 = vmatpush3.bf16.msra.mxu1 %v1518_v18 }
 0x269   : > { %v669_v19 = vpop.f32.mrf.mxu0  ;;  %v711_v20 = vpop.f32.mrf.mxu1 }
 0x26b   : > { %v1390_v21 = vpop.f32.mrf.mxu0  ;;  %v1396_v22 = vpop.f32.mrf.mxu1 }
 0x26d   : > { %v672_v23 = vpop.f32.mrf.mxu0  ;;  %v714_v24 = vpop.f32.mrf.mxu1 }
 0x26e   : > { %v676_v25 = vpack.c.bf16 %v672_v23, %v669_v19  ;;  %v718_v26 = vpack.c.bf16 %v714_v24, %v711_v20 }
 0x26f   : > { %v1391_v27 = vpop.f32.mrf.mxu0  ;;  %v1397_v0 = vpop.f32.mrf.mxu1 }
 0x270   : > { %1435 = vmatmul.mubr.bf16.vlgmr.msra.gmra.mxu0 %v676_v25  ;;  %1455 = vmatmul.mubr.bf16.vlgmr.msra.gmra.mxu1 %v718_v26 }
 0x289   : > { %v834_v28 = vpop.f32.mrf.mxu1 }
 0x28b   : > { %v1416_v29 = vpop.f32.mrf.mxu1 }
 0x28d   : > { %v837_v30 = vpop.f32.mrf.mxu1 }
 0x28f   : > { %v1417_v31 = vpop.f32.mrf.mxu1 }
 0x330   : > { %v923_v32 = vpop.f32.mrf.mxu0  ;;  %v1029_v33 = vpop.f32.mrf.mxu1 }
 0x331   : > { %v924_v34 = vadd.f32 %v923_v32, %v834_v28 }
 0x332   : > { %v1436_v35 = vpop.f32.mrf.mxu0  ;;  %v1456_v36 = vpop.f32.mrf.mxu1 }
 0x333   : > { %v1036_v37 = vadd.f32 %v1029_v33, %v924_v34 }
 0x334   : > { %v926_v39 = vpop.f32.mrf.mxu0  ;;  %v1032_v40 = vpop.f32.mrf.mxu1 }
 0x335   : > { %v927_v41 = vadd.f32 %v926_v39, %v837_v30  ;;  %v1040_v45 = vadd.f32 %v1038_v38, %v1036_v37 }
 0x336   : > { %v1437_v43 = vpop.f32.mrf.mxu0  ;;  %v1457_v44 = vpop.f32.mrf.mxu1 }
 0x337   : > { %v1037_v46 = vadd.f32 %v1032_v40, %v927_v41  ;;  %v1042_v48 = vmax.f32 %v1040_v45, 0.0 }
 0x339   : > { %v1041_v47 = vadd.f32 %v1039_v42, %v1037_v46 }
 0x33b   : > { %v1043_v49 = vmax.f32 %v1041_v47, 0.0 }
 0x33d   : > { %v1250_v50 = vpack.c.bf16 %v1043_v49, %v1042_v48 }
 0x33f   : > { %1251 = vst [vmem:[%s197_s5] sm:$0xff] %v1250_v50  }
 0x340 PF: > { %s14_s15 = sadd.s32 1, %s1526_s15  }
 0x341   : > { %p11_p4 = scmp.ge.s32.totalorder %s14_s15, 4  }
 0x343   :  { %13 = sbr.rel (!%p11_p4) target bundleno = 1 (0x1), region = 71 }

// kernel: apply_hourglass.15
= control target key start
LH: loop header
LB: loop body
LE: loop exit
PB: predicated region body
PF: predicated region fallthrough
CT: control target
= control target key end

     0   :  { %s540_s15 = smov 0   ;;  %s579_s0 = inlined_call_operand.vmem [shape: bf16[2,16,128], index: 0, kind: input, shape index: {}]   ;;  %s580_s1 = inlined_call_operand.vmem [shape: bf16[2,8,64], index: 1, kind: input, shape index: {}]   ;;  %s581_s2 = inlined_call_operand.vmem [shape: bf16[64,128], index: 2, kind: input, shape index: {}]   ;;  %s582_s3 = inlined_call_operand.vmem [shape: bf16[16,8], index: 3, kind: input, shape index: {}]   ;;  %s583_s4 = inlined_call_operand.vmem [shape: bf16[2,16,128], index: 4, kind: output, shape index: {}]  }
   0x1 LB: > { %s431_s16 = sadd.s32 4294967295, %s511_s15   ;;  %p435_p0 = scmp.ge.s32.totalorder %s511_s15, 1  ;;  %s511_s15 = sphi %s540_s15, %s14_s15  }
   0x2   : > { %p171_p1 = scmp.lt.s32.totalorder %s511_s15, 3 }
   0x4   : > { %p172_p2 = pnand %p435_p0, %p171_p1 }
   0x5   : > { %p201_p3 = scmp.lt.s32.totalorder (!%p172_p2), %s431_s16, 1 }
   0x6   : > { %175 = sbr.rel (%p172_p2) target bundleno = 429 (0x1ad), region = 36 }
   0xb   : > { %v500_v0 = vld [vmem:[%s581_s2 + $0x18] sm:$0xff]   ;;  %v513_v1 = vmov 0.0   ;;  %v501_v2 = vld [vmem:[%s581_s2 + $0x10] sm:$0xff]   ;;  %vm514_vm0 = vmmov 0   ;;  %s585_s16 = smov (!%p201_p3, %s431_s16), 1  ;;  %v502_v3 = vld [vmem:[%s581_s2 + $0x8] sm:$0xff]  }
   0xc   : > { %472 = vmatprep.subr.bf16.mxu0 %v513_v1  ;;  %484 = vmatprep.subr.bf16.mxu1 %v513_v1  ;;  %s438_s23 = sshll.u32 %s585_s16, 2  ;;  %v503_v4 = vld [vmem:[%s581_s2] sm:$0xff]   ;;  %vm249_vm1 = vcmask 523264   ;;  %vm309_vm2 = vcmask 1043456   ;;  %vm305_vm3 = vcmask 64512   ;;  %s452_s5 = sshll.u32 %s585_s16, 3 }
   0xd   : > { %473 = vmatpush3.bf16.msra.mxu0 %v500_v0  ;;  %480 = vmatprep.mubr.msk.bf16.mxu0 %vm514_vm0, %v513_v1  ;;  %s209_s28 = scalar_lea.vmem %s580_s1, %s438_s23  ;;  %v504_v10 = vld [vmem:[%s582_s3] sm:$0xff]   ;;  %s205_s8 = scalar_lea.vmem %s579_s0, %s452_s5 }
   0xe   : > { %474 = vmatprep.subr.bf16.mxu0 %v513_v1  ;;  %486 = vmatprep.mubr.msk.bf16.mxu1 %vm514_vm0, %v513_v1  ;;  %v216_v5 = vld [vmem:[%s209_s28] sm:$0xf]  ;;  %s214_s11 = scalar_lea.vmem %s583_s4, %s452_s5 }
   0xf   : > { %v457_v13 = vld [vmem:[%s205_s8] sm:$0xff]  }
  0x10   : > { %v458_v15 = vunpack.c.l.bf16 %v457_v13  ;;  %v459_v16 = vunpack.c.h.bf16 %v457_v13 }
  0x11   : > { %475 = vmatpush3.bf16.msra.mxu0 %v501_v2 }
  0x12   : > { %476 = vmatprep.subr.bf16.mxu0 %v513_v1 }
  0x15   : > { %477 = vmatpush3.bf16.msra.mxu0 %v502_v3 }
  0x16   : > { %478 = vmatprep.subr.bf16.mxu0 %v513_v1 }
  0x19   : > { %479 = vmatpush3.bf16.msra.mxu0 %v503_v4 }
  0x1c   : > { %481 = vmatmul.mubr.msk.bf16.vlgmr.msra.gmra.mxu0 %vm249_vm1, %v216_v5 }
  0xdc   : > { %v287_v6 = vpop.f32.mrf.mxu0 }
  0xdd   : > { %v295_v7 = vpack.c.bf16 %v287_v6, %v287_v6 }
  0xde   : > { %v482_v8 = vpop.f32.mrf.mxu0 }
  0xdf   : > { %v311_v9 = vsel %vm309_vm2, %v295_v7, 0 }
  0xe0   : > { %v290_v11 = vpop.f32.mrf.mxu0  ;;  %485 = vmatpush3.bf16.msra.mxu1 %v311_v9 }
  0xe2   : > { %v483_v12 = vpop.f32.mrf.mxu0 }
  0xe3   : > { %487 = vmatmul.mubr.msk.bf16.vlgmr.msra.gmra.mxu1 %vm305_vm3, %v504_v10 }
 0x1a3   : > { %v347_v14 = vpop.f32.mrf.mxu1 }
 0x1a4   : > { %v348_v19 = vadd.f32 %v458_v15, %v347_v14 }
 0x1a5   : > { %v488_v17 = vpop.f32.mrf.mxu1 }
 0x1a7   : > { %v350_v18 = vpop.f32.mrf.mxu1 }
 0x1a8   : > { %v351_v20 = vadd.f32 %v459_v16, %v350_v18 }
 0x1a9   : > { %v489_v21 = vpop.f32.mrf.mxu1 }
 0x1aa   : > { %v463_v22 = vpack.c.bf16 %v351_v20, %v348_v19 }
 0x1ac   : > { %464 = vst [vmem:[%s214_s11] sm:$0xff] %v463_v22  }
 0x1ad PF: > { %s14_s15 = sadd.s32 1, %s511_s15  }
 0x1ae   : > { %p11_p4 = scmp.ge.s32.totalorder %s14_s15, 4  }
 0x1b0   :  { %13 = sbr.rel (!%p11_p4) target bundleno = 1 (0x1), region = 69 }

// kernel: apply_hourglass.16
= control target key start
LH: loop header
LB: loop body
LE: loop exit
PB: predicated region body
PF: predicated region fallthrough
CT: control target
= control target key end

     0   :  { %s1571_s18 = smov 0   ;;  %s1824_s0 = inlined_call_operand.vmem [shape: bf16[2,16,128], index: 0, kind: input, shape index: {}]   ;;  %s1825_s1 = inlined_call_operand.vmem [shape: bf16[2,16,16], index: 1, kind: input, shape index: {}]   ;;  %s1826_s2 = inlined_call_operand.vmem [shape: bf16[3,128,64], index: 2, kind: input, shape index: {}]   ;;  %s1827_s3 = inlined_call_operand.vmem [shape: bf16[3,64,64], index: 3, kind: input, shape index: {}]   ;;  %s1828_s4 = inlined_call_operand.vmem [shape: bf16[128,64], index: 4, kind: input, shape index: {}]   ;;  %s1829_s5 = inlined_call_operand.vmem [shape: bf16[2,16,64], index: 5, kind: output, shape index: {}]  }
   0x1 LB: > { %s1154_s19 = sadd.s32 4294967295, %s1537_s18   ;;  %p1158_p0 = scmp.ge.s32.totalorder %s1537_s18, 1  ;;  %s1537_s18 = sphi %s1571_s18, %s15_s18  }
   0x2   : > { %p187_p1 = scmp.lt.s32.totalorder %s1537_s18, 3 }
   0x4   : > { %p188_p2 = pnand %p1158_p0, %p187_p1 }
   0x5   : > { %p215_p3 = scmp.lt.s32.totalorder (!%p188_p2), %s1154_s19, 1 }
   0x6   : > { %191 = sbr.rel (%p188_p2) target bundleno = 846 (0x34e), region = 40 }
   0xb   : > { %v1539_v0 = vmov 0.0   ;;  %s1831_s19 = smov (!%p215_p3, %s1154_s19), 1  ;;  %vm1540_vm0 = vmmov 0   ;;  %v1596_v1 = vld [vmem:[%s1825_s1] sm:$0xff]   ;;  %v1603_v3 = vld [vmem:[%s1825_s1 + $0x8] sm:$0xff]   ;;  %vm244_vm1 = vcmask 130048  }
   0xc   : > { %1334 = vmatprep.subr.bf16.mxu0 %v1539_v0  ;;  %1340 = vmatprep.subr.bf16.mxu1 %v1539_v0  ;;  %s1271_s20 = sshll.u32 %s1831_s19, 3  ;;  %v1487_v4 = vld [vmem:[%s1826_s2 + $0x78] sm:$0xff]   ;;  %v1488_v5 = vld [vmem:[%s1826_s2 + $0x70] sm:$0xff]   ;;  %v1489_v8 = vld [vmem:[%s1826_s2 + $0x68] sm:$0xff]   ;;  %vm787_vm2 = vcmask 523264   ;;  %vm1096_vm3 = vcmask 519168  }
   0xd   : > { %1336 = vmatprep.mubr.msk.bf16.mxu0 %vm1540_vm0, %v1539_v0  ;;  %1342 = vmatprep.mubr.msk.bf16.mxu1 %vm1540_vm0, %v1539_v0  ;;  %s219_s23 = scalar_lea.vmem %s1824_s0, %s1271_s20  ;;  %v1495_v6 = vld [vmem:[%s1826_s2 + $0x38] sm:$0xff]   ;;  %v1497_v7 = vld [vmem:[%s1826_s2 + $0x30] sm:$0xff]   ;;  %v1499_v9 = vld [vmem:[%s1826_s2 + $0x28] sm:$0xff]   ;;  %s224_s30 = scalar_lea.vmem %s1829_s5, %s1271_s20 }
   0xe   : > { %v1598_v2 = vld [vmem:[%s219_s23] sm:$0xff]   ;;  %v1491_v12 = vld [vmem:[%s1826_s2 + $0x58] sm:$0xff]   ;;  %v1492_v14 = vld [vmem:[%s1826_s2 + $0x50] sm:$0xff]  }
   0xf   : > { %1335 = vmatpush3.bf16.msra.mxu0 %v1598_v2  ;;  %1341 = vmatpush3.bf16.msra.mxu1 %v1598_v2  ;;  %v1490_v10 = vld [vmem:[%s1826_s2 + $0x60] sm:$0xff]   ;;  %v1503_v13 = vld [vmem:[%s1826_s2 + $0x18] sm:$0xff]   ;;  %v1505_v15 = vld [vmem:[%s1826_s2 + $0x10] sm:$0xff]  }
  0x10   : > { %1346 = vmatprep.subr.bf16.mxu0 %v1539_v0  ;;  %1366 = vmatprep.subr.bf16.mxu1 %v1539_v0  ;;  %v1501_v11 = vld [vmem:[%s1826_s2 + $0x20] sm:$0xff]   ;;  %v1493_v16 = vld [vmem:[%s1826_s2 + $0x48] sm:$0xff]   ;;  %v1496_v18 = vld [vmem:[%s1826_s2 + $0xb8] sm:$0xff]  }
  0x11   : > { %v1494_v17 = vld [vmem:[%s1826_s2 + $0x40] sm:$0xff]   ;;  %v1498_v19 = vld [vmem:[%s1826_s2 + $0xb0] sm:$0xff]   ;;  %v1500_v20 = vld [vmem:[%s1826_s2 + $0xa8] sm:$0xff]  }
  0x12   : > { %1337 = vmatmul.mubr.msk.bf16.vlgmr.msra.gmra.mxu0 %vm244_vm1, %v1596_v1  ;;  %1343 = vmatmul.mubr.msk.bf16.vlgmr.msra.gmra.mxu1 %vm244_vm1, %v1603_v3  ;;  %v1502_v21 = vld [vmem:[%s1826_s2 + $0xa0] sm:$0xff]   ;;  %v1504_v22 = vld [vmem:[%s1826_s2 + $0x98] sm:$0xff]   ;;  %v1506_v23 = vld [vmem:[%s1826_s2 + $0x90] sm:$0xff]  }
  0x13   : > { %1347 = vmatpush3.bf16.msra.mxu0 %v1487_v4  ;;  %1362 = vmatprep.mubr.msk.bf16.mxu0 %vm1540_vm0, %v1539_v0  ;;  %v1507_v24 = vld [vmem:[%s1826_s2 + $0x8] sm:$0xff]   ;;  %v1509_v26 = vld [vmem:[%s1826_s2] sm:$0xff]   ;;  %v1516_v42 = vld [vmem:[%s1828_s4 + $0x38] sm:$0xff]  }
  0x14   : > { %1348 = vmatprep.subr.bf16.mxu0 %v1539_v0  ;;  %1382 = vmatprep.mubr.msk.bf16.mxu1 %vm1540_vm0, %v1539_v0  ;;  %v1508_v25 = vld [vmem:[%s1826_s2 + $0x88] sm:$0xff]   ;;  %v1510_v27 = vld [vmem:[%s1826_s2 + $0x80] sm:$0xff]   ;;  %v1518_v43 = vld [vmem:[%s1828_s4 + $0x30] sm:$0xff]  }
  0x15   : > { %1367 = vmatpush3.bf16.msra.mxu1 %v1495_v6  ;;  %v1511_v59 = vld [vmem:[%s1827_s3 + $0x38] sm:$0xff]   ;;  %v1512_v60 = vld [vmem:[%s1827_s3 + $0x30] sm:$0xff]   ;;  %v1513_v61 = vld [vmem:[%s1827_s3 + $0x28] sm:$0xff]  }
  0x16   : > { %1368 = vmatprep.subr.bf16.mxu1 %v1539_v0  ;;  %v1514_v62 = vld [vmem:[%s1827_s3 + $0x20] sm:$0xff]   ;;  %v1515_v63 = vld [vmem:[%s1827_s3 + $0x18] sm:$0xff]   ;;  %v1520_v4 = vld [vmem:[%s1828_s4 + $0x28] sm:$0xff]  }
  0x17   : > { %1349 = vmatpush3.bf16.msra.mxu0 %v1488_v5  ;;  %v1522_v5 = vld [vmem:[%s1828_s4 + $0x20] sm:$0xff]  }
  0x18   : > { %1350 = vmatprep.subr.bf16.mxu0 %v1539_v0  ;;  %v1521_v6 = vld [vmem:[%s1827_s3] sm:$0xff]  }
  0x19   : > { %1369 = vmatpush3.bf16.msra.mxu1 %v1497_v7  ;;  %v1524_v7 = vld [vmem:[%s1828_s4 + $0x18] sm:$0xff]  }
  0x1a   : > { %1370 = vmatprep.subr.bf16.mxu1 %v1539_v0 }
  0x1b   : > { %1351 = vmatpush3.bf16.msra.mxu0 %v1489_v8  ;;  %v1526_v8 = vld [vmem:[%s1828_s4 + $0x10] sm:$0xff]  }
  0x1c   : > { %1352 = vmatprep.subr.bf16.mxu0 %v1539_v0 }
  0x1d   : > { %1371 = vmatpush3.bf16.msra.mxu1 %v1499_v9  ;;  %v1528_v9 = vld [vmem:[%s1828_s4 + $0x8] sm:$0xff]  }
  0x1e   : > { %1372 = vmatprep.subr.bf16.mxu1 %v1539_v0 }
  0x1f   : > { %1353 = vmatpush3.bf16.msra.mxu0 %v1490_v10  ;;  %v1530_v10 = vld [vmem:[%s1828_s4] sm:$0xff]  }
  0x20   : > { %1354 = vmatprep.subr.bf16.mxu0 %v1539_v0 }
  0x21   : > { %1373 = vmatpush3.bf16.msra.mxu1 %v1501_v11 }
  0x22   : > { %1374 = vmatprep.subr.bf16.mxu1 %v1539_v0 }
  0x23   : > { %1355 = vmatpush3.bf16.msra.mxu0 %v1491_v12 }
  0x24   : > { %1356 = vmatprep.subr.bf16.mxu0 %v1539_v0 }
  0x25   : > { %1375 = vmatpush3.bf16.msra.mxu1 %v1503_v13 }
  0x26   : > { %1376 = vmatprep.subr.bf16.mxu1 %v1539_v0 }
  0x27   : > { %1357 = vmatpush3.bf16.msra.mxu0 %v1492_v14  ;;  %v1523_v14 = vld [vmem:[%s1827_s3 + $0x58] sm:$0xff]  }
  0x28   : > { %1358 = vmatprep.subr.bf16.mxu0 %v1539_v0 }
  0x29   : > { %1377 = vmatpush3.bf16.msra.mxu1 %v1505_v15 }
  0x2a   : > { %1378 = vmatprep.subr.bf16.mxu1 %v1539_v0 }
  0x2b   : > { %1359 = vmatpush3.bf16.msra.mxu0 %v1493_v16 }
  0x2c   : > { %1360 = vmatprep.subr.bf16.mxu0 %v1539_v0 }
  0x2d   : > { %1379 = vmatpush3.bf16.msra.mxu1 %v1507_v24 }
  0x2e   : > { %1380 = vmatprep.subr.bf16.mxu1 %v1539_v0 }
  0x2f   : > { %1361 = vmatpush3.bf16.msra.mxu0 %v1494_v17  ;;  %v1525_v17 = vld [vmem:[%s1827_s3 + $0x50] sm:$0xff]  }
  0x30   : > { %1386 = vmatprep.subr.bf16.mxu0 %v1539_v0 }
  0x31   : > { %1381 = vmatpush3.bf16.msra.mxu1 %v1509_v26 }
  0x32   : > { %1363 = vmatmul.mubr.bf16.vlgmr.msra.gmra.mxu0 %v1598_v2  ;;  %1406 = vmatprep.subr.bf16.mxu1 %v1539_v0 }
  0x33   : > { %1387 = vmatpush3.bf16.msra.mxu0 %v1496_v18  ;;  %1402 = vmatprep.mubr.msk.bf16.mxu0 %vm1540_vm0, %v1539_v0 }
  0x34   : > { %1388 = vmatprep.subr.bf16.mxu0 %v1539_v0 }
  0x37   : > { %1389 = vmatpush3.bf16.msra.mxu0 %v1498_v19  ;;  %v1527_v19 = vld [vmem:[%s1827_s3 + $0x48] sm:$0xff]  }
  0x38   : > { %1390 = vmatprep.subr.bf16.mxu0 %v1539_v0 }
  0x3b   : > { %1391 = vmatpush3.bf16.msra.mxu0 %v1500_v20 }
  0x3c   : > { %1392 = vmatprep.subr.bf16.mxu0 %v1539_v0 }
  0x3f   : > { %1393 = vmatpush3.bf16.msra.mxu0 %v1502_v21 }
  0x40   : > { %1394 = vmatprep.subr.bf16.mxu0 %v1539_v0 }
  0x43   : > { %1395 = vmatpush3.bf16.msra.mxu0 %v1504_v22  ;;  %v1529_v22 = vld [vmem:[%s1827_s3 + $0x40] sm:$0xff]  }
  0x44   : > { %1396 = vmatprep.subr.bf16.mxu0 %v1539_v0 }
  0x47   : > { %1397 = vmatpush3.bf16.msra.mxu0 %v1506_v23 }
  0x48   : > { %1398 = vmatprep.subr.bf16.mxu0 %v1539_v0 }
  0x4b   : > { %1399 = vmatpush3.bf16.msra.mxu0 %v1508_v25 }
  0x4c   : > { %1400 = vmatprep.subr.bf16.mxu0 %v1539_v0 }
  0x4f   : > { %1401 = vmatpush3.bf16.msra.mxu0 %v1510_v27 }
  0x50   : > { %1454 = vmatprep.subr.bf16.mxu0 %v1539_v0 }
  0xd2   : > { %v282_v28 = vpop.f32.mrf.mxu0  ;;  %v332_v29 = vpop.f32.mrf.mxu1 }
  0xd4   : > { %v1338_v30 = vpop.f32.mrf.mxu0  ;;  %v1344_v31 = vpop.f32.mrf.mxu1 }
  0xd6   : > { %v285_v32 = vpop.f32.mrf.mxu0  ;;  %v335_v33 = vpop.f32.mrf.mxu1 }
  0xd7   : > { %v289_v34 = vpack.c.bf16 %v285_v32, %v282_v28  ;;  %v339_v35 = vpack.c.bf16 %v335_v33, %v332_v29 }
  0xd8   : > { %v1339_v36 = vpop.f32.mrf.mxu0  ;;  %v1345_v37 = vpop.f32.mrf.mxu1 }
  0xd9   : > { %1383 = vmatmul.mubr.bf16.vlgmr.msra.gmra.mxu1 %v289_v34  ;;  %1403 = vmatmul.mubr.bf16.vlgmr.msra.gmra.mxu0 %v339_v35 }
  0xda   : > { %1408 = vmatprep.mubr.msk.bf16.mxu1 %vm1540_vm0, %v1539_v0  ;;  %1470 = vmatprep.mubr.msk.bf16.mxu0 %vm1540_vm0, %v1539_v0 }
  0xdb   : > { %1455 = vmatpush3.bf16.msra.mxu0 %v1516_v42 }
  0xdc   : > { %1456 = vmatprep.subr.bf16.mxu0 %v1539_v0 }
  0xdf   : > { %1457 = vmatpush3.bf16.msra.mxu0 %v1518_v43 }
  0xe0   : > { %1458 = vmatprep.subr.bf16.mxu0 %v1539_v0 }
  0xe3   : > { %1459 = vmatpush3.bf16.msra.mxu0 %v1520_v4 }
  0xe4   : > { %1460 = vmatprep.subr.bf16.mxu0 %v1539_v0 }
  0xe7   : > { %1461 = vmatpush3.bf16.msra.mxu0 %v1522_v5 }
  0xe8   : > { %1462 = vmatprep.subr.bf16.mxu0 %v1539_v0 }
  0xeb   : > { %1463 = vmatpush3.bf16.msra.mxu0 %v1524_v7 }
  0xec   : > { %1464 = vmatprep.subr.bf16.mxu0 %v1539_v0 }
  0xef   : > { %1465 = vmatpush3.bf16.msra.mxu0 %v1526_v8 }
  0xf0   : > { %1466 = vmatprep.subr.bf16.mxu0 %v1539_v0 }
  0xf2   : > { %v455_v38 = vpop.f32.mrf.mxu0 }
  0xf3   : > { %1467 = vmatpush3.bf16.msra.mxu0 %v1528_v9 }
  0xf4   : > { %v1364_v39 = vpop.f32.mrf.mxu0  ;;  %1468 = vmatprep.subr.bf16.mxu0 %v1539_v0 }
  0xf6   : > { %v458_v40 = vpop.f32.mrf.mxu0 }
  0xf7   : > { %1469 = vmatpush3.bf16.msra.mxu0 %v1530_v10 }
  0xf8   : > { %v1365_v41 = vpop.f32.mrf.mxu0 }
  0xfa   : > { %1471 = vmatmul.mubr.bf16.vlgmr.msra.gmra.mxu0 %v1598_v2 }
 0x199   : > { %v544_v44 = vpop.f32.mrf.mxu1  ;;  %v650_v45 = vpop.f32.mrf.mxu0 }
 0x19a   : > { %v545_v46 = vadd.f32 %v544_v44, %v455_v38 }
 0x19b   : > { %v1384_v47 = vpop.f32.mrf.mxu1  ;;  %v1404_v48 = vpop.f32.mrf.mxu0 }
 0x19c   : > { %v657_v51 = vadd.f32 %v650_v45, %v545_v46 }
 0x19d   : > { %v547_v49 = vpop.f32.mrf.mxu1  ;;  %v653_v50 = vpop.f32.mrf.mxu0 }
 0x19e   : > { %v548_v52 = vadd.f32 %v547_v49, %v458_v40  ;;  %v659_v56 = vmax.f32 %v657_v51, 0.0 }
 0x19f   : > { %v1385_v53 = vpop.f32.mrf.mxu1  ;;  %v1405_v54 = vpop.f32.mrf.mxu0 }
 0x1a0   : > { %v658_v55 = vadd.f32 %v653_v50, %v548_v52 }
 0x1a2   : > { %v660_v57 = vmax.f32 %v658_v55, 0.0 }
 0x1a4   : > { %v661_v58 = vpack.c.bf16 %v660_v57, %v659_v56 }
 0x1a6   : > { %1407 = vmatpush3.bf16.msra.mxu1 %v661_v58 }
 0x1a7   : > { %1412 = vmatprep.subr.bf16.mxu1 %v1539_v0 }
 0x1a9   : > { %1409 = vmatmul.mubr.msk.bf16.vlgmr.msra.gmra.mxu1 %vm244_vm1, %v1596_v1  ;;  %v1517_v1 = vld [vmem:[%s1827_s3 + $0x10] sm:$0xff]  }
 0x1aa   : > { %1413 = vmatpush3.bf16.msra.mxu1 %v661_v58  ;;  %1414 = vmatprep.mubr.msk.bf16.mxu1 %vm1540_vm0, %v1539_v0 }
 0x1ab   : > { %1418 = vmatprep.subr.bf16.mxu1 %v1539_v0 }
 0x1b1   : > { %1415 = vmatmul.mubr.msk.bf16.vlgmr.msra.gmra.mxu1 %vm244_vm1, %v1603_v3  ;;  %v1519_v3 = vld [vmem:[%s1827_s3 + $0x8] sm:$0xff]  }
 0x1b2   : > { %1419 = vmatpush3.bf16.msra.mxu1 %v1511_v59  ;;  %1426 = vmatprep.mubr.msk.bf16.mxu1 %vm1540_vm0, %v1539_v0 }
 0x1b3   : > { %1420 = vmatprep.subr.bf16.mxu1 %v1539_v0 }
 0x1b6   : > { %1421 = vmatpush3.bf16.msra.mxu1 %v1512_v60 }
 0x1b7   : > { %1422 = vmatprep.subr.bf16.mxu1 %v1539_v0 }
 0x1ba   : > { %1423 = vmatpush3.bf16.msra.mxu1 %v1513_v61  ;;  %v1077_v28 = vpop.f32.mrf.mxu0 }
 0x1bb   : > { %1424 = vmatprep.subr.bf16.mxu1 %v1539_v0 }
 0x1bc   : > { %v1472_v29 = vpop.f32.mrf.mxu0 }
 0x1be   : > { %1425 = vmatpush3.bf16.msra.mxu1 %v1514_v62  ;;  %v1080_v30 = vpop.f32.mrf.mxu0 }
 0x1bf   : > { %1430 = vmatprep.subr.bf16.mxu1 %v1539_v0 }
 0x1c0   : > { %v1473_v31 = vpop.f32.mrf.mxu0 }
 0x1c1   : > { %1427 = vmatmul.mubr.msk.bf16.vlgmr.msra.gmra.mxu1 %vm787_vm2, %v661_v58 }
 0x1c2   : > { %1431 = vmatpush3.bf16.msra.mxu1 %v1515_v63  ;;  %1438 = vmatprep.mubr.msk.bf16.mxu1 %vm1540_vm0, %v1539_v0 }
 0x1c3   : > { %1432 = vmatprep.subr.bf16.mxu1 %v1539_v0 }
 0x1c6   : > { %1433 = vmatpush3.bf16.msra.mxu1 %v1517_v1 }
 0x1c7   : > { %1434 = vmatprep.subr.bf16.mxu1 %v1539_v0 }
 0x1ca   : > { %1435 = vmatpush3.bf16.msra.mxu1 %v1519_v3 }
 0x1cb   : > { %1436 = vmatprep.subr.bf16.mxu1 %v1539_v0 }
 0x1ce   : > { %1437 = vmatpush3.bf16.msra.mxu1 %v1521_v6 }
 0x1cf   : > { %1442 = vmatprep.subr.bf16.mxu1 %v1539_v0 }
 0x269   : > { %v696_v11 = vpop.f32.mrf.mxu1 }
 0x26b   : > { %v1410_v12 = vpop.f32.mrf.mxu1 }
 0x26d   : > { %v699_v13 = vpop.f32.mrf.mxu1 }
 0x26e   : > { %v703_v15 = vpack.c.bf16 %v699_v13, %v696_v11 }
 0x26f   : > { %v1411_v16 = vpop.f32.mrf.mxu1 }
 0x270   : > { %1439 = vmatmul.mubr.msk.bf16.vlgmr.msra.gmra.mxu1 %vm787_vm2, %v703_v15 }
 0x271   : > { %1443 = vmatpush3.bf16.msra.mxu1 %v1523_v14  ;;  %v738_v18 = vpop.f32.mrf.mxu1  ;;  %1450 = vmatprep.mubr.msk.bf16.mxu1 %vm1540_vm0, %v1539_v0 }
 0x272   : > { %1444 = vmatprep.subr.bf16.mxu1 %v1539_v0 }
 0x273   : > { %v1416_v2 = vpop.f32.mrf.mxu1 }
 0x275   : > { %1445 = vmatpush3.bf16.msra.mxu1 %v1525_v17  ;;  %v741_v20 = vpop.f32.mrf.mxu1 }
 0x276   : > { %1446 = vmatprep.subr.bf16.mxu1 %v1539_v0  ;;  %v745_v23 = vpack.c.bf16 %v741_v20, %v738_v18 }
 0x277   : > { %v1417_v21 = vpop.f32.mrf.mxu1 }
 0x279   : > { %1447 = vmatpush3.bf16.msra.mxu1 %v1527_v19 }
 0x27a   : > { %1448 = vmatprep.subr.bf16.mxu1 %v1539_v0 }
 0x27d   : > { %1449 = vmatpush3.bf16.msra.mxu1 %v1529_v22 }
 0x280   : > { %1451 = vmatmul.mubr.msk.bf16.vlgmr.msra.gmra.mxu1 %vm787_vm2, %v745_v23 }
 0x281   : > { %v825_v24 = vpop.f32.mrf.mxu1 }
 0x283   : > { %v1428_v25 = vpop.f32.mrf.mxu1 }
 0x285   : > { %v828_v26 = vpop.f32.mrf.mxu1 }
 0x287   : > { %v1429_v27 = vpop.f32.mrf.mxu1 }
 0x330   : > { %v893_v32 = vpop.f32.mrf.mxu1 }
 0x331   : > { %v894_v36 = vadd.f32 %v893_v32, %v825_v24 }
 0x332   : > { %v1440_v33 = vpop.f32.mrf.mxu1 }
 0x334   : > { %v896_v34 = vpop.f32.mrf.mxu1 }
 0x335   : > { %v897_v39 = vadd.f32 %v896_v34, %v828_v26 }
 0x336   : > { %v1441_v35 = vpop.f32.mrf.mxu1 }
 0x340   : > { %v970_v37 = vpop.f32.mrf.mxu1 }
 0x341   : > { %v977_v0 = vadd.f32 %v970_v37, %v894_v36 }
 0x342   : > { %v1452_v38 = vpop.f32.mrf.mxu1 }
 0x343   : > { %v1084_v40 = vadd.f32 %v1077_v28, %v977_v0 }
 0x344   : > { %v973_v41 = vpop.f32.mrf.mxu1 }
 0x345   : > { %v1086_v42 = vmax.f32 %v1084_v40, 0.0  ;;  %v978_v43 = vadd.f32 %v973_v41, %v897_v39 }
 0x346   : > { %v1453_v44 = vpop.f32.mrf.mxu1 }
 0x347   : > { %v1273_v45 = vpack.c.bf16 %v1086_v42, %v1086_v42  ;;  %v1085_v46 = vadd.f32 %v1080_v30, %v978_v43 }
 0x349   : > { %1097 = vst.msk [vmem:[%s224_s30] sm:$0xf] %vm1096_vm3, %v1273_v45  ;;  %v1087_v47 = vmax.f32 %v1085_v46, 0.0 }
 0x34b   : > { %v1274_v48 = vpack.c.bf16 %v1087_v47, %v1087_v47 }
 0x34d   : > { %1098 = vst.msk [vmem:[%s224_s30 + $0x4] sm:$0xf] %vm1096_vm3, %v1274_v48 }
 0x34e PF: > { %s15_s18 = sadd.s32 1, %s1537_s18  }
 0x34f   : > { %p12_p4 = scmp.ge.s32.totalorder %s15_s18, 4  }
 0x351   :  { %14 = sbr.rel (!%p12_p4) target bundleno = 1 (0x1), region = 75 }

// kernel: apply_hourglass.9
= control target key start
LH: loop header
LB: loop body
LE: loop exit
PB: predicated region body
PF: predicated region fallthrough
CT: control target
= control target key end

     0   :  { %s1731_s15 = smov 0   ;;  %s1953_s0 = inlined_call_operand.vmem [shape: bf16[2,32,128], index: 0, kind: input, shape index: {}]   ;;  %s1954_s1 = inlined_call_operand.vmem [shape: bf16[2,32,32], index: 1, kind: input, shape index: {}]   ;;  %s1955_s2 = inlined_call_operand.vmem [shape: bf16[3,128,128], index: 2, kind: input, shape index: {}]   ;;  %s1956_s3 = inlined_call_operand.vmem [shape: bf16[3,128,128], index: 3, kind: input, shape index: {}]   ;;  %s1957_s4 = inlined_call_operand.vmem [shape: bf16[2,32,128], index: 4, kind: output, shape index: {}]  }
   0x1 LB: > { %s1244_s16 = sadd.s32 4294967295, %s1704_s15   ;;  %p1248_p0 = scmp.ge.s32.totalorder %s1704_s15, 1  ;;  %s1704_s15 = sphi %s1731_s15, %s14_s15  }
   0x2   : > { %p162_p1 = scmp.lt.s32.totalorder %s1704_s15, 3 }
   0x4   : > { %p163_p2 = pnand %p1248_p0, %p162_p1 }
   0x5   : > { %p188_p3 = scmp.lt.s32.totalorder (!%p163_p2), %s1244_s16, 1 }
   0x6   : > { %166 = sbr.rel (%p163_p2) target bundleno = 862 (0x35e), region = 36 }
   0xb   : > { %v1742_v0 = vld [vmem:[%s1954_s1] sm:$0xff]   ;;  %vm234_vm0 = vcmask 261120   ;;  %s1959_s16 = smov (!%p188_p3, %s1244_s16), 1  ;;  %v1764_v3 = vld [vmem:[%s1954_s1 + $0x8] sm:$0xff]   ;;  %v1769_v4 = vld [vmem:[%s1954_s1 + $0x10] sm:$0xff]  }
   0xc   : > { %1486 = vmatprep.mubr.msk.bf16.mxu0 %vm234_vm0, %v1742_v0  ;;  %s1389_s19 = sshll.u32 %s1959_s16, 4  ;;  %v1656_v5 = vld [vmem:[%s1955_s2 + $0x38] sm:$0xff]   ;;  %v1657_v6 = vld [vmem:[%s1955_s2 + $0x30] sm:$0xff]   ;;  %v1658_v7 = vld [vmem:[%s1955_s2 + $0x28] sm:$0xff]  }
   0xd   : > { %s192_s22 = scalar_lea.vmem %s1953_s0, %s1389_s19  ;;  %1518 = vmatprep.subr.bf16.mxu1 %v1656_v5  ;;  %v1648_v8 = vld [vmem:[%s1955_s2 + $0x78] sm:$0xff]   ;;  %v1660_v10 = vld [vmem:[%s1955_s2 + $0x20] sm:$0xff]   ;;  %v1649_v11 = vld [vmem:[%s1955_s2 + $0x70] sm:$0xff]   ;;  %s197_s9 = scalar_lea.vmem %s1957_s4, %s1389_s19 }
   0xe   : > { %v1754_v1 = vld [vmem:[%s192_s22 + $0x8] sm:$0xff]   ;;  %v1756_v2 = vld [vmem:[%s192_s22] sm:$0xff]   ;;  %1519 = vmatpush3.bf16.msra.mxu1 %v1656_v5  ;;  %v1794_v9 = vld [vmem:[%s1954_s1 + $0x18] sm:$0xff]  }
   0xf   : > { %1482 = vmatprep.subr.bf16.mxu0 %v1754_v1  ;;  %1520 = vmatprep.subr.bf16.mxu1 %v1657_v6  ;;  %v1662_v12 = vld [vmem:[%s1955_s2 + $0x18] sm:$0xff]   ;;  %v1650_v13 = vld [vmem:[%s1955_s2 + $0x68] sm:$0xff]   ;;  %v1664_v14 = vld [vmem:[%s1955_s2 + $0x10] sm:$0xff]  }
  0x10   : > { %1483 = vmatpush3.bf16.msra.mxu0 %v1754_v1  ;;  %v1651_v15 = vld [vmem:[%s1955_s2 + $0x60] sm:$0xff]   ;;  %v1652_v16 = vld [vmem:[%s1955_s2 + $0x58] sm:$0xff]   ;;  %v1653_v17 = vld [vmem:[%s1955_s2 + $0x50] sm:$0xff]  }
  0x11   : > { %1484 = vmatprep.subr.bf16.mxu0 %v1756_v2  ;;  %v1654_v18 = vld [vmem:[%s1955_s2 + $0x48] sm:$0xff]   ;;  %v1655_v19 = vld [vmem:[%s1955_s2 + $0x40] sm:$0xff]   ;;  %v1659_v20 = vld [vmem:[%s1955_s2 + $0xb8] sm:$0xff]  }
  0x12   : > { %1521 = vmatpush3.bf16.msra.mxu1 %v1657_v6  ;;  %v1661_v21 = vld [vmem:[%s1955_s2 + $0xb0] sm:$0xff]   ;;  %v1663_v22 = vld [vmem:[%s1955_s2 + $0xa8] sm:$0xff]   ;;  %v1665_v23 = vld [vmem:[%s1955_s2 + $0xa0] sm:$0xff]  }
  0x13   : > { %1522 = vmatprep.subr.bf16.mxu1 %v1658_v7  ;;  %v1666_v24 = vld [vmem:[%s1955_s2 + $0x8] sm:$0xff]   ;;  %v1667_v25 = vld [vmem:[%s1955_s2 + $0x98] sm:$0xff]   ;;  %v1668_v26 = vld [vmem:[%s1955_s2] sm:$0xff]  }
  0x14   : > { %1485 = vmatpush3.bf16.msra.mxu0 %v1756_v2  ;;  %v1669_v27 = vld [vmem:[%s1955_s2 + $0x90] sm:$0xff]   ;;  %v1670_v28 = vld [vmem:[%s1955_s2 + $0x88] sm:$0xff]   ;;  %v1671_v29 = vld [vmem:[%s1955_s2 + $0x80] sm:$0xff]  }
  0x15   : > { %1490 = vmatprep.subr.bf16.mxu0 %v1754_v1  ;;  %v1680_v42 = vld [vmem:[%s1956_s3 + $0x38] sm:$0xff]   ;;  %v1681_v43 = vld [vmem:[%s1956_s3 + $0x30] sm:$0xff]   ;;  %v1682_v44 = vld [vmem:[%s1956_s3 + $0x28] sm:$0xff]  }
  0x16   : > { %1523 = vmatpush3.bf16.msra.mxu1 %v1658_v7  ;;  %v1684_v45 = vld [vmem:[%s1956_s3 + $0x20] sm:$0xff]   ;;  %v1686_v46 = vld [vmem:[%s1956_s3 + $0x18] sm:$0xff]   ;;  %v1688_v47 = vld [vmem:[%s1956_s3 + $0x10] sm:$0xff]  }
  0x17   : > { %1487 = vmatmul.mubr.msk.bf16.vlgmr.msra.gmra.mxu0 %vm234_vm0, %v1764_v3  ;;  %1524 = vmatprep.subr.bf16.mxu1 %v1660_v10 }
  0x18   : > { %1491 = vmatpush3.bf16.msra.mxu0 %v1754_v1  ;;  %1494 = vmatprep.mubr.msk.bf16.mxu0 %vm234_vm0, %v1769_v4 }
  0x19   : > { %1492 = vmatprep.subr.bf16.mxu0 %v1756_v2 }
  0x1a   : > { %1525 = vmatpush3.bf16.msra.mxu1 %v1660_v10 }
  0x1b   : > { %1526 = vmatprep.subr.bf16.mxu1 %v1662_v12 }
  0x1c   : > { %1493 = vmatpush3.bf16.msra.mxu0 %v1756_v2 }
  0x1d   : > { %1498 = vmatprep.subr.bf16.mxu0 %v1648_v8 }
  0x1e   : > { %1527 = vmatpush3.bf16.msra.mxu1 %v1662_v12 }
  0x1f   : > { %1495 = vmatmul.mubr.msk.bf16.vlgmr.msra.gmra.mxu0 %vm234_vm0, %v1794_v9  ;;  %1528 = vmatprep.subr.bf16.mxu1 %v1664_v14 }
  0x20   : > { %1499 = vmatpush3.bf16.msra.mxu0 %v1648_v8  ;;  %1514 = vmatprep.mubr.bf16.mxu0 %v1756_v2 }
  0x21   : > { %1500 = vmatprep.subr.bf16.mxu0 %v1649_v11 }
  0x22   : > { %1529 = vmatpush3.bf16.msra.mxu1 %v1664_v14 }
  0x23   : > { %1530 = vmatprep.subr.bf16.mxu1 %v1666_v24 }
  0x24   : > { %1501 = vmatpush3.bf16.msra.mxu0 %v1649_v11 }
  0x25   : > { %1502 = vmatprep.subr.bf16.mxu0 %v1650_v13 }
  0x26   : > { %1531 = vmatpush3.bf16.msra.mxu1 %v1666_v24  ;;  %v1690_v24 = vld [vmem:[%s1956_s3 + $0x8] sm:$0xff]  }
  0x27   : > { %1532 = vmatprep.subr.bf16.mxu1 %v1668_v26 }
  0x28   : > { %1503 = vmatpush3.bf16.msra.mxu0 %v1650_v13 }
  0x29   : > { %1504 = vmatprep.subr.bf16.mxu0 %v1651_v15 }
  0x2a   : > { %1533 = vmatpush3.bf16.msra.mxu1 %v1668_v26  ;;  %v1692_v26 = vld [vmem:[%s1956_s3] sm:$0xff]  }
  0x2c   : > { %1505 = vmatpush3.bf16.msra.mxu0 %v1651_v15  ;;  %v1672_v15 = vld [vmem:[%s1956_s3 + $0x78] sm:$0xff]  }
  0x2d   : > { %1506 = vmatprep.subr.bf16.mxu0 %v1652_v16 }
  0x30   : > { %1507 = vmatpush3.bf16.msra.mxu0 %v1652_v16  ;;  %v1673_v16 = vld [vmem:[%s1956_s3 + $0x70] sm:$0xff]  }
  0x31   : > { %1508 = vmatprep.subr.bf16.mxu0 %v1653_v17 }
  0x34   : > { %1509 = vmatpush3.bf16.msra.mxu0 %v1653_v17  ;;  %v1676_v17 = vld [vmem:[%s1956_s3 + $0x58] sm:$0xff]  }
  0x35   : > { %1510 = vmatprep.subr.bf16.mxu0 %v1654_v18 }
  0x38   : > { %1511 = vmatpush3.bf16.msra.mxu0 %v1654_v18  ;;  %v1678_v18 = vld [vmem:[%s1956_s3 + $0x48] sm:$0xff]  }
  0x39   : > { %1512 = vmatprep.subr.bf16.mxu0 %v1655_v19 }
  0x3c   : > { %1513 = vmatpush3.bf16.msra.mxu0 %v1655_v19  ;;  %v1679_v19 = vld [vmem:[%s1956_s3 + $0x40] sm:$0xff]  }
  0x3d   : > { %1538 = vmatprep.subr.bf16.mxu0 %v1659_v20 }
  0x3f   : > { %1515 = vmatmul.mubr.bf16.vlgmr.msra.gmra.mxu0 %v1754_v1 }
  0x40   : > { %1539 = vmatpush3.bf16.msra.mxu0 %v1659_v20  ;;  %v1683_v20 = vld [vmem:[%s1956_s3 + $0xb8] sm:$0xff]  }
  0x41   : > { %1540 = vmatprep.subr.bf16.mxu0 %v1661_v21 }
  0x44   : > { %1541 = vmatpush3.bf16.msra.mxu0 %v1661_v21  ;;  %v1685_v21 = vld [vmem:[%s1956_s3 + $0xb0] sm:$0xff]  }
  0x45   : > { %1542 = vmatprep.subr.bf16.mxu0 %v1663_v22 }
  0x48   : > { %1543 = vmatpush3.bf16.msra.mxu0 %v1663_v22  ;;  %v1687_v22 = vld [vmem:[%s1956_s3 + $0xa8] sm:$0xff]  }
  0x49   : > { %1544 = vmatprep.subr.bf16.mxu0 %v1665_v23 }
  0x4c   : > { %1545 = vmatpush3.bf16.msra.mxu0 %v1665_v23  ;;  %v1689_v23 = vld [vmem:[%s1956_s3 + $0xa0] sm:$0xff]  }
  0x4d   : > { %1546 = vmatprep.subr.bf16.mxu0 %v1667_v25 }
  0x50   : > { %1547 = vmatpush3.bf16.msra.mxu0 %v1667_v25  ;;  %v1691_v25 = vld [vmem:[%s1956_s3 + $0x98] sm:$0xff]  }
  0x51   : > { %1548 = vmatprep.subr.bf16.mxu0 %v1669_v27 }
  0x54   : > { %1549 = vmatpush3.bf16.msra.mxu0 %v1669_v27  ;;  %v1693_v27 = vld [vmem:[%s1956_s3 + $0x90] sm:$0xff]  }
  0x55   : > { %1550 = vmatprep.subr.bf16.mxu0 %v1670_v28 }
  0x58   : > { %1551 = vmatpush3.bf16.msra.mxu0 %v1670_v28  ;;  %v1694_v28 = vld [vmem:[%s1956_s3 + $0x88] sm:$0xff]  }
  0x59   : > { %1552 = vmatprep.subr.bf16.mxu0 %v1671_v29 }
  0x5c   : > { %1553 = vmatpush3.bf16.msra.mxu0 %v1671_v29  ;;  %v1695_v29 = vld [vmem:[%s1956_s3 + $0x80] sm:$0xff]  }
  0x5d   : > { %1594 = vmatprep.subr.bf16.mxu0 %v1680_v42 }
  0xd7   : > { %v1488_v30 = vpop.f32.mrf.mxu0 }
  0xd9   : > { %v275_v31 = vpop.f32.mrf.mxu0 }
  0xdb   : > { %v1489_v32 = vpop.f32.mrf.mxu0 }
  0xdc   : > { %v291_v35 = vpack.c.bf16 %v1489_v32, %v1488_v30 }
  0xdd   : > { %v278_v33 = vpop.f32.mrf.mxu0 }
  0xde   : > { %v290_v34 = vpack.c.bf16 %v278_v33, %v275_v31 }
  0xdf   : > { %v1496_v36 = vpop.f32.mrf.mxu0 }
  0xe0   : > { %1534 = vmatprep.mubr.bf16.mxu1 %v290_v34 }
  0xe1   : > { %v342_v37 = vpop.f32.mrf.mxu0  ;;  %1535 = vmatmul.mubr.bf16.vlgmr.msra.gmra.mxu1 %v291_v35 }
  0xe2   : > { %1562 = vmatprep.mubr.msk.bf16.mxu1 %vm234_vm0, %v1742_v0 }
  0xe3   : > { %v1497_v38 = vpop.f32.mrf.mxu0 }
  0xe4   : > { %v358_v41 = vpack.c.bf16 %v1497_v38, %v1496_v36 }
  0xe5   : > { %v345_v39 = vpop.f32.mrf.mxu0 }
  0xe6   : > { %v357_v40 = vpack.c.bf16 %v345_v39, %v342_v37 }
  0xe8   : > { %1554 = vmatprep.mubr.bf16.mxu0 %v357_v40 }
  0xe9   : > { %1555 = vmatmul.mubr.bf16.vlgmr.msra.gmra.mxu0 %v358_v41 }
  0xea   : > { %1595 = vmatpush3.bf16.msra.mxu0 %v1680_v42 }
  0xeb   : > { %1596 = vmatprep.subr.bf16.mxu0 %v1681_v43 }
  0xee   : > { %1597 = vmatpush3.bf16.msra.mxu0 %v1681_v43 }
  0xef   : > { %1598 = vmatprep.subr.bf16.mxu0 %v1682_v44 }
  0xf2   : > { %1599 = vmatpush3.bf16.msra.mxu0 %v1682_v44 }
  0xf3   : > { %1600 = vmatprep.subr.bf16.mxu0 %v1684_v45 }
  0xf6   : > { %1601 = vmatpush3.bf16.msra.mxu0 %v1684_v45 }
  0xf7   : > { %1602 = vmatprep.subr.bf16.mxu0 %v1686_v46 }
  0xfa   : > { %1603 = vmatpush3.bf16.msra.mxu0 %v1686_v46 }
  0xfb   : > { %1604 = vmatprep.subr.bf16.mxu0 %v1688_v47 }
  0xfe   : > { %1605 = vmatpush3.bf16.msra.mxu0 %v1688_v47 }
  0xff   : > { %v1516_v48 = vpop.f32.mrf.mxu0  ;;  %1606 = vmatprep.subr.bf16.mxu0 %v1690_v24 }
 0x101   : > { %v474_v49 = vpop.f32.mrf.mxu0 }
 0x102   : > { %1607 = vmatpush3.bf16.msra.mxu0 %v1690_v24 }
 0x103   : > { %v1517_v51 = vpop.f32.mrf.mxu0  ;;  %1608 = vmatprep.subr.bf16.mxu0 %v1692_v26 }
 0x105   : > { %v477_v53 = vpop.f32.mrf.mxu0 }
 0x106   : > { %1609 = vmatpush3.bf16.msra.mxu0 %v1692_v26 }
 0x1a1   : > { %v1536_v50 = vpop.f32.mrf.mxu1 }
 0x1a2   : > { %v580_v56 = vadd.f32 %v1536_v50, %v1516_v48 }
 0x1a3   : > { %v571_v52 = vpop.f32.mrf.mxu1 }
 0x1a4   : > { %v572_v59 = vadd.f32 %v571_v52, %v474_v49 }
 0x1a5   : > { %v1537_v54 = vpop.f32.mrf.mxu1 }
 0x1a6   : > { %v583_v60 = vadd.f32 %v1537_v54, %v1517_v51 }
 0x1a7   : > { %v574_v57 = vpop.f32.mrf.mxu1 }
 0x1a8   : > { %v575_v63 = vadd.f32 %v574_v57, %v477_v53  ;;  %v1159_v53 = vunpack.c.l.bf16 %v1754_v1 }
 0x1a9   : > { %v1556_v55 = vpop.f32.mrf.mxu0 }
 0x1aa   : > { %v702_v61 = vadd.f32 %v1556_v55, %v580_v56 }
 0x1ab   : > { %v685_v58 = vpop.f32.mrf.mxu0 }
 0x1ac   : > { %v700_v0 = vadd.f32 %v685_v58, %v572_v59  ;;  %v706_v7 = vmax.f32 %v702_v61, 0.0  ;;  %v1157_v58 = vunpack.c.l.bf16 %v1756_v2  ;;  %v1160_v59 = vunpack.c.h.bf16 %v1754_v1 }
 0x1ad   : > { %v1557_v62 = vpop.f32.mrf.mxu0 }
 0x1ae   : > { %v703_v5 = vadd.f32 %v1557_v62, %v583_v60  ;;  %v704_v11 = vmax.f32 %v700_v0, 0.0  ;;  %v1158_v0 = vunpack.c.h.bf16 %v1756_v2 }
 0x1af   : > { %v688_v6 = vpop.f32.mrf.mxu0 }
 0x1b0   : > { %v707_v8 = vmax.f32 %v703_v5, 0.0  ;;  %v701_v10 = vadd.f32 %v688_v6, %v575_v63 }
 0x1b2   : > { %v709_v12 = vpack.c.bf16 %v707_v8, %v706_v7  ;;  %v705_v13 = vmax.f32 %v701_v10, 0.0 }
 0x1b4   : > { %v708_v14 = vpack.c.bf16 %v705_v13, %v704_v11  ;;  %1558 = vmatprep.subr.bf16.mxu1 %v709_v12 }
 0x1b5   : > { %1559 = vmatpush3.bf16.msra.mxu1 %v709_v12 }
 0x1b6   : > { %1560 = vmatprep.subr.bf16.mxu1 %v708_v14 }
 0x1b9   : > { %1561 = vmatpush3.bf16.msra.mxu1 %v708_v14 }
 0x1ba   : > { %1566 = vmatprep.subr.bf16.mxu1 %v709_v12 }
 0x1bc   : > { %1563 = vmatmul.mubr.msk.bf16.vlgmr.msra.gmra.mxu1 %vm234_vm0, %v1764_v3  ;;  %v1674_v3 = vld [vmem:[%s1956_s3 + $0x68] sm:$0xff]  }
 0x1bd   : > { %1567 = vmatpush3.bf16.msra.mxu1 %v709_v12  ;;  %1570 = vmatprep.mubr.msk.bf16.mxu1 %vm234_vm0, %v1769_v4  ;;  %v1675_v4 = vld [vmem:[%s1956_s3 + $0x60] sm:$0xff]  }
 0x1be   : > { %1568 = vmatprep.subr.bf16.mxu1 %v708_v14 }
 0x1c1   : > { %1569 = vmatpush3.bf16.msra.mxu1 %v708_v14 }
 0x1c2   : > { %1574 = vmatprep.subr.bf16.mxu1 %v1672_v15 }
 0x1c4   : > { %1571 = vmatmul.mubr.msk.bf16.vlgmr.msra.gmra.mxu1 %vm234_vm0, %v1794_v9  ;;  %v1677_v9 = vld [vmem:[%s1956_s3 + $0x50] sm:$0xff]  }
 0x1c5   : > { %1575 = vmatpush3.bf16.msra.mxu1 %v1672_v15  ;;  %1590 = vmatprep.mubr.bf16.mxu1 %v708_v14 }
 0x1c6   : > { %1576 = vmatprep.subr.bf16.mxu1 %v1673_v16 }
 0x1c9   : > { %1577 = vmatpush3.bf16.msra.mxu1 %v1673_v16 }
 0x1ca   : > { %1578 = vmatprep.subr.bf16.mxu1 %v1674_v3 }
 0x1cd   : > { %1579 = vmatpush3.bf16.msra.mxu1 %v1674_v3 }
 0x1ce   : > { %1580 = vmatprep.subr.bf16.mxu1 %v1675_v4 }
 0x1d1   : > { %1581 = vmatpush3.bf16.msra.mxu1 %v1675_v4 }
 0x1d2   : > { %1582 = vmatprep.subr.bf16.mxu1 %v1676_v17 }
 0x1d5   : > { %1583 = vmatpush3.bf16.msra.mxu1 %v1676_v17 }
 0x1d6   : > { %1584 = vmatprep.subr.bf16.mxu1 %v1677_v9 }
 0x1d9   : > { %1585 = vmatpush3.bf16.msra.mxu1 %v1677_v9 }
 0x1da   : > { %1586 = vmatprep.subr.bf16.mxu1 %v1678_v18 }
 0x1dd   : > { %1587 = vmatpush3.bf16.msra.mxu1 %v1678_v18 }
 0x1de   : > { %1588 = vmatprep.subr.bf16.mxu1 %v1679_v19 }
 0x1e1   : > { %1589 = vmatpush3.bf16.msra.mxu1 %v1679_v19 }
 0x1e2   : > { %1614 = vmatprep.subr.bf16.mxu1 %v1683_v20 }
 0x1e4   : > { %1591 = vmatmul.mubr.bf16.vlgmr.msra.gmra.mxu1 %v709_v12 }
 0x1e5   : > { %1615 = vmatpush3.bf16.msra.mxu1 %v1683_v20 }
 0x1e6   : > { %1616 = vmatprep.subr.bf16.mxu1 %v1685_v21 }
 0x1e9   : > { %1617 = vmatpush3.bf16.msra.mxu1 %v1685_v21 }
 0x1ea   : > { %1618 = vmatprep.subr.bf16.mxu1 %v1687_v22 }
 0x1ed   : > { %1619 = vmatpush3.bf16.msra.mxu1 %v1687_v22 }
 0x1ee   : > { %1620 = vmatprep.subr.bf16.mxu1 %v1689_v23 }
 0x1f1   : > { %1621 = vmatpush3.bf16.msra.mxu1 %v1689_v23 }
 0x1f2   : > { %1622 = vmatprep.subr.bf16.mxu1 %v1691_v25 }
 0x1f5   : > { %1623 = vmatpush3.bf16.msra.mxu1 %v1691_v25 }
 0x1f6   : > { %1624 = vmatprep.subr.bf16.mxu1 %v1693_v27 }
 0x1f9   : > { %1625 = vmatpush3.bf16.msra.mxu1 %v1693_v27 }
 0x1fa   : > { %1626 = vmatprep.subr.bf16.mxu1 %v1694_v28 }
 0x1fd   : > { %1627 = vmatpush3.bf16.msra.mxu1 %v1694_v28 }
 0x1fe   : > { %1628 = vmatprep.subr.bf16.mxu1 %v1695_v29 }
 0x201   : > { %1629 = vmatpush3.bf16.msra.mxu1 %v1695_v29 }
 0x27c   : > { %v1564_v30 = vpop.f32.mrf.mxu1 }
 0x27e   : > { %v744_v31 = vpop.f32.mrf.mxu1 }
 0x280   : > { %v1565_v32 = vpop.f32.mrf.mxu1 }
 0x281   : > { %v760_v35 = vpack.c.bf16 %v1565_v32, %v1564_v30 }
 0x282   : > { %v747_v33 = vpop.f32.mrf.mxu1 }
 0x283   : > { %v759_v34 = vpack.c.bf16 %v747_v33, %v744_v31 }
 0x284   : > { %v1572_v36 = vpop.f32.mrf.mxu1 }
 0x285   : > { %1610 = vmatprep.mubr.bf16.mxu0 %v759_v34 }
 0x286   : > { %v795_v37 = vpop.f32.mrf.mxu1  ;;  %1611 = vmatmul.mubr.bf16.vlgmr.msra.gmra.mxu0 %v760_v35 }
 0x288   : > { %v1573_v38 = vpop.f32.mrf.mxu1 }
 0x289   : > { %v811_v41 = vpack.c.bf16 %v1573_v38, %v1572_v36 }
 0x28a   : > { %v798_v39 = vpop.f32.mrf.mxu1 }
 0x28b   : > { %v810_v40 = vpack.c.bf16 %v798_v39, %v795_v37 }
 0x28d   : > { %1630 = vmatprep.mubr.bf16.mxu1 %v810_v40 }
 0x28e   : > { %1631 = vmatmul.mubr.bf16.vlgmr.msra.gmra.mxu1 %v811_v41 }
 0x2a4   : > { %v1592_v42 = vpop.f32.mrf.mxu1 }
 0x2a6   : > { %v927_v43 = vpop.f32.mrf.mxu1 }
 0x2a8   : > { %v1593_v45 = vpop.f32.mrf.mxu1 }
 0x2aa   : > { %v930_v47 = vpop.f32.mrf.mxu1 }
 0x346   : > { %v1612_v44 = vpop.f32.mrf.mxu0 }
 0x347   : > { %v1033_v49 = vadd.f32 %v1612_v44, %v1592_v42 }
 0x348   : > { %v1024_v46 = vpop.f32.mrf.mxu0 }
 0x349   : > { %v1025_v51 = vadd.f32 %v1024_v46, %v927_v43 }
 0x34a   : > { %v1613_v48 = vpop.f32.mrf.mxu0 }
 0x34b   : > { %v1036_v56 = vadd.f32 %v1613_v48, %v1593_v45 }
 0x34c   : > { %v1027_v54 = vpop.f32.mrf.mxu0 }
 0x34d   : > { %v1028_v61 = vadd.f32 %v1027_v54, %v930_v47 }
 0x34e   : > { %v1632_v50 = vpop.f32.mrf.mxu1 }
 0x34f   : > { %v1155_v52 = vadd.f32 %v1632_v50, %v1033_v49 }
 0x350   : > { %v1138_v55 = vpop.f32.mrf.mxu1 }
 0x351   : > { %v1153_v57 = vadd.f32 %v1138_v55, %v1025_v51  ;;  %v1163_v62 = vadd.f32 %v1159_v53, %v1155_v52 }
 0x352   : > { %v1633_v60 = vpop.f32.mrf.mxu1 }
 0x353   : > { %v1156_v63 = vadd.f32 %v1633_v60, %v1036_v56  ;;  %v1161_v6 = vadd.f32 %v1157_v58, %v1153_v57  ;;  %v1167_v10 = vmax.f32 %v1163_v62, 0.0 }
 0x354   : > { %v1141_v5 = vpop.f32.mrf.mxu1 }
 0x355   : > { %v1164_v7 = vadd.f32 %v1160_v59, %v1156_v63  ;;  %v1154_v8 = vadd.f32 %v1141_v5, %v1028_v61  ;;  %v1165_v13 = vmax.f32 %v1161_v6, 0.0 }
 0x357   : > { %v1168_v11 = vmax.f32 %v1164_v7, 0.0  ;;  %v1162_v12 = vadd.f32 %v1158_v0, %v1154_v8 }
 0x359   : > { %v1403_v1 = vpack.c.bf16 %v1168_v11, %v1167_v10  ;;  %v1166_v14 = vmax.f32 %v1162_v12, 0.0 }
 0x35b   : > { %1405 = vst [vmem:[%s197_s9 + $0x8] sm:$0xff] %v1403_v1   ;;  %v1398_v15 = vpack.c.bf16 %v1166_v14, %v1165_v13 }
 0x35d   : > { %1399 = vst [vmem:[%s197_s9] sm:$0xff] %v1398_v15  }
 0x35e PF: > { %s14_s15 = sadd.s32 1, %s1704_s15  }
 0x35f   : > { %p11_p4 = scmp.ge.s32.totalorder %s14_s15, 4  }
 0x361   :  { %13 = sbr.rel (!%p11_p4) target bundleno = 1 (0x1), region = 71 }

// kernel: apply_hourglass.17
= control target key start
LH: loop header
LB: loop body
LE: loop exit
PB: predicated region body
PF: predicated region fallthrough
CT: control target
= control target key end

     0   :  { %9 = vsyncpa [#allocation3], 0  ;;  %s834_s0 = inlined_call_operand.vmem [shape: bf16[2,32,128], index: 0, kind: input, shape index: {}]   ;;  %s835_s1 = inlined_call_operand.vmem [shape: bf16[2,16,64], index: 1, kind: input, shape index: {}]   ;;  %s836_s2 = inlined_call_operand.vmem [shape: bf16[64,128], index: 2, kind: input, shape index: {}]   ;;  %s837_s3 = inlined_call_operand.vmem [shape: bf16[32,16], index: 3, kind: input, shape index: {}]   ;;  %s838_s4 = inlined_call_operand.hbm [shape: bf16[2,32,128], index: 4, kind: output, shape index: {}]  }
   0x1   :  { %11 = vsyncpa [#allocation3 + $0x1], 0  ;;  %s711_s15 = smov 0   ;;  %s713_s16 = smov 0  }
   0x2   :  { %s715_s17 = smov 0   ;;  %s717_s18 = smov 0  }
   0x3 LB: > { %s732_s19 = sadd.s32 4294967295, %s679_s18   ;;  %s488_s20 = sadd.s32 4294967294, %s679_s18   ;;  %s679_s18 = sphi %s717_s18, %s844_s18   ;;  %s675_s17 = sphi %s715_s17, %s843_s17   ;;  %s671_s16 = sphi %s713_s16, %s842_s16   ;;  %s667_s15 = sphi %s711_s15, %s841_s15  }
   0x4   : > { %s736_s21 = sadd.s32 1, %s679_s18   ;;  %s118_s22 = sadd.s32 1, %s675_s17 }
   0x5   : > { %s115_s23 = ssub.s32 %s679_s18, %s736_s21  ;;  %p128_p0 = scmp.ne.s32.totalorder %s675_s17, %s671_s16 }
   0x6   : > { %p116_p1 = scmp.eq.s32.totalorder %s115_s23, 0  ;;  %p129_p2 = scmp.eq.s32.totalorder %s732_s19, 1 }
   0x7   : > { %p134_p3 = scmp.ne.s32.totalorder %s671_s16, %s667_s15  ;;  %p135_p4 = scmp.eq.s32.totalorder %s488_s20, 1 }
   0x8   : > { %s747_s24 = scalar_select %p116_p1, %s675_s17, %s118_s22  }
   0x9   : > { %p749_p5 = por %p129_p2, %p128_p0  ;;  %p753_p6 = por %p135_p4, %p134_p3 }
   0xa   : > { %p491_p7 = scmp.ge.s32.totalorder %s679_s18, 1  ;;  %p175_p8 = scmp.lt.s32.totalorder %s679_s18, 3 }
   0xc   : > { %p176_p9 = pnand %p491_p7, %p175_p8 }
   0xd   : > { %p206_p10 = scmp.lt.s32.totalorder (!%p176_p9), %s732_s19, 1  ;;  %s203_s6 = sand.u32 (!%p176_p9), 1, %s671_s16  }
   0xe   : > { %179 = sbr.rel (%p176_p9) target bundleno = 456 (0x1c8), region = 36  ;;  %s492_s7 = sshll.u32 (!%p176_p9), %s203_s6, 4 }
   0xf   : > { %s522_s9 = sshll.u32 (!%p176_p9), %s732_s19, 8  ;;  %s794_s13 = scalar_lea.sflag (!%p176_p9), [#allocation3], %s203_s6 }
  0x10   : > { %s792_s12 = scalar_lea.hbm (!%p176_p9), %s838_s4, %s522_s9  ;;  %s683_s14 = smov (!%p176_p9), [#allocation2]  }
  0x11   : > { %s623_s20 = sshll.u32 (!%p176_p9), %s683_s14, 4  ;;  %s624_s20 = int_to_ptr.vmem [resolvable:$false] %s623_s20 }
  0x12   : > { %s625_s22 = scalar_lea.vmem (!%p176_p9), %s624_s20, 512 }
  0x13   : > { %v612_v0 = vld [vmem:[%s836_s2 + $0x18] sm:$0xff]   ;;  %v681_v1 = vmov 0.0   ;;  %v613_v2 = vld [vmem:[%s836_s2 + $0x10] sm:$0xff]   ;;  %vm682_vm0 = vmmov 0   ;;  %s207_s5 = scalar_select %p206_p10, %s732_s19, 1  ;;  %v614_v3 = vld [vmem:[%s836_s2 + $0x8] sm:$0xff]  }
  0x14   : > { %551 = vmatprep.subr.bf16.mxu0 %v681_v1  ;;  %559 = vmatprep.mubr.msk.bf16.mxu0 %vm682_vm0, %v681_v1  ;;  %v615_v4 = vld [vmem:[%s836_s2] sm:$0xff]   ;;  %vm256_vm1 = vcmask 523264   ;;  %vm324_vm2 = vcmask 130048   ;;  %v618_v12 = vld [vmem:[%s837_s3 + $0x8] sm:$0xff]  }
  0x15   : > { %552 = vmatpush3.bf16.msra.mxu0 %v612_v0  ;;  %s517_s8 = sshll.u32 %s207_s5, 3  ;;  %v617_v6 = vld [vmem:[%s837_s3] sm:$0xff]   ;;  %s516_s27 = sshll.u32 %s207_s5, 4 }
  0x16   : > { %553 = vmatprep.subr.bf16.mxu0 %v681_v1  ;;  %s215_s11 = scalar_lea.vmem %s835_s1, %s517_s8  ;;  %565 = vmatprep.mubr.msk.bf16.mxu1 %vm324_vm2, %v617_v6  ;;  %s210_s30 = scalar_lea.vmem %s834_s0, %s516_s27 }
  0x17   : > { %v616_v5 = vld [vmem:[%s215_s11] sm:$0xff]   ;;  %v541_v13 = vld [vmem:[%s210_s30 + $0x8] sm:$0xff]   ;;  %s205_s5 = scalar_lea.vmem [#allocation2], %s492_s7 }
  0x18   : > { %v524_v15 = vld [vmem:[%s210_s30] sm:$0xff]   ;;  %v529_v16 = vunpack.c.l.bf16 %v541_v13  ;;  %v530_v17 = vunpack.c.h.bf16 %v541_v13  ;;  %s414_s8 = sshll.u32 %s205_s5, 4  ;;  %s787_s8 = int_to_ptr.vmem [resolvable:$true] %s414_s8 }
  0x19   : > { %554 = vmatpush3.bf16.msra.mxu0 %v613_v2  ;;  %v525_v19 = vunpack.c.l.bf16 %v524_v15  ;;  %v526_v20 = vunpack.c.h.bf16 %v524_v15  ;;  %s619_s19 = scalar_lea.vmem %s787_s8, 256  ;;  %p626_p0 = scmp.lt.s32.totalorder %s787_s8, %s624_s20 }
  0x1a   : > { %555 = vmatprep.subr.bf16.mxu0 %v681_v1  ;;  %p620_p11 = scmp.ne.s32.totalorder %s787_s8, %s619_s19  ;;  %p627_p1 = scmp.lt.s32.totalorder %s625_s22, %s619_s19 }
  0x1c   : > { %p621_p12 = pnand %p620_p11, %p749_p5  ;;  %p628_p2 = por %p627_p1, %p626_p0 }
  0x1d   : > { %556 = vmatpush3.bf16.msra.mxu0 %v614_v3 }
  0x1e   : > { %557 = vmatprep.subr.bf16.mxu0 %v681_v1  ;;  %p622_p13 = pneg %p621_p12 }
  0x20   : > { %p629_p3 = pnand %p628_p2, %p622_p13 }
  0x21   : > { %558 = vmatpush3.bf16.msra.mxu0 %v615_v4 }
  0x24   : > { %560 = vmatmul.mubr.msk.bf16.vlgmr.msra.gmra.mxu0 %vm256_vm1, %v616_v5 }
  0xe4   : > { %v294_v7 = vpop.f32.mrf.mxu0 }
  0xe6   : > { %v561_v8 = vpop.f32.mrf.mxu0 }
  0xe8   : > { %v297_v9 = vpop.f32.mrf.mxu0 }
  0xe9   : > { %v305_v10 = vpack.c.bf16 %v297_v9, %v294_v7 }
  0xea   : > { %v562_v11 = vpop.f32.mrf.mxu0 }
  0xeb   : > { %563 = vmatprep.subr.bf16.mxu1 %v305_v10 }
  0xec   : > { %564 = vmatpush3.bf16.msra.mxu1 %v305_v10 }
  0xef   : > { %566 = vmatmul.mubr.msk.bf16.vlgmr.msra.gmra.mxu1 %vm324_vm2, %v618_v12 }
 0x1af   : > { %v567_v14 = vpop.f32.mrf.mxu1 }
 0x1b0   : > { %v374_v22 = vadd.f32 %v567_v14, %v529_v16 }
 0x1b1   : > { %v365_v18 = vpop.f32.mrf.mxu1 }
 0x1b2   : > { %v366_v25 = vadd.f32 %v525_v19, %v365_v18 }
 0x1b3   : > { %v568_v21 = vpop.f32.mrf.mxu1 }
 0x1b4   : > { %v377_v23 = vadd.f32 %v568_v21, %v530_v17 }
 0x1b5   : > { %v368_v24 = vpop.f32.mrf.mxu1 }
 0x1b6   : > { %v539_v26 = vpack.c.bf16 %v377_v23, %v374_v22  ;;  %v369_v27 = vadd.f32 %v526_v20, %v368_v24 }
 0x1b8   : > { %542 = vst [vmem:[%s205_s5 + $0x8] sm:$0xff] %v539_v26   ;;  %v534_v28 = vpack.c.bf16 %v369_v27, %v366_v25 }
 0x1ba   : > { %535 = vst [vmem:[%s205_s5] sm:$0xff] %v534_v28  }
 0x1bb   : > { %632 = shalt.err (!%p629_p3)
}
 0x1bc   : > { %s633_s23 = scalar_lea.hbm %s792_s12, 256  ;;  %s637_s29 = scalar_lea.hbm %s838_s4, 512 }
 0x1bd   : > { %p634_p4 = scmp.ne.s32.totalorder %s792_s12, %s633_s23  ;;  %p638_p9 = scmp.lt.s32.totalorder %s792_s12, %s838_s4 }
 0x1be   : > { %p639_p10 = scmp.lt.s32.totalorder %s637_s29, %s633_s23 }
 0x1bf   : > { %p635_p7 = pnand %p634_p4, %p749_p5 }
 0x1c0   : > { %p640_p11 = por %p639_p10, %p638_p9 }
 0x1c1   : > { %p636_p8 = pneg %p635_p7 }
 0x1c3   : > { %p641_p12 = pnand %p640_p11, %p636_p8 }
 0x1c5   : > { %644 = shalt.err (!%p641_p12)
}
 0x1c6   : > { %s684_s7 = smov 64   ;;  %s685_s5 = smov 4  }
 0x1c7   : > { %569 = dma.vmem_to_hbm [thread:$0]  (%p749_p5), %s787_s8, 256, %s792_s12, %s794_s13, %s684_s7, %s684_s7, %s685_s5  }
 0x1c8 PF: > { %p575_p13 = scmp.ge.s32.totalorder %s679_s18, 2  ;;  %s429_s9 = sand.u32 1, %s667_s15  }
 0x1c9   : > { %s430_s10 = scalar_lea.sflag [#allocation3], %s429_s9 }
 0x1ca   : > { %p572_p0 = pnand %p575_p13, %p753_p6 }
 0x1cc   : > { %p573_p1 = pneg %p572_p0 }
 0x1ce   : > { %662 = dma.done.wait (%p573_p1), %s430_s10, 256  }
 0x1cf   : > { %664 = vsyncadd (%p573_p1), %s430_s10, 4294967040  ;;  %p14_p2 = scmp.ge.s32.totalorder %s736_s21, 4   ;;  %s841_s15 = smov %s671_s16 }
 0x1d0   : > { %s842_s16 = smov %s675_s17  ;;  %s843_s17 = smov %s747_s24 }
 0x1d1   : > { %s844_s18 = smov %s736_s21  ;;  %16 = sbr.rel (!%p14_p2) target bundleno = 3 (0x3), region = 74 }
 0x1d6   :  { %435 = vsyncpa [#allocation3], 1 }
 0x1d7   :  { %437 = vsyncpa [#allocation3 + $0x1], 1 }

</bundles_post_ra>
